<compile_context>
chip_gen: v6e
topology: v6e:2x2x1
jax: 0.10.0
libtpu: 0.0.40
codegen_flags: <defaults>
</compile_context>

<pallas_src>
import functools
import math

import jax
import jax.numpy as jnp
from jax.experimental import pallas as pl
from jax.experimental.pallas import tpu as pltpu

# ----------------------------- configuration --------------------------------
NUM_CLASS   = 5
INPUT_DIMS  = 4
SUB_SEQ_LEN = 8
PAD_IDX     = 0
DIM_X       = 32
LAYERS      = 2
HEAD_NUM    = 4
DIM_HEAD    = 8          # dim_head_hidden
FF_HIDDEN   = 64

MM_DTYPE = jnp.bfloat16  # MXU input dtype; accumulation is always float32
LN_EPS   = 1e-5          # PyTorch nn.LayerNorm default


# ----------------------------- in-kernel helpers ----------------------------
def _mm(a, w):
    """bf16 MXU matmul with f32 accumulation."""
    return jnp.dot(a.astype(MM_DTYPE), w.astype(MM_DTYPE),
                   preferred_element_type=jnp.float32)


def _layernorm(x, g, b):
    mu = jnp.mean(x, axis=-1, keepdims=True)
    var = jnp.mean(jnp.square(x - mu), axis=-1, keepdims=True)
    return (x - mu) * jax.lax.rsqrt(var + LN_EPS) * g + b


# ----------------------------- fused forward kernel -------------------------
def _cascade_kernel(x_ref, submask_ref, secmask_ref, pos_ref,
                    emb_w_ref, emb_b_ref, fc_w_ref, fc_b_ref, prj_w_ref,
                    wqkv_ref, bqkv_ref, wo_ref, bo_ref, ln1g_ref, ln1b_ref,
                    ffw1_ref, ffb1_ref, ffw2_ref, ffb2_ref, ln2g_ref, ln2b_ref,
                    out_ref, *, num_sub, sub_seq, dim_x, head_num, dim_head, layers):
    """One batch element per grid step; everything stays in VMEM/vregs."""
    hd = head_num * dim_head
    scale = 1.0 / math.sqrt(dim_head)

    def encoder_layer(x3, key_mask3, idx):
        # x3: (B_, S_, dim_x), key_mask3: (B_, 1, S_)  (post-LN transformer layer)
        B_, S_, D = x3.shape
        xf = x3.reshape(B_ * S_, D)

        # fused QKV: one (D, 3*hd) matmul instead of three narrow ones
        qkv = _mm(xf, wqkv_ref[idx]) + bqkv_ref[idx]                 # (B_*S_, 3*hd) f32
        q3 = qkv[:, 0 * hd:1 * hd].reshape(B_, S_, hd)
        k3 = qkv[:, 1 * hd:2 * hd].reshape(B_, S_, hd)
        v3 = qkv[:, 2 * hd:3 * hd].reshape(B_, S_, hd)

        heads = []
        for h in range(head_num):                                    # static unroll
            sl = slice(h * dim_head, (h + 1) * dim_head)
            qh = q3[:, :, sl].astype(MM_DTYPE)
            kh = k3[:, :, sl].astype(MM_DTYPE)
            vh = v3[:, :, sl].astype(MM_DTYPE)
            s = jnp.einsum('bqd,bkd->bqk', qh, kh,
                           preferred_element_type=jnp.float32) * scale
            s = jnp.where(key_mask3 > 0.0, s, -1e9)                  # key padding mask
            s = s - jnp.max(s, axis=-1, keepdims=True)
            p = jnp.exp(s)
            p = p * pl.reciprocal(jnp.sum(p, axis=-1, keepdims=True), approx=True)
            heads.append(jnp.einsum('bqk,bkd->bqd', p.astype(MM_DTYPE), vh,
                                    preferred_element_type=jnp.float32))
        attn = jnp.concatenate(heads, axis=-1).reshape(B_ * S_, hd)

        # output projection + residual + LayerNorm (fused, no HBM round-trip)
        o = _mm(attn, wo_ref[idx]) + bo_ref[idx] + xf
        o = _layernorm(o, ln1g_ref[idx], ln1b_ref[idx])

        # position-wise feed-forward + residual + LayerNorm
        f = jnp.maximum(_mm(o, ffw1_ref[idx]) + ffb1_ref[idx], 0.0)
        f = _mm(f, ffw2_ref[idx]) + ffb2_ref[idx] + o
        f = _layernorm(f, ln2g_ref[idx], ln2b_ref[idx])
        return f.reshape(B_, S_, D)

    # -- ContinousSeqEmbedding: linear projection + sinusoidal positional enc --
    x_tok = x_ref[0]                                                 # (num_sub*S, input_dims)
    emb = _mm(x_tok, emb_w_ref[...]) + emb_b_ref[...]                # (num_sub*S, dim_x)
    x3 = emb.reshape(num_sub, sub_seq, dim_x) + pos_ref[...][None, :, :]

    # -- first transformer stack: tokens within each sub-sequence --------------
    key_mask1 = submask_ref[0]                                       # (num_sub, 1, S)
    for l in range(layers):
        x3 = encoder_layer(x3, key_mask1, l)

    # -- fc: Linear(sub_seq_len -> 1) over token axis == weighted token pooling
    second = jnp.sum(x3 * fc_w_ref[...][None, :, :], axis=1) + fc_b_ref[...]
    y3 = second.reshape(1, num_sub, dim_x)                           # (1, num_sub, dim_x)

    # -- second transformer stack: over sub-sequence summaries -----------------
    key_mask2 = secmask_ref[...]                                     # (1, 1, num_sub)
    for l in range(layers):
        y3 = encoder_layer(y3, key_mask2, layers + l)

    # -- mean pooling over all sub-seq positions (matches reference) + proj ----
    pooled = jnp.mean(y3, axis=1)                                    # (1, dim_x)
    logits = _mm(pooled, prj_w_ref[...])                             # (1, num_class), no bias
    out_ref[0] = logits.astype(out_ref.dtype)


# ----------------------------- wrapper ---------------------------------------
def sinusoid_pos_table(n_position, d_model):
    pos = jnp.arange(n_position, dtype=jnp.float32)[:, None]
    i = jnp.arange(d_model, dtype=jnp.float32)[None, :]
    angle = pos / jnp.power(10000.0, (2.0 * jnp.floor(i / 2.0)) / d_model)
    idx = jnp.arange(d_model)[None, :]
    return jnp.where(idx % 2 == 0, jnp.sin(angle), jnp.cos(angle)).astype(jnp.float32)


def _replicated_spec(arr):
    nd = arr.ndim
    return pl.BlockSpec(arr.shape, lambda b, _nd=nd: (0,) * _nd)


def forward(params, x, x_mask):
    """x: (batch, n, input_dims) float, x_mask: (batch, 1, n) float (1=valid)."""
    batch, n, num_emb = x.shape

    # pad sequence length up to a multiple of sub_seq_len (pad value = pad_idx)
    append = n % SUB_SEQ_LEN
    if append > 0:
        pad_len = SUB_SEQ_LEN - append
        x = jnp.concatenate(
            [x, PAD_IDX * jnp.ones((batch, pad_len, num_emb), x.dtype)], axis=1)
        x_mask = jnp.concatenate(
            [x_mask, PAD_IDX * jnp.ones((batch, 1, pad_len), x_mask.dtype)], axis=2)
        n = n + pad_len
    num_sub = n // SUB_SEQ_LEN

    sub_mask = x_mask.reshape(batch, num_sub, 1, SUB_SEQ_LEN).astype(jnp.float32)
    second_mask = (jnp.sum(
        x_mask.reshape(batch, 1, num_sub, SUB_SEQ_LEN), axis=-1) > 0
    ).astype(jnp.float32)                                            # (batch, 1, num_sub)

    pos = sinusoid_pos_table(SUB_SEQ_LEN, DIM_X)

    inputs = [
        x.astype(jnp.float32), sub_mask, second_mask, pos,
        params['emb_w'], params['emb_b'], params['fc_w'], params['fc_b'],
        params['prj_w'],
        params['wqkv'], params['bqkv'], params['wo'], params['bo'],
        params['ln1_g'], params['ln1_b'], params['ff_w1'], params['ff_b1'],
        params['ff_w2'], params['ff_b2'], params['ln2_g'], params['ln2_b'],
    ]

    in_specs = [
        pl.BlockSpec((1, n, num_emb), lambda b: (b, 0, 0)),
        pl.BlockSpec((1, num_sub, 1, SUB_SEQ_LEN), lambda b: (b, 0, 0, 0)),
        pl.BlockSpec((1, 1, num_sub), lambda b: (b, 0, 0)),
    ] + [_replicated_spec(a) for a in inputs[3:]]                    # weights: VMEM-resident

    kernel = functools.partial(
        _cascade_kernel, num_sub=num_sub, sub_seq=SUB_SEQ_LEN, dim_x=DIM_X,
        head_num=HEAD_NUM, dim_head=DIM_HEAD, layers=LAYERS)

    out = pl.pallas_call(
        kernel,
        out_shape=jax.ShapeDtypeStruct((batch, 1, NUM_CLASS), jnp.float32),
        grid=(batch,),
        in_specs=in_specs,
        out_specs=pl.BlockSpec((1, 1, NUM_CLASS), lambda b: (b, 0, 0)),
        compiler_params=pltpu.CompilerParams(
            dimension_semantics=("parallel",)),       # both TensorCores on v7x
    )(*inputs)
    return out[:, 0, :]


# ----------------------------- parameter init -------------------------------
def init_params(key):
    keys = iter(jax.random.split(key, 64))

    def nrm(shape, scale=0.05, dtype=MM_DTYPE):
        return (scale * jax.random.normal(next(keys), shape, jnp.float32)).astype(dtype)

    L2 = 2 * LAYERS                     # trans1 layers followed by trans2 layers
    hd = HEAD_NUM * DIM_HEAD
    params = dict(
        emb_w=nrm((INPUT_DIMS, DIM_X)),
        emb_b=jnp.zeros((1, DIM_X), jnp.float32),
        # per-layer weights stacked along a leading [trans1_l0, trans1_l1, trans2_l0, trans2_l1] axis
        wqkv=nrm((L2, DIM_X, 3 * hd)),
        bqkv=jnp.zeros((L2, 1, 3 * hd), jnp.float32),
        wo=nrm((L2, hd, DIM_X)),
        bo=jnp.zeros((L2, 1, DIM_X), jnp.float32),
        ln1_g=jnp.ones((L2, 1, DIM_X), jnp.float32),
        ln1_b=jnp.zeros((L2, 1, DIM_X), jnp.float32),
        ff_w1=nrm((L2, DIM_X, FF_HIDDEN)),
        ff_b1=jnp.zeros((L2, 1, FF_HIDDEN), jnp.float32),
        ff_w2=nrm((L2, FF_HIDDEN, DIM_X)),
        ff_b2=jnp.zeros((L2, 1, DIM_X), jnp.float32),
        ln2_g=jnp.ones((L2, 1, DIM_X), jnp.float32),
        ln2_b=jnp.zeros((L2, 1, DIM_X), jnp.float32),
        fc_w=nrm((SUB_SEQ_LEN, 1), dtype=jnp.float32),
        fc_b=jnp.zeros((1, 1), jnp.float32),
        prj_w=nrm((DIM_X, NUM_CLASS)),
    )
    return params


# ----------------------------------- main ------------------------------------
if __name__ == "__main__":
    key = jax.random.PRNGKey(0)
    pkey, xkey = jax.random.split(key)
    params = init_params(pkey)

    batch, n = 2, 12     # n % sub_seq_len != 0 -> exercises the padding branch
    x = jax.random.normal(xkey, (batch, n, INPUT_DIMS), jnp.float32)
    x_mask = jnp.ones((batch, 1, n), jnp.float32)

    out = jax.jit(forward)(params, x, x_mask)
    out = jax.block_until_ready(out)
    assert out.shape == (batch, NUM_CLASS), out.shape
    assert jnp.all(jnp.isfinite(out))
    print("KERNEL_OK")
</pallas_src>

<mosaic_0001>
module attributes {stable_mosaic.version = 11 : i64} {
  func.func @_cascade_kernel(%arg0: i32, %arg1: memref<1x16x4xf32, #tpu.memory_space<vmem>>, %arg2: memref<1x2x1x8xf32, #tpu.memory_space<vmem>>, %arg3: memref<1x1x2xf32, #tpu.memory_space<vmem>>, %arg4: memref<8x32xf32, #tpu.memory_space<vmem>>, %arg5: memref<4x32xbf16, #tpu.memory_space<vmem>>, %arg6: memref<1x32xf32, #tpu.memory_space<vmem>>, %arg7: memref<8x1xf32, #tpu.memory_space<vmem>>, %arg8: memref<1x1xf32, #tpu.memory_space<vmem>>, %arg9: memref<32x5xbf16, #tpu.memory_space<vmem>>, %arg10: memref<4x32x96xbf16, #tpu.memory_space<vmem>>, %arg11: memref<4x1x96xf32, #tpu.memory_space<vmem>>, %arg12: memref<4x32x32xbf16, #tpu.memory_space<vmem>>, %arg13: memref<4x1x32xf32, #tpu.memory_space<vmem>>, %arg14: memref<4x1x32xf32, #tpu.memory_space<vmem>>, %arg15: memref<4x1x32xf32, #tpu.memory_space<vmem>>, %arg16: memref<4x32x64xbf16, #tpu.memory_space<vmem>>, %arg17: memref<4x1x64xf32, #tpu.memory_space<vmem>>, %arg18: memref<4x64x32xbf16, #tpu.memory_space<vmem>>, %arg19: memref<4x1x32xf32, #tpu.memory_space<vmem>>, %arg20: memref<4x1x32xf32, #tpu.memory_space<vmem>>, %arg21: memref<4x1x32xf32, #tpu.memory_space<vmem>>, %arg22: memref<1x1x5xf32, #tpu.memory_space<vmem>>) attributes {dimension_semantics = [#tpu.dimension_semantics<parallel>], iteration_bounds = array<i64: 2>, scalar_prefetch = 0 : i64, scratch_operands = 0 : i64, tpu.core_type = #tpu.core_type<tc>, window_params = [{transform_indices = @transform_0, window_bounds = array<i64: 1, 16, 4>}, {transform_indices = @transform_1, window_bounds = array<i64: 1, 2, 1, 8>}, {transform_indices = @transform_2, window_bounds = array<i64: 1, 1, 2>}, {pipeline_mode = #tpu.pipeline_mode<synchronous>, transform_indices = @transform_3, window_bounds = array<i64: 8, 32>}, {pipeline_mode = #tpu.pipeline_mode<synchronous>, transform_indices = @transform_4, window_bounds = array<i64: 4, 32>}, {pipeline_mode = #tpu.pipeline_mode<synchronous>, transform_indices = @transform_5, window_bounds = array<i64: 1, 32>}, {pipeline_mode = #tpu.pipeline_mode<synchronous>, transform_indices = @transform_6, window_bounds = array<i64: 8, 1>}, {pipeline_mode = #tpu.pipeline_mode<synchronous>, transform_indices = @transform_7, window_bounds = array<i64: 1, 1>}, {pipeline_mode = #tpu.pipeline_mode<synchronous>, transform_indices = @transform_8, window_bounds = array<i64: 32, 5>}, {pipeline_mode = #tpu.pipeline_mode<synchronous>, transform_indices = @transform_9, window_bounds = array<i64: 4, 32, 96>}, {pipeline_mode = #tpu.pipeline_mode<synchronous>, transform_indices = @transform_10, window_bounds = array<i64: 4, 1, 96>}, {pipeline_mode = #tpu.pipeline_mode<synchronous>, transform_indices = @transform_11, window_bounds = array<i64: 4, 32, 32>}, {pipeline_mode = #tpu.pipeline_mode<synchronous>, transform_indices = @transform_12, window_bounds = array<i64: 4, 1, 32>}, {pipeline_mode = #tpu.pipeline_mode<synchronous>, transform_indices = @transform_13, window_bounds = array<i64: 4, 1, 32>}, {pipeline_mode = #tpu.pipeline_mode<synchronous>, transform_indices = @transform_14, window_bounds = array<i64: 4, 1, 32>}, {pipeline_mode = #tpu.pipeline_mode<synchronous>, transform_indices = @transform_15, window_bounds = array<i64: 4, 32, 64>}, {pipeline_mode = #tpu.pipeline_mode<synchronous>, transform_indices = @transform_16, window_bounds = array<i64: 4, 1, 64>}, {pipeline_mode = #tpu.pipeline_mode<synchronous>, transform_indices = @transform_17, window_bounds = array<i64: 4, 64, 32>}, {pipeline_mode = #tpu.pipeline_mode<synchronous>, transform_indices = @transform_18, window_bounds = array<i64: 4, 1, 32>}, {pipeline_mode = #tpu.pipeline_mode<synchronous>, transform_indices = @transform_19, window_bounds = array<i64: 4, 1, 32>}, {pipeline_mode = #tpu.pipeline_mode<synchronous>, transform_indices = @transform_20, window_bounds = array<i64: 4, 1, 32>}, {transform_indices = @transform_21, window_bounds = array<i64: 1, 1, 5>}]} {
    %c0 = arith.constant 0 : index
    %c0_0 = arith.constant 0 : index
    %c0_1 = arith.constant 0 : index
    %0 = vector.load %arg1[%c0, %c0_0, %c0_1] : memref<1x16x4xf32, #tpu.memory_space<vmem>>, vector<1x16x4xf32>
    %1 = vector.shape_cast %0 : vector<1x16x4xf32> to vector<16x4xf32>
    %c0_2 = arith.constant 0 : index
    %c0_3 = arith.constant 0 : index
    %2 = vector.load %arg5[%c0_2, %c0_3] : memref<4x32xbf16, #tpu.memory_space<vmem>>, vector<4x32xbf16>
    %3 = arith.truncf %1 : vector<16x4xf32> to vector<16x4xbf16>
    %cst = arith.constant dense<0.000000e+00> : vector<16x32xf32>
    %4 = tpu.matmul %3, %2, %cst {dimension_numbers = #tpu.dot_dimension_numbers<[1], [0], [0], [1], [0, 0, 1, 1], [], []>} : vector<16x4xbf16>, vector<4x32xbf16>, vector<16x32xf32> -> vector<16x32xf32>
    %c0_4 = arith.constant 0 : index
    %c0_5 = arith.constant 0 : index
    %5 = vector.load %arg6[%c0_4, %c0_5] : memref<1x32xf32, #tpu.memory_space<vmem>>, vector<1x32xf32>
    %6 = vector.broadcast %5 : vector<1x32xf32> to vector<16x32xf32>
    %7 = arith.addf %4, %6 : vector<16x32xf32>
    %8 = vector.shape_cast %7 : vector<16x32xf32> to vector<2x8x32xf32>
    %c0_6 = arith.constant 0 : index
    %c0_7 = arith.constant 0 : index
    %9 = vector.load %arg4[%c0_6, %c0_7] : memref<8x32xf32, #tpu.memory_space<vmem>>, vector<8x32xf32>
    %10 = vector.shape_cast %9 : vector<8x32xf32> to vector<1x8x32xf32>
    %11 = vector.broadcast %10 : vector<1x8x32xf32> to vector<2x8x32xf32>
    %12 = arith.addf %8, %11 : vector<2x8x32xf32>
    %c0_8 = arith.constant 0 : index
    %c0_9 = arith.constant 0 : index
    %c0_10 = arith.constant 0 : index
    %c0_11 = arith.constant 0 : index
    %13 = vector.load %arg2[%c0_8, %c0_9, %c0_10, %c0_11] : memref<1x2x1x8xf32, #tpu.memory_space<vmem>>, vector<1x2x1x8xf32>
    %14 = vector.shape_cast %13 : vector<1x2x1x8xf32> to vector<2x1x8xf32>
    %15 = vector.shape_cast %12 : vector<2x8x32xf32> to vector<16x32xf32>
    %c0_12 = arith.constant 0 : index
    %c0_13 = arith.constant 0 : index
    %c0_14 = arith.constant 0 : index
    %16 = vector.load %arg10[%c0_12, %c0_13, %c0_14] : memref<4x32x96xbf16, #tpu.memory_space<vmem>>, vector<1x32x96xbf16>
    %17 = vector.shape_cast %16 : vector<1x32x96xbf16> to vector<32x96xbf16>
    %18 = arith.truncf %15 : vector<16x32xf32> to vector<16x32xbf16>
    %cst_15 = arith.constant dense<0.000000e+00> : vector<16x96xf32>
    %19 = tpu.matmul %18, %17, %cst_15 {dimension_numbers = #tpu.dot_dimension_numbers<[1], [0], [0], [1], [0, 0, 1, 1], [], []>} : vector<16x32xbf16>, vector<32x96xbf16>, vector<16x96xf32> -> vector<16x96xf32>
    %c0_16 = arith.constant 0 : index
    %c0_17 = arith.constant 0 : index
    %c0_18 = arith.constant 0 : index
    %20 = vector.load %arg11[%c0_16, %c0_17, %c0_18] : memref<4x1x96xf32, #tpu.memory_space<vmem>>, vector<1x1x96xf32>
    %21 = vector.shape_cast %20 : vector<1x1x96xf32> to vector<1x96xf32>
    %22 = vector.broadcast %21 : vector<1x96xf32> to vector<16x96xf32>
    %23 = arith.addf %19, %22 : vector<16x96xf32>
    %24 = vector.extract_strided_slice %23 {offsets = [0, 0], sizes = [16, 32], strides = [1, 1]} : vector<16x96xf32> to vector<16x32xf32>
    %25 = vector.shape_cast %24 : vector<16x32xf32> to vector<2x8x32xf32>
    %26 = vector.extract_strided_slice %23 {offsets = [0, 32], sizes = [16, 32], strides = [1, 1]} : vector<16x96xf32> to vector<16x32xf32>
    %27 = vector.shape_cast %26 : vector<16x32xf32> to vector<2x8x32xf32>
    %28 = vector.extract_strided_slice %23 {offsets = [0, 64], sizes = [16, 32], strides = [1, 1]} : vector<16x96xf32> to vector<16x32xf32>
    %29 = vector.shape_cast %28 : vector<16x32xf32> to vector<2x8x32xf32>
    %30 = vector.extract_strided_slice %25 {offsets = [0, 0, 0], sizes = [2, 8, 8], strides = [1, 1, 1]} : vector<2x8x32xf32> to vector<2x8x8xf32>
    %31 = arith.truncf %30 : vector<2x8x8xf32> to vector<2x8x8xbf16>
    %32 = vector.extract_strided_slice %27 {offsets = [0, 0, 0], sizes = [2, 8, 8], strides = [1, 1, 1]} : vector<2x8x32xf32> to vector<2x8x8xf32>
    %33 = arith.truncf %32 : vector<2x8x8xf32> to vector<2x8x8xbf16>
    %34 = vector.extract_strided_slice %29 {offsets = [0, 0, 0], sizes = [2, 8, 8], strides = [1, 1, 1]} : vector<2x8x32xf32> to vector<2x8x8xf32>
    %35 = arith.truncf %34 : vector<2x8x8xf32> to vector<2x8x8xbf16>
    "tpu.trace_start"() <{level = 10 : i32, message = "bqd,bkd->bqk"}> : () -> ()
    %cst_19 = arith.constant dense<0.000000e+00> : vector<2x8x8xf32>
    %36 = tpu.matmul %31, %33, %cst_19 {dimension_numbers = #tpu.dot_dimension_numbers<[2], [2], [1], [1], [0, 0, 0, 1, 1, 1], [0], [0]>} : vector<2x8x8xbf16>, vector<2x8x8xbf16>, vector<2x8x8xf32> -> vector<2x8x8xf32>
    "tpu.trace_stop"() : () -> ()
    %cst_20 = arith.constant 0.353553385 : f32
    %37 = vector.broadcast %cst_20 : f32 to vector<2x8x8xf32>
    %38 = arith.mulf %36, %37 : vector<2x8x8xf32>
    %cst_21 = arith.constant 0.000000e+00 : f32
    %39 = vector.broadcast %cst_21 : f32 to vector<2x1x8xf32>
    %40 = arith.cmpf ogt, %14, %39 : vector<2x1x8xf32>
    %cst_22 = arith.constant -1.000000e+09 : f32
    %41 = vector.shape_cast %40 : vector<2x1x8xi1> to vector<2x1x8xi1>
    %42 = vector.broadcast %41 : vector<2x1x8xi1> to vector<2x8x8xi1>
    %43 = vector.broadcast %cst_22 : f32 to vector<2x8x8xf32>
    %44 = arith.select %42, %38, %43 : vector<2x8x8xi1>, vector<2x8x8xf32>
    %cst_23 = arith.constant dense<0xFF800000> : vector<2x8xf32>
    %45 = vector.multi_reduction <maximumf>, %44, %cst_23 [2] : vector<2x8x8xf32> to vector<2x8xf32>
    %46 = vector.shape_cast %45 : vector<2x8xf32> to vector<2x8x1xf32>
    %47 = vector.broadcast %46 : vector<2x8x1xf32> to vector<2x8x8xf32>
    %48 = arith.subf %44, %47 : vector<2x8x8xf32>
    %49 = math.exp %48 : vector<2x8x8xf32>
    %cst_24 = arith.constant dense<0.000000e+00> : vector<2x8xf32>
    %50 = vector.multi_reduction <add>, %49, %cst_24 [2] : vector<2x8x8xf32> to vector<2x8xf32>
    %51 = vector.shape_cast %50 : vector<2x8xf32> to vector<2x8x1xf32>
    %52 = tpu.reciprocal %51 {approx = true} : vector<2x8x1xf32> -> vector<2x8x1xf32>
    %53 = vector.broadcast %52 : vector<2x8x1xf32> to vector<2x8x8xf32>
    %54 = arith.mulf %49, %53 : vector<2x8x8xf32>
    %55 = arith.truncf %54 : vector<2x8x8xf32> to vector<2x8x8xbf16>
    "tpu.trace_start"() <{level = 10 : i32, message = "bqk,bkd->bqd"}> : () -> ()
    %cst_25 = arith.constant dense<0.000000e+00> : vector<2x8x8xf32>
    %56 = tpu.matmul %55, %35, %cst_25 {dimension_numbers = #tpu.dot_dimension_numbers<[2], [1], [1], [2], [0, 0, 0, 1, 1, 2], [0], [0]>} : vector<2x8x8xbf16>, vector<2x8x8xbf16>, vector<2x8x8xf32> -> vector<2x8x8xf32>
    "tpu.trace_stop"() : () -> ()
    %57 = vector.extract_strided_slice %25 {offsets = [0, 0, 8], sizes = [2, 8, 8], strides = [1, 1, 1]} : vector<2x8x32xf32> to vector<2x8x8xf32>
    %58 = arith.truncf %57 : vector<2x8x8xf32> to vector<2x8x8xbf16>
    %59 = vector.extract_strided_slice %27 {offsets = [0, 0, 8], sizes = [2, 8, 8], strides = [1, 1, 1]} : vector<2x8x32xf32> to vector<2x8x8xf32>
    %60 = arith.truncf %59 : vector<2x8x8xf32> to vector<2x8x8xbf16>
    %61 = vector.extract_strided_slice %29 {offsets = [0, 0, 8], sizes = [2, 8, 8], strides = [1, 1, 1]} : vector<2x8x32xf32> to vector<2x8x8xf32>
    %62 = arith.truncf %61 : vector<2x8x8xf32> to vector<2x8x8xbf16>
    "tpu.trace_start"() <{level = 10 : i32, message = "bqd,bkd->bqk"}> : () -> ()
    %cst_26 = arith.constant dense<0.000000e+00> : vector<2x8x8xf32>
    %63 = tpu.matmul %58, %60, %cst_26 {dimension_numbers = #tpu.dot_dimension_numbers<[2], [2], [1], [1], [0, 0, 0, 1, 1, 1], [0], [0]>} : vector<2x8x8xbf16>, vector<2x8x8xbf16>, vector<2x8x8xf32> -> vector<2x8x8xf32>
    "tpu.trace_stop"() : () -> ()
    %cst_27 = arith.constant 0.353553385 : f32
    %64 = vector.broadcast %cst_27 : f32 to vector<2x8x8xf32>
    %65 = arith.mulf %63, %64 : vector<2x8x8xf32>
    %cst_28 = arith.constant 0.000000e+00 : f32
    %66 = vector.broadcast %cst_28 : f32 to vector<2x1x8xf32>
    %67 = arith.cmpf ogt, %14, %66 : vector<2x1x8xf32>
    %cst_29 = arith.constant -1.000000e+09 : f32
    %68 = vector.shape_cast %67 : vector<2x1x8xi1> to vector<2x1x8xi1>
    %69 = vector.broadcast %68 : vector<2x1x8xi1> to vector<2x8x8xi1>
    %70 = vector.broadcast %cst_29 : f32 to vector<2x8x8xf32>
    %71 = arith.select %69, %65, %70 : vector<2x8x8xi1>, vector<2x8x8xf32>
    %cst_30 = arith.constant dense<0xFF800000> : vector<2x8xf32>
    %72 = vector.multi_reduction <maximumf>, %71, %cst_30 [2] : vector<2x8x8xf32> to vector<2x8xf32>
    %73 = vector.shape_cast %72 : vector<2x8xf32> to vector<2x8x1xf32>
    %74 = vector.broadcast %73 : vector<2x8x1xf32> to vector<2x8x8xf32>
    %75 = arith.subf %71, %74 : vector<2x8x8xf32>
    %76 = math.exp %75 : vector<2x8x8xf32>
    %cst_31 = arith.constant dense<0.000000e+00> : vector<2x8xf32>
    %77 = vector.multi_reduction <add>, %76, %cst_31 [2] : vector<2x8x8xf32> to vector<2x8xf32>
    %78 = vector.shape_cast %77 : vector<2x8xf32> to vector<2x8x1xf32>
    %79 = tpu.reciprocal %78 {approx = true} : vector<2x8x1xf32> -> vector<2x8x1xf32>
    %80 = vector.broadcast %79 : vector<2x8x1xf32> to vector<2x8x8xf32>
    %81 = arith.mulf %76, %80 : vector<2x8x8xf32>
    %82 = arith.truncf %81 : vector<2x8x8xf32> to vector<2x8x8xbf16>
    "tpu.trace_start"() <{level = 10 : i32, message = "bqk,bkd->bqd"}> : () -> ()
    %cst_32 = arith.constant dense<0.000000e+00> : vector<2x8x8xf32>
    %83 = tpu.matmul %82, %62, %cst_32 {dimension_numbers = #tpu.dot_dimension_numbers<[2], [1], [1], [2], [0, 0, 0, 1, 1, 2], [0], [0]>} : vector<2x8x8xbf16>, vector<2x8x8xbf16>, vector<2x8x8xf32> -> vector<2x8x8xf32>
    "tpu.trace_stop"() : () -> ()
    %84 = vector.extract_strided_slice %25 {offsets = [0, 0, 16], sizes = [2, 8, 8], strides = [1, 1, 1]} : vector<2x8x32xf32> to vector<2x8x8xf32>
    %85 = arith.truncf %84 : vector<2x8x8xf32> to vector<2x8x8xbf16>
    %86 = vector.extract_strided_slice %27 {offsets = [0, 0, 16], sizes = [2, 8, 8], strides = [1, 1, 1]} : vector<2x8x32xf32> to vector<2x8x8xf32>
    %87 = arith.truncf %86 : vector<2x8x8xf32> to vector<2x8x8xbf16>
    %88 = vector.extract_strided_slice %29 {offsets = [0, 0, 16], sizes = [2, 8, 8], strides = [1, 1, 1]} : vector<2x8x32xf32> to vector<2x8x8xf32>
    %89 = arith.truncf %88 : vector<2x8x8xf32> to vector<2x8x8xbf16>
    "tpu.trace_start"() <{level = 10 : i32, message = "bqd,bkd->bqk"}> : () -> ()
    %cst_33 = arith.constant dense<0.000000e+00> : vector<2x8x8xf32>
    %90 = tpu.matmul %85, %87, %cst_33 {dimension_numbers = #tpu.dot_dimension_numbers<[2], [2], [1], [1], [0, 0, 0, 1, 1, 1], [0], [0]>} : vector<2x8x8xbf16>, vector<2x8x8xbf16>, vector<2x8x8xf32> -> vector<2x8x8xf32>
    "tpu.trace_stop"() : () -> ()
    %cst_34 = arith.constant 0.353553385 : f32
    %91 = vector.broadcast %cst_34 : f32 to vector<2x8x8xf32>
    %92 = arith.mulf %90, %91 : vector<2x8x8xf32>
    %cst_35 = arith.constant 0.000000e+00 : f32
    %93 = vector.broadcast %cst_35 : f32 to vector<2x1x8xf32>
    %94 = arith.cmpf ogt, %14, %93 : vector<2x1x8xf32>
    %cst_36 = arith.constant -1.000000e+09 : f32
    %95 = vector.shape_cast %94 : vector<2x1x8xi1> to vector<2x1x8xi1>
    %96 = vector.broadcast %95 : vector<2x1x8xi1> to vector<2x8x8xi1>
    %97 = vector.broadcast %cst_36 : f32 to vector<2x8x8xf32>
    %98 = arith.select %96, %92, %97 : vector<2x8x8xi1>, vector<2x8x8xf32>
    %cst_37 = arith.constant dense<0xFF800000> : vector<2x8xf32>
    %99 = vector.multi_reduction <maximumf>, %98, %cst_37 [2] : vector<2x8x8xf32> to vector<2x8xf32>
    %100 = vector.shape_cast %99 : vector<2x8xf32> to vector<2x8x1xf32>
    %101 = vector.broadcast %100 : vector<2x8x1xf32> to vector<2x8x8xf32>
    %102 = arith.subf %98, %101 : vector<2x8x8xf32>
    %103 = math.exp %102 : vector<2x8x8xf32>
    %cst_38 = arith.constant dense<0.000000e+00> : vector<2x8xf32>
    %104 = vector.multi_reduction <add>, %103, %cst_38 [2] : vector<2x8x8xf32> to vector<2x8xf32>
    %105 = vector.shape_cast %104 : vector<2x8xf32> to vector<2x8x1xf32>
    %106 = tpu.reciprocal %105 {approx = true} : vector<2x8x1xf32> -> vector<2x8x1xf32>
    %107 = vector.broadcast %106 : vector<2x8x1xf32> to vector<2x8x8xf32>
    %108 = arith.mulf %103, %107 : vector<2x8x8xf32>
    %109 = arith.truncf %108 : vector<2x8x8xf32> to vector<2x8x8xbf16>
    "tpu.trace_start"() <{level = 10 : i32, message = "bqk,bkd->bqd"}> : () -> ()
    %cst_39 = arith.constant dense<0.000000e+00> : vector<2x8x8xf32>
    %110 = tpu.matmul %109, %89, %cst_39 {dimension_numbers = #tpu.dot_dimension_numbers<[2], [1], [1], [2], [0, 0, 0, 1, 1, 2], [0], [0]>} : vector<2x8x8xbf16>, vector<2x8x8xbf16>, vector<2x8x8xf32> -> vector<2x8x8xf32>
    "tpu.trace_stop"() : () -> ()
    %111 = vector.extract_strided_slice %25 {offsets = [0, 0, 24], sizes = [2, 8, 8], strides = [1, 1, 1]} : vector<2x8x32xf32> to vector<2x8x8xf32>
    %112 = arith.truncf %111 : vector<2x8x8xf32> to vector<2x8x8xbf16>
    %113 = vector.extract_strided_slice %27 {offsets = [0, 0, 24], sizes = [2, 8, 8], strides = [1, 1, 1]} : vector<2x8x32xf32> to vector<2x8x8xf32>
    %114 = arith.truncf %113 : vector<2x8x8xf32> to vector<2x8x8xbf16>
    %115 = vector.extract_strided_slice %29 {offsets = [0, 0, 24], sizes = [2, 8, 8], strides = [1, 1, 1]} : vector<2x8x32xf32> to vector<2x8x8xf32>
    %116 = arith.truncf %115 : vector<2x8x8xf32> to vector<2x8x8xbf16>
    "tpu.trace_start"() <{level = 10 : i32, message = "bqd,bkd->bqk"}> : () -> ()
    %cst_40 = arith.constant dense<0.000000e+00> : vector<2x8x8xf32>
    %117 = tpu.matmul %112, %114, %cst_40 {dimension_numbers = #tpu.dot_dimension_numbers<[2], [2], [1], [1], [0, 0, 0, 1, 1, 1], [0], [0]>} : vector<2x8x8xbf16>, vector<2x8x8xbf16>, vector<2x8x8xf32> -> vector<2x8x8xf32>
    "tpu.trace_stop"() : () -> ()
    %cst_41 = arith.constant 0.353553385 : f32
    %118 = vector.broadcast %cst_41 : f32 to vector<2x8x8xf32>
    %119 = arith.mulf %117, %118 : vector<2x8x8xf32>
    %cst_42 = arith.constant 0.000000e+00 : f32
    %120 = vector.broadcast %cst_42 : f32 to vector<2x1x8xf32>
    %121 = arith.cmpf ogt, %14, %120 : vector<2x1x8xf32>
    %cst_43 = arith.constant -1.000000e+09 : f32
    %122 = vector.shape_cast %121 : vector<2x1x8xi1> to vector<2x1x8xi1>
    %123 = vector.broadcast %122 : vector<2x1x8xi1> to vector<2x8x8xi1>
    %124 = vector.broadcast %cst_43 : f32 to vector<2x8x8xf32>
    %125 = arith.select %123, %119, %124 : vector<2x8x8xi1>, vector<2x8x8xf32>
    %cst_44 = arith.constant dense<0xFF800000> : vector<2x8xf32>
    %126 = vector.multi_reduction <maximumf>, %125, %cst_44 [2] : vector<2x8x8xf32> to vector<2x8xf32>
    %127 = vector.shape_cast %126 : vector<2x8xf32> to vector<2x8x1xf32>
    %128 = vector.broadcast %127 : vector<2x8x1xf32> to vector<2x8x8xf32>
    %129 = arith.subf %125, %128 : vector<2x8x8xf32>
    %130 = math.exp %129 : vector<2x8x8xf32>
    %cst_45 = arith.constant dense<0.000000e+00> : vector<2x8xf32>
    %131 = vector.multi_reduction <add>, %130, %cst_45 [2] : vector<2x8x8xf32> to vector<2x8xf32>
    %132 = vector.shape_cast %131 : vector<2x8xf32> to vector<2x8x1xf32>
    %133 = tpu.reciprocal %132 {approx = true} : vector<2x8x1xf32> -> vector<2x8x1xf32>
    %134 = vector.broadcast %133 : vector<2x8x1xf32> to vector<2x8x8xf32>
    %135 = arith.mulf %130, %134 : vector<2x8x8xf32>
    %136 = arith.truncf %135 : vector<2x8x8xf32> to vector<2x8x8xbf16>
    "tpu.trace_start"() <{level = 10 : i32, message = "bqk,bkd->bqd"}> : () -> ()
    %cst_46 = arith.constant dense<0.000000e+00> : vector<2x8x8xf32>
    %137 = tpu.matmul %136, %116, %cst_46 {dimension_numbers = #tpu.dot_dimension_numbers<[2], [1], [1], [2], [0, 0, 0, 1, 1, 2], [0], [0]>} : vector<2x8x8xbf16>, vector<2x8x8xbf16>, vector<2x8x8xf32> -> vector<2x8x8xf32>
    "tpu.trace_stop"() : () -> ()
    %138 = tpu.concatenate %56, %83, %110, %137 in 2 : vector<2x8x8xf32>, vector<2x8x8xf32>, vector<2x8x8xf32>, vector<2x8x8xf32> -> vector<2x8x32xf32>
    %139 = vector.shape_cast %138 : vector<2x8x32xf32> to vector<16x32xf32>
    %c0_47 = arith.constant 0 : index
    %c0_48 = arith.constant 0 : index
    %c0_49 = arith.constant 0 : index
    %140 = vector.load %arg12[%c0_47, %c0_48, %c0_49] : memref<4x32x32xbf16, #tpu.memory_space<vmem>>, vector<1x32x32xbf16>
    %141 = vector.shape_cast %140 : vector<1x32x32xbf16> to vector<32x32xbf16>
    %142 = arith.truncf %139 : vector<16x32xf32> to vector<16x32xbf16>
    %cst_50 = arith.constant dense<0.000000e+00> : vector<16x32xf32>
    %143 = tpu.matmul %142, %141, %cst_50 {dimension_numbers = #tpu.dot_dimension_numbers<[1], [0], [0], [1], [0, 0, 1, 1], [], []>} : vector<16x32xbf16>, vector<32x32xbf16>, vector<16x32xf32> -> vector<16x32xf32>
    %c0_51 = arith.constant 0 : index
    %c0_52 = arith.constant 0 : index
    %c0_53 = arith.constant 0 : index
    %144 = vector.load %arg13[%c0_51, %c0_52, %c0_53] : memref<4x1x32xf32, #tpu.memory_space<vmem>>, vector<1x1x32xf32>
    %145 = vector.shape_cast %144 : vector<1x1x32xf32> to vector<1x32xf32>
    %146 = vector.broadcast %145 : vector<1x32xf32> to vector<16x32xf32>
    %147 = arith.addf %143, %146 : vector<16x32xf32>
    %148 = arith.addf %147, %15 : vector<16x32xf32>
    %c0_54 = arith.constant 0 : index
    %c0_55 = arith.constant 0 : index
    %c0_56 = arith.constant 0 : index
    %149 = vector.load %arg14[%c0_54, %c0_55, %c0_56] : memref<4x1x32xf32, #tpu.memory_space<vmem>>, vector<1x1x32xf32>
    %150 = vector.shape_cast %149 : vector<1x1x32xf32> to vector<1x32xf32>
    %c0_57 = arith.constant 0 : index
    %c0_58 = arith.constant 0 : index
    %c0_59 = arith.constant 0 : index
    %151 = vector.load %arg15[%c0_57, %c0_58, %c0_59] : memref<4x1x32xf32, #tpu.memory_space<vmem>>, vector<1x1x32xf32>
    %152 = vector.shape_cast %151 : vector<1x1x32xf32> to vector<1x32xf32>
    %cst_60 = arith.constant dense<0.000000e+00> : vector<16xf32>
    %153 = vector.multi_reduction <add>, %148, %cst_60 [1] : vector<16x32xf32> to vector<16xf32>
    %154 = vector.shape_cast %153 : vector<16xf32> to vector<16x1xf32>
    %cst_61 = arith.constant 3.200000e+01 : f32
    %155 = vector.broadcast %cst_61 : f32 to vector<16x1xf32>
    %156 = arith.divf %154, %155 : vector<16x1xf32>
    %157 = vector.broadcast %156 : vector<16x1xf32> to vector<16x32xf32>
    %158 = arith.subf %148, %157 : vector<16x32xf32>
    %159 = arith.mulf %158, %158 : vector<16x32xf32>
    %cst_62 = arith.constant dense<0.000000e+00> : vector<16xf32>
    %160 = vector.multi_reduction <add>, %159, %cst_62 [1] : vector<16x32xf32> to vector<16xf32>
    %161 = vector.shape_cast %160 : vector<16xf32> to vector<16x1xf32>
    %cst_63 = arith.constant 3.200000e+01 : f32
    %162 = vector.broadcast %cst_63 : f32 to vector<16x1xf32>
    %163 = arith.divf %161, %162 : vector<16x1xf32>
    %164 = vector.broadcast %156 : vector<16x1xf32> to vector<16x32xf32>
    %165 = arith.subf %148, %164 : vector<16x32xf32>
    %cst_64 = arith.constant 9.99999974E-6 : f32
    %166 = vector.broadcast %cst_64 : f32 to vector<16x1xf32>
    %167 = arith.addf %163, %166 : vector<16x1xf32>
    %168 = math.rsqrt %167 : vector<16x1xf32>
    %169 = vector.broadcast %168 : vector<16x1xf32> to vector<16x32xf32>
    %170 = arith.mulf %165, %169 : vector<16x32xf32>
    %171 = vector.broadcast %150 : vector<1x32xf32> to vector<16x32xf32>
    %172 = arith.mulf %170, %171 : vector<16x32xf32>
    %173 = vector.broadcast %152 : vector<1x32xf32> to vector<16x32xf32>
    %174 = arith.addf %172, %173 : vector<16x32xf32>
    %c0_65 = arith.constant 0 : index
    %c0_66 = arith.constant 0 : index
    %c0_67 = arith.constant 0 : index
    %175 = vector.load %arg16[%c0_65, %c0_66, %c0_67] : memref<4x32x64xbf16, #tpu.memory_space<vmem>>, vector<1x32x64xbf16>
    %176 = vector.shape_cast %175 : vector<1x32x64xbf16> to vector<32x64xbf16>
    %177 = arith.truncf %174 : vector<16x32xf32> to vector<16x32xbf16>
    %cst_68 = arith.constant dense<0.000000e+00> : vector<16x64xf32>
    %178 = tpu.matmul %177, %176, %cst_68 {dimension_numbers = #tpu.dot_dimension_numbers<[1], [0], [0], [1], [0, 0, 1, 1], [], []>} : vector<16x32xbf16>, vector<32x64xbf16>, vector<16x64xf32> -> vector<16x64xf32>
    %c0_69 = arith.constant 0 : index
    %c0_70 = arith.constant 0 : index
    %c0_71 = arith.constant 0 : index
    %179 = vector.load %arg17[%c0_69, %c0_70, %c0_71] : memref<4x1x64xf32, #tpu.memory_space<vmem>>, vector<1x1x64xf32>
    %180 = vector.shape_cast %179 : vector<1x1x64xf32> to vector<1x64xf32>
    %181 = vector.broadcast %180 : vector<1x64xf32> to vector<16x64xf32>
    %182 = arith.addf %178, %181 : vector<16x64xf32>
    %cst_72 = arith.constant 0.000000e+00 : f32
    %183 = vector.broadcast %cst_72 : f32 to vector<16x64xf32>
    %184 = arith.maximumf %182, %183 : vector<16x64xf32>
    %c0_73 = arith.constant 0 : index
    %c0_74 = arith.constant 0 : index
    %c0_75 = arith.constant 0 : index
    %185 = vector.load %arg18[%c0_73, %c0_74, %c0_75] : memref<4x64x32xbf16, #tpu.memory_space<vmem>>, vector<1x64x32xbf16>
    %186 = vector.shape_cast %185 : vector<1x64x32xbf16> to vector<64x32xbf16>
    %187 = arith.truncf %184 : vector<16x64xf32> to vector<16x64xbf16>
    %cst_76 = arith.constant dense<0.000000e+00> : vector<16x32xf32>
    %188 = tpu.matmul %187, %186, %cst_76 {dimension_numbers = #tpu.dot_dimension_numbers<[1], [0], [0], [1], [0, 0, 1, 1], [], []>} : vector<16x64xbf16>, vector<64x32xbf16>, vector<16x32xf32> -> vector<16x32xf32>
    %c0_77 = arith.constant 0 : index
    %c0_78 = arith.constant 0 : index
    %c0_79 = arith.constant 0 : index
    %189 = vector.load %arg19[%c0_77, %c0_78, %c0_79] : memref<4x1x32xf32, #tpu.memory_space<vmem>>, vector<1x1x32xf32>
    %190 = vector.shape_cast %189 : vector<1x1x32xf32> to vector<1x32xf32>
    %191 = vector.broadcast %190 : vector<1x32xf32> to vector<16x32xf32>
    %192 = arith.addf %188, %191 : vector<16x32xf32>
    %193 = arith.addf %192, %174 : vector<16x32xf32>
    %c0_80 = arith.constant 0 : index
    %c0_81 = arith.constant 0 : index
    %c0_82 = arith.constant 0 : index
    %194 = vector.load %arg20[%c0_80, %c0_81, %c0_82] : memref<4x1x32xf32, #tpu.memory_space<vmem>>, vector<1x1x32xf32>
    %195 = vector.shape_cast %194 : vector<1x1x32xf32> to vector<1x32xf32>
    %c0_83 = arith.constant 0 : index
    %c0_84 = arith.constant 0 : index
    %c0_85 = arith.constant 0 : index
    %196 = vector.load %arg21[%c0_83, %c0_84, %c0_85] : memref<4x1x32xf32, #tpu.memory_space<vmem>>, vector<1x1x32xf32>
    %197 = vector.shape_cast %196 : vector<1x1x32xf32> to vector<1x32xf32>
    %cst_86 = arith.constant dense<0.000000e+00> : vector<16xf32>
    %198 = vector.multi_reduction <add>, %193, %cst_86 [1] : vector<16x32xf32> to vector<16xf32>
    %199 = vector.shape_cast %198 : vector<16xf32> to vector<16x1xf32>
    %cst_87 = arith.constant 3.200000e+01 : f32
    %200 = vector.broadcast %cst_87 : f32 to vector<16x1xf32>
    %201 = arith.divf %199, %200 : vector<16x1xf32>
    %202 = vector.broadcast %201 : vector<16x1xf32> to vector<16x32xf32>
    %203 = arith.subf %193, %202 : vector<16x32xf32>
    %204 = arith.mulf %203, %203 : vector<16x32xf32>
    %cst_88 = arith.constant dense<0.000000e+00> : vector<16xf32>
    %205 = vector.multi_reduction <add>, %204, %cst_88 [1] : vector<16x32xf32> to vector<16xf32>
    %206 = vector.shape_cast %205 : vector<16xf32> to vector<16x1xf32>
    %cst_89 = arith.constant 3.200000e+01 : f32
    %207 = vector.broadcast %cst_89 : f32 to vector<16x1xf32>
    %208 = arith.divf %206, %207 : vector<16x1xf32>
    %209 = vector.broadcast %201 : vector<16x1xf32> to vector<16x32xf32>
    %210 = arith.subf %193, %209 : vector<16x32xf32>
    %cst_90 = arith.constant 9.99999974E-6 : f32
    %211 = vector.broadcast %cst_90 : f32 to vector<16x1xf32>
    %212 = arith.addf %208, %211 : vector<16x1xf32>
    %213 = math.rsqrt %212 : vector<16x1xf32>
    %214 = vector.broadcast %213 : vector<16x1xf32> to vector<16x32xf32>
    %215 = arith.mulf %210, %214 : vector<16x32xf32>
    %216 = vector.broadcast %195 : vector<1x32xf32> to vector<16x32xf32>
    %217 = arith.mulf %215, %216 : vector<16x32xf32>
    %218 = vector.broadcast %197 : vector<1x32xf32> to vector<16x32xf32>
    %219 = arith.addf %217, %218 : vector<16x32xf32>
    %220 = vector.shape_cast %219 : vector<16x32xf32> to vector<2x8x32xf32>
    %221 = vector.shape_cast %220 : vector<2x8x32xf32> to vector<16x32xf32>
    %c1 = arith.constant 1 : index
    %c0_91 = arith.constant 0 : index
    %c0_92 = arith.constant 0 : index
    %222 = vector.load %arg10[%c1, %c0_91, %c0_92] : memref<4x32x96xbf16, #tpu.memory_space<vmem>>, vector<1x32x96xbf16>
    %223 = vector.shape_cast %222 : vector<1x32x96xbf16> to vector<32x96xbf16>
    %224 = arith.truncf %221 : vector<16x32xf32> to vector<16x32xbf16>
    %cst_93 = arith.constant dense<0.000000e+00> : vector<16x96xf32>
    %225 = tpu.matmul %224, %223, %cst_93 {dimension_numbers = #tpu.dot_dimension_numbers<[1], [0], [0], [1], [0, 0, 1, 1], [], []>} : vector<16x32xbf16>, vector<32x96xbf16>, vector<16x96xf32> -> vector<16x96xf32>
    %c1_94 = arith.constant 1 : index
    %c0_95 = arith.constant 0 : index
    %c0_96 = arith.constant 0 : index
    %226 = vector.load %arg11[%c1_94, %c0_95, %c0_96] : memref<4x1x96xf32, #tpu.memory_space<vmem>>, vector<1x1x96xf32>
    %227 = vector.shape_cast %226 : vector<1x1x96xf32> to vector<1x96xf32>
    %228 = vector.broadcast %227 : vector<1x96xf32> to vector<16x96xf32>
    %229 = arith.addf %225, %228 : vector<16x96xf32>
    %230 = vector.extract_strided_slice %229 {offsets = [0, 0], sizes = [16, 32], strides = [1, 1]} : vector<16x96xf32> to vector<16x32xf32>
    %231 = vector.shape_cast %230 : vector<16x32xf32> to vector<2x8x32xf32>
    %232 = vector.extract_strided_slice %229 {offsets = [0, 32], sizes = [16, 32], strides = [1, 1]} : vector<16x96xf32> to vector<16x32xf32>
    %233 = vector.shape_cast %232 : vector<16x32xf32> to vector<2x8x32xf32>
    %234 = vector.extract_strided_slice %229 {offsets = [0, 64], sizes = [16, 32], strides = [1, 1]} : vector<16x96xf32> to vector<16x32xf32>
    %235 = vector.shape_cast %234 : vector<16x32xf32> to vector<2x8x32xf32>
    %236 = vector.extract_strided_slice %231 {offsets = [0, 0, 0], sizes = [2, 8, 8], strides = [1, 1, 1]} : vector<2x8x32xf32> to vector<2x8x8xf32>
    %237 = arith.truncf %236 : vector<2x8x8xf32> to vector<2x8x8xbf16>
    %238 = vector.extract_strided_slice %233 {offsets = [0, 0, 0], sizes = [2, 8, 8], strides = [1, 1, 1]} : vector<2x8x32xf32> to vector<2x8x8xf32>
    %239 = arith.truncf %238 : vector<2x8x8xf32> to vector<2x8x8xbf16>
    %240 = vector.extract_strided_slice %235 {offsets = [0, 0, 0], sizes = [2, 8, 8], strides = [1, 1, 1]} : vector<2x8x32xf32> to vector<2x8x8xf32>
    %241 = arith.truncf %240 : vector<2x8x8xf32> to vector<2x8x8xbf16>
    "tpu.trace_start"() <{level = 10 : i32, message = "bqd,bkd->bqk"}> : () -> ()
    %cst_97 = arith.constant dense<0.000000e+00> : vector<2x8x8xf32>
    %242 = tpu.matmul %237, %239, %cst_97 {dimension_numbers = #tpu.dot_dimension_numbers<[2], [2], [1], [1], [0, 0, 0, 1, 1, 1], [0], [0]>} : vector<2x8x8xbf16>, vector<2x8x8xbf16>, vector<2x8x8xf32> -> vector<2x8x8xf32>
    "tpu.trace_stop"() : () -> ()
    %cst_98 = arith.constant 0.353553385 : f32
    %243 = vector.broadcast %cst_98 : f32 to vector<2x8x8xf32>
    %244 = arith.mulf %242, %243 : vector<2x8x8xf32>
    %cst_99 = arith.constant 0.000000e+00 : f32
    %245 = vector.broadcast %cst_99 : f32 to vector<2x1x8xf32>
    %246 = arith.cmpf ogt, %14, %245 : vector<2x1x8xf32>
    %cst_100 = arith.constant -1.000000e+09 : f32
    %247 = vector.shape_cast %246 : vector<2x1x8xi1> to vector<2x1x8xi1>
    %248 = vector.broadcast %247 : vector<2x1x8xi1> to vector<2x8x8xi1>
    %249 = vector.broadcast %cst_100 : f32 to vector<2x8x8xf32>
    %250 = arith.select %248, %244, %249 : vector<2x8x8xi1>, vector<2x8x8xf32>
    %cst_101 = arith.constant dense<0xFF800000> : vector<2x8xf32>
    %251 = vector.multi_reduction <maximumf>, %250, %cst_101 [2] : vector<2x8x8xf32> to vector<2x8xf32>
    %252 = vector.shape_cast %251 : vector<2x8xf32> to vector<2x8x1xf32>
    %253 = vector.broadcast %252 : vector<2x8x1xf32> to vector<2x8x8xf32>
    %254 = arith.subf %250, %253 : vector<2x8x8xf32>
    %255 = math.exp %254 : vector<2x8x8xf32>
    %cst_102 = arith.constant dense<0.000000e+00> : vector<2x8xf32>
    %256 = vector.multi_reduction <add>, %255, %cst_102 [2] : vector<2x8x8xf32> to vector<2x8xf32>
    %257 = vector.shape_cast %256 : vector<2x8xf32> to vector<2x8x1xf32>
    %258 = tpu.reciprocal %257 {approx = true} : vector<2x8x1xf32> -> vector<2x8x1xf32>
    %259 = vector.broadcast %258 : vector<2x8x1xf32> to vector<2x8x8xf32>
    %260 = arith.mulf %255, %259 : vector<2x8x8xf32>
    %261 = arith.truncf %260 : vector<2x8x8xf32> to vector<2x8x8xbf16>
    "tpu.trace_start"() <{level = 10 : i32, message = "bqk,bkd->bqd"}> : () -> ()
    %cst_103 = arith.constant dense<0.000000e+00> : vector<2x8x8xf32>
    %262 = tpu.matmul %261, %241, %cst_103 {dimension_numbers = #tpu.dot_dimension_numbers<[2], [1], [1], [2], [0, 0, 0, 1, 1, 2], [0], [0]>} : vector<2x8x8xbf16>, vector<2x8x8xbf16>, vector<2x8x8xf32> -> vector<2x8x8xf32>
    "tpu.trace_stop"() : () -> ()
    %263 = vector.extract_strided_slice %231 {offsets = [0, 0, 8], sizes = [2, 8, 8], strides = [1, 1, 1]} : vector<2x8x32xf32> to vector<2x8x8xf32>
    %264 = arith.truncf %263 : vector<2x8x8xf32> to vector<2x8x8xbf16>
    %265 = vector.extract_strided_slice %233 {offsets = [0, 0, 8], sizes = [2, 8, 8], strides = [1, 1, 1]} : vector<2x8x32xf32> to vector<2x8x8xf32>
    %266 = arith.truncf %265 : vector<2x8x8xf32> to vector<2x8x8xbf16>
    %267 = vector.extract_strided_slice %235 {offsets = [0, 0, 8], sizes = [2, 8, 8], strides = [1, 1, 1]} : vector<2x8x32xf32> to vector<2x8x8xf32>
    %268 = arith.truncf %267 : vector<2x8x8xf32> to vector<2x8x8xbf16>
    "tpu.trace_start"() <{level = 10 : i32, message = "bqd,bkd->bqk"}> : () -> ()
    %cst_104 = arith.constant dense<0.000000e+00> : vector<2x8x8xf32>
    %269 = tpu.matmul %264, %266, %cst_104 {dimension_numbers = #tpu.dot_dimension_numbers<[2], [2], [1], [1], [0, 0, 0, 1, 1, 1], [0], [0]>} : vector<2x8x8xbf16>, vector<2x8x8xbf16>, vector<2x8x8xf32> -> vector<2x8x8xf32>
    "tpu.trace_stop"() : () -> ()
    %cst_105 = arith.constant 0.353553385 : f32
    %270 = vector.broadcast %cst_105 : f32 to vector<2x8x8xf32>
    %271 = arith.mulf %269, %270 : vector<2x8x8xf32>
    %cst_106 = arith.constant 0.000000e+00 : f32
    %272 = vector.broadcast %cst_106 : f32 to vector<2x1x8xf32>
    %273 = arith.cmpf ogt, %14, %272 : vector<2x1x8xf32>
    %cst_107 = arith.constant -1.000000e+09 : f32
    %274 = vector.shape_cast %273 : vector<2x1x8xi1> to vector<2x1x8xi1>
    %275 = vector.broadcast %274 : vector<2x1x8xi1> to vector<2x8x8xi1>
    %276 = vector.broadcast %cst_107 : f32 to vector<2x8x8xf32>
    %277 = arith.select %275, %271, %276 : vector<2x8x8xi1>, vector<2x8x8xf32>
    %cst_108 = arith.constant dense<0xFF800000> : vector<2x8xf32>
    %278 = vector.multi_reduction <maximumf>, %277, %cst_108 [2] : vector<2x8x8xf32> to vector<2x8xf32>
    %279 = vector.shape_cast %278 : vector<2x8xf32> to vector<2x8x1xf32>
    %280 = vector.broadcast %279 : vector<2x8x1xf32> to vector<2x8x8xf32>
    %281 = arith.subf %277, %280 : vector<2x8x8xf32>
    %282 = math.exp %281 : vector<2x8x8xf32>
    %cst_109 = arith.constant dense<0.000000e+00> : vector<2x8xf32>
    %283 = vector.multi_reduction <add>, %282, %cst_109 [2] : vector<2x8x8xf32> to vector<2x8xf32>
    %284 = vector.shape_cast %283 : vector<2x8xf32> to vector<2x8x1xf32>
    %285 = tpu.reciprocal %284 {approx = true} : vector<2x8x1xf32> -> vector<2x8x1xf32>
    %286 = vector.broadcast %285 : vector<2x8x1xf32> to vector<2x8x8xf32>
    %287 = arith.mulf %282, %286 : vector<2x8x8xf32>
    %288 = arith.truncf %287 : vector<2x8x8xf32> to vector<2x8x8xbf16>
    "tpu.trace_start"() <{level = 10 : i32, message = "bqk,bkd->bqd"}> : () -> ()
    %cst_110 = arith.constant dense<0.000000e+00> : vector<2x8x8xf32>
    %289 = tpu.matmul %288, %268, %cst_110 {dimension_numbers = #tpu.dot_dimension_numbers<[2], [1], [1], [2], [0, 0, 0, 1, 1, 2], [0], [0]>} : vector<2x8x8xbf16>, vector<2x8x8xbf16>, vector<2x8x8xf32> -> vector<2x8x8xf32>
    "tpu.trace_stop"() : () -> ()
    %290 = vector.extract_strided_slice %231 {offsets = [0, 0, 16], sizes = [2, 8, 8], strides = [1, 1, 1]} : vector<2x8x32xf32> to vector<2x8x8xf32>
    %291 = arith.truncf %290 : vector<2x8x8xf32> to vector<2x8x8xbf16>
    %292 = vector.extract_strided_slice %233 {offsets = [0, 0, 16], sizes = [2, 8, 8], strides = [1, 1, 1]} : vector<2x8x32xf32> to vector<2x8x8xf32>
    %293 = arith.truncf %292 : vector<2x8x8xf32> to vector<2x8x8xbf16>
    %294 = vector.extract_strided_slice %235 {offsets = [0, 0, 16], sizes = [2, 8, 8], strides = [1, 1, 1]} : vector<2x8x32xf32> to vector<2x8x8xf32>
    %295 = arith.truncf %294 : vector<2x8x8xf32> to vector<2x8x8xbf16>
    "tpu.trace_start"() <{level = 10 : i32, message = "bqd,bkd->bqk"}> : () -> ()
    %cst_111 = arith.constant dense<0.000000e+00> : vector<2x8x8xf32>
    %296 = tpu.matmul %291, %293, %cst_111 {dimension_numbers = #tpu.dot_dimension_numbers<[2], [2], [1], [1], [0, 0, 0, 1, 1, 1], [0], [0]>} : vector<2x8x8xbf16>, vector<2x8x8xbf16>, vector<2x8x8xf32> -> vector<2x8x8xf32>
    "tpu.trace_stop"() : () -> ()
    %cst_112 = arith.constant 0.353553385 : f32
    %297 = vector.broadcast %cst_112 : f32 to vector<2x8x8xf32>
    %298 = arith.mulf %296, %297 : vector<2x8x8xf32>
    %cst_113 = arith.constant 0.000000e+00 : f32
    %299 = vector.broadcast %cst_113 : f32 to vector<2x1x8xf32>
    %300 = arith.cmpf ogt, %14, %299 : vector<2x1x8xf32>
    %cst_114 = arith.constant -1.000000e+09 : f32
    %301 = vector.shape_cast %300 : vector<2x1x8xi1> to vector<2x1x8xi1>
    %302 = vector.broadcast %301 : vector<2x1x8xi1> to vector<2x8x8xi1>
    %303 = vector.broadcast %cst_114 : f32 to vector<2x8x8xf32>
    %304 = arith.select %302, %298, %303 : vector<2x8x8xi1>, vector<2x8x8xf32>
    %cst_115 = arith.constant dense<0xFF800000> : vector<2x8xf32>
    %305 = vector.multi_reduction <maximumf>, %304, %cst_115 [2] : vector<2x8x8xf32> to vector<2x8xf32>
    %306 = vector.shape_cast %305 : vector<2x8xf32> to vector<2x8x1xf32>
    %307 = vector.broadcast %306 : vector<2x8x1xf32> to vector<2x8x8xf32>
    %308 = arith.subf %304, %307 : vector<2x8x8xf32>
    %309 = math.exp %308 : vector<2x8x8xf32>
    %cst_116 = arith.constant dense<0.000000e+00> : vector<2x8xf32>
    %310 = vector.multi_reduction <add>, %309, %cst_116 [2] : vector<2x8x8xf32> to vector<2x8xf32>
    %311 = vector.shape_cast %310 : vector<2x8xf32> to vector<2x8x1xf32>
    %312 = tpu.reciprocal %311 {approx = true} : vector<2x8x1xf32> -> vector<2x8x1xf32>
    %313 = vector.broadcast %312 : vector<2x8x1xf32> to vector<2x8x8xf32>
    %314 = arith.mulf %309, %313 : vector<2x8x8xf32>
    %315 = arith.truncf %314 : vector<2x8x8xf32> to vector<2x8x8xbf16>
    "tpu.trace_start"() <{level = 10 : i32, message = "bqk,bkd->bqd"}> : () -> ()
    %cst_117 = arith.constant dense<0.000000e+00> : vector<2x8x8xf32>
    %316 = tpu.matmul %315, %295, %cst_117 {dimension_numbers = #tpu.dot_dimension_numbers<[2], [1], [1], [2], [0, 0, 0, 1, 1, 2], [0], [0]>} : vector<2x8x8xbf16>, vector<2x8x8xbf16>, vector<2x8x8xf32> -> vector<2x8x8xf32>
    "tpu.trace_stop"() : () -> ()
    %317 = vector.extract_strided_slice %231 {offsets = [0, 0, 24], sizes = [2, 8, 8], strides = [1, 1, 1]} : vector<2x8x32xf32> to vector<2x8x8xf32>
    %318 = arith.truncf %317 : vector<2x8x8xf32> to vector<2x8x8xbf16>
    %319 = vector.extract_strided_slice %233 {offsets = [0, 0, 24], sizes = [2, 8, 8], strides = [1, 1, 1]} : vector<2x8x32xf32> to vector<2x8x8xf32>
    %320 = arith.truncf %319 : vector<2x8x8xf32> to vector<2x8x8xbf16>
    %321 = vector.extract_strided_slice %235 {offsets = [0, 0, 24], sizes = [2, 8, 8], strides = [1, 1, 1]} : vector<2x8x32xf32> to vector<2x8x8xf32>
    %322 = arith.truncf %321 : vector<2x8x8xf32> to vector<2x8x8xbf16>
    "tpu.trace_start"() <{level = 10 : i32, message = "bqd,bkd->bqk"}> : () -> ()
    %cst_118 = arith.constant dense<0.000000e+00> : vector<2x8x8xf32>
    %323 = tpu.matmul %318, %320, %cst_118 {dimension_numbers = #tpu.dot_dimension_numbers<[2], [2], [1], [1], [0, 0, 0, 1, 1, 1], [0], [0]>} : vector<2x8x8xbf16>, vector<2x8x8xbf16>, vector<2x8x8xf32> -> vector<2x8x8xf32>
    "tpu.trace_stop"() : () -> ()
    %cst_119 = arith.constant 0.353553385 : f32
    %324 = vector.broadcast %cst_119 : f32 to vector<2x8x8xf32>
    %325 = arith.mulf %323, %324 : vector<2x8x8xf32>
    %cst_120 = arith.constant 0.000000e+00 : f32
    %326 = vector.broadcast %cst_120 : f32 to vector<2x1x8xf32>
    %327 = arith.cmpf ogt, %14, %326 : vector<2x1x8xf32>
    %cst_121 = arith.constant -1.000000e+09 : f32
    %328 = vector.shape_cast %327 : vector<2x1x8xi1> to vector<2x1x8xi1>
    %329 = vector.broadcast %328 : vector<2x1x8xi1> to vector<2x8x8xi1>
    %330 = vector.broadcast %cst_121 : f32 to vector<2x8x8xf32>
    %331 = arith.select %329, %325, %330 : vector<2x8x8xi1>, vector<2x8x8xf32>
    %cst_122 = arith.constant dense<0xFF800000> : vector<2x8xf32>
    %332 = vector.multi_reduction <maximumf>, %331, %cst_122 [2] : vector<2x8x8xf32> to vector<2x8xf32>
    %333 = vector.shape_cast %332 : vector<2x8xf32> to vector<2x8x1xf32>
    %334 = vector.broadcast %333 : vector<2x8x1xf32> to vector<2x8x8xf32>
    %335 = arith.subf %331, %334 : vector<2x8x8xf32>
    %336 = math.exp %335 : vector<2x8x8xf32>
    %cst_123 = arith.constant dense<0.000000e+00> : vector<2x8xf32>
    %337 = vector.multi_reduction <add>, %336, %cst_123 [2] : vector<2x8x8xf32> to vector<2x8xf32>
    %338 = vector.shape_cast %337 : vector<2x8xf32> to vector<2x8x1xf32>
    %339 = tpu.reciprocal %338 {approx = true} : vector<2x8x1xf32> -> vector<2x8x1xf32>
    %340 = vector.broadcast %339 : vector<2x8x1xf32> to vector<2x8x8xf32>
    %341 = arith.mulf %336, %340 : vector<2x8x8xf32>
    %342 = arith.truncf %341 : vector<2x8x8xf32> to vector<2x8x8xbf16>
    "tpu.trace_start"() <{level = 10 : i32, message = "bqk,bkd->bqd"}> : () -> ()
    %cst_124 = arith.constant dense<0.000000e+00> : vector<2x8x8xf32>
    %343 = tpu.matmul %342, %322, %cst_124 {dimension_numbers = #tpu.dot_dimension_numbers<[2], [1], [1], [2], [0, 0, 0, 1, 1, 2], [0], [0]>} : vector<2x8x8xbf16>, vector<2x8x8xbf16>, vector<2x8x8xf32> -> vector<2x8x8xf32>
    "tpu.trace_stop"() : () -> ()
    %344 = tpu.concatenate %262, %289, %316, %343 in 2 : vector<2x8x8xf32>, vector<2x8x8xf32>, vector<2x8x8xf32>, vector<2x8x8xf32> -> vector<2x8x32xf32>
    %345 = vector.shape_cast %344 : vector<2x8x32xf32> to vector<16x32xf32>
    %c1_125 = arith.constant 1 : index
    %c0_126 = arith.constant 0 : index
    %c0_127 = arith.constant 0 : index
    %346 = vector.load %arg12[%c1_125, %c0_126, %c0_127] : memref<4x32x32xbf16, #tpu.memory_space<vmem>>, vector<1x32x32xbf16>
    %347 = vector.shape_cast %346 : vector<1x32x32xbf16> to vector<32x32xbf16>
    %348 = arith.truncf %345 : vector<16x32xf32> to vector<16x32xbf16>
    %cst_128 = arith.constant dense<0.000000e+00> : vector<16x32xf32>
    %349 = tpu.matmul %348, %347, %cst_128 {dimension_numbers = #tpu.dot_dimension_numbers<[1], [0], [0], [1], [0, 0, 1, 1], [], []>} : vector<16x32xbf16>, vector<32x32xbf16>, vector<16x32xf32> -> vector<16x32xf32>
    %c1_129 = arith.constant 1 : index
    %c0_130 = arith.constant 0 : index
    %c0_131 = arith.constant 0 : index
    %350 = vector.load %arg13[%c1_129, %c0_130, %c0_131] : memref<4x1x32xf32, #tpu.memory_space<vmem>>, vector<1x1x32xf32>
    %351 = vector.shape_cast %350 : vector<1x1x32xf32> to vector<1x32xf32>
    %352 = vector.broadcast %351 : vector<1x32xf32> to vector<16x32xf32>
    %353 = arith.addf %349, %352 : vector<16x32xf32>
    %354 = arith.addf %353, %221 : vector<16x32xf32>
    %c1_132 = arith.constant 1 : index
    %c0_133 = arith.constant 0 : index
    %c0_134 = arith.constant 0 : index
    %355 = vector.load %arg14[%c1_132, %c0_133, %c0_134] : memref<4x1x32xf32, #tpu.memory_space<vmem>>, vector<1x1x32xf32>
    %356 = vector.shape_cast %355 : vector<1x1x32xf32> to vector<1x32xf32>
    %c1_135 = arith.constant 1 : index
    %c0_136 = arith.constant 0 : index
    %c0_137 = arith.constant 0 : index
    %357 = vector.load %arg15[%c1_135, %c0_136, %c0_137] : memref<4x1x32xf32, #tpu.memory_space<vmem>>, vector<1x1x32xf32>
    %358 = vector.shape_cast %357 : vector<1x1x32xf32> to vector<1x32xf32>
    %cst_138 = arith.constant dense<0.000000e+00> : vector<16xf32>
    %359 = vector.multi_reduction <add>, %354, %cst_138 [1] : vector<16x32xf32> to vector<16xf32>
    %360 = vector.shape_cast %359 : vector<16xf32> to vector<16x1xf32>
    %cst_139 = arith.constant 3.200000e+01 : f32
    %361 = vector.broadcast %cst_139 : f32 to vector<16x1xf32>
    %362 = arith.divf %360, %361 : vector<16x1xf32>
    %363 = vector.broadcast %362 : vector<16x1xf32> to vector<16x32xf32>
    %364 = arith.subf %354, %363 : vector<16x32xf32>
    %365 = arith.mulf %364, %364 : vector<16x32xf32>
    %cst_140 = arith.constant dense<0.000000e+00> : vector<16xf32>
    %366 = vector.multi_reduction <add>, %365, %cst_140 [1] : vector<16x32xf32> to vector<16xf32>
    %367 = vector.shape_cast %366 : vector<16xf32> to vector<16x1xf32>
    %cst_141 = arith.constant 3.200000e+01 : f32
    %368 = vector.broadcast %cst_141 : f32 to vector<16x1xf32>
    %369 = arith.divf %367, %368 : vector<16x1xf32>
    %370 = vector.broadcast %362 : vector<16x1xf32> to vector<16x32xf32>
    %371 = arith.subf %354, %370 : vector<16x32xf32>
    %cst_142 = arith.constant 9.99999974E-6 : f32
    %372 = vector.broadcast %cst_142 : f32 to vector<16x1xf32>
    %373 = arith.addf %369, %372 : vector<16x1xf32>
    %374 = math.rsqrt %373 : vector<16x1xf32>
    %375 = vector.broadcast %374 : vector<16x1xf32> to vector<16x32xf32>
    %376 = arith.mulf %371, %375 : vector<16x32xf32>
    %377 = vector.broadcast %356 : vector<1x32xf32> to vector<16x32xf32>
    %378 = arith.mulf %376, %377 : vector<16x32xf32>
    %379 = vector.broadcast %358 : vector<1x32xf32> to vector<16x32xf32>
    %380 = arith.addf %378, %379 : vector<16x32xf32>
    %c1_143 = arith.constant 1 : index
    %c0_144 = arith.constant 0 : index
    %c0_145 = arith.constant 0 : index
    %381 = vector.load %arg16[%c1_143, %c0_144, %c0_145] : memref<4x32x64xbf16, #tpu.memory_space<vmem>>, vector<1x32x64xbf16>
    %382 = vector.shape_cast %381 : vector<1x32x64xbf16> to vector<32x64xbf16>
    %383 = arith.truncf %380 : vector<16x32xf32> to vector<16x32xbf16>
    %cst_146 = arith.constant dense<0.000000e+00> : vector<16x64xf32>
    %384 = tpu.matmul %383, %382, %cst_146 {dimension_numbers = #tpu.dot_dimension_numbers<[1], [0], [0], [1], [0, 0, 1, 1], [], []>} : vector<16x32xbf16>, vector<32x64xbf16>, vector<16x64xf32> -> vector<16x64xf32>
    %c1_147 = arith.constant 1 : index
    %c0_148 = arith.constant 0 : index
    %c0_149 = arith.constant 0 : index
    %385 = vector.load %arg17[%c1_147, %c0_148, %c0_149] : memref<4x1x64xf32, #tpu.memory_space<vmem>>, vector<1x1x64xf32>
    %386 = vector.shape_cast %385 : vector<1x1x64xf32> to vector<1x64xf32>
    %387 = vector.broadcast %386 : vector<1x64xf32> to vector<16x64xf32>
    %388 = arith.addf %384, %387 : vector<16x64xf32>
    %cst_150 = arith.constant 0.000000e+00 : f32
    %389 = vector.broadcast %cst_150 : f32 to vector<16x64xf32>
    %390 = arith.maximumf %388, %389 : vector<16x64xf32>
    %c1_151 = arith.constant 1 : index
    %c0_152 = arith.constant 0 : index
    %c0_153 = arith.constant 0 : index
    %391 = vector.load %arg18[%c1_151, %c0_152, %c0_153] : memref<4x64x32xbf16, #tpu.memory_space<vmem>>, vector<1x64x32xbf16>
    %392 = vector.shape_cast %391 : vector<1x64x32xbf16> to vector<64x32xbf16>
    %393 = arith.truncf %390 : vector<16x64xf32> to vector<16x64xbf16>
    %cst_154 = arith.constant dense<0.000000e+00> : vector<16x32xf32>
    %394 = tpu.matmul %393, %392, %cst_154 {dimension_numbers = #tpu.dot_dimension_numbers<[1], [0], [0], [1], [0, 0, 1, 1], [], []>} : vector<16x64xbf16>, vector<64x32xbf16>, vector<16x32xf32> -> vector<16x32xf32>
    %c1_155 = arith.constant 1 : index
    %c0_156 = arith.constant 0 : index
    %c0_157 = arith.constant 0 : index
    %395 = vector.load %arg19[%c1_155, %c0_156, %c0_157] : memref<4x1x32xf32, #tpu.memory_space<vmem>>, vector<1x1x32xf32>
    %396 = vector.shape_cast %395 : vector<1x1x32xf32> to vector<1x32xf32>
    %397 = vector.broadcast %396 : vector<1x32xf32> to vector<16x32xf32>
    %398 = arith.addf %394, %397 : vector<16x32xf32>
    %399 = arith.addf %398, %380 : vector<16x32xf32>
    %c1_158 = arith.constant 1 : index
    %c0_159 = arith.constant 0 : index
    %c0_160 = arith.constant 0 : index
    %400 = vector.load %arg20[%c1_158, %c0_159, %c0_160] : memref<4x1x32xf32, #tpu.memory_space<vmem>>, vector<1x1x32xf32>
    %401 = vector.shape_cast %400 : vector<1x1x32xf32> to vector<1x32xf32>
    %c1_161 = arith.constant 1 : index
    %c0_162 = arith.constant 0 : index
    %c0_163 = arith.constant 0 : index
    %402 = vector.load %arg21[%c1_161, %c0_162, %c0_163] : memref<4x1x32xf32, #tpu.memory_space<vmem>>, vector<1x1x32xf32>
    %403 = vector.shape_cast %402 : vector<1x1x32xf32> to vector<1x32xf32>
    %cst_164 = arith.constant dense<0.000000e+00> : vector<16xf32>
    %404 = vector.multi_reduction <add>, %399, %cst_164 [1] : vector<16x32xf32> to vector<16xf32>
    %405 = vector.shape_cast %404 : vector<16xf32> to vector<16x1xf32>
    %cst_165 = arith.constant 3.200000e+01 : f32
    %406 = vector.broadcast %cst_165 : f32 to vector<16x1xf32>
    %407 = arith.divf %405, %406 : vector<16x1xf32>
    %408 = vector.broadcast %407 : vector<16x1xf32> to vector<16x32xf32>
    %409 = arith.subf %399, %408 : vector<16x32xf32>
    %410 = arith.mulf %409, %409 : vector<16x32xf32>
    %cst_166 = arith.constant dense<0.000000e+00> : vector<16xf32>
    %411 = vector.multi_reduction <add>, %410, %cst_166 [1] : vector<16x32xf32> to vector<16xf32>
    %412 = vector.shape_cast %411 : vector<16xf32> to vector<16x1xf32>
    %cst_167 = arith.constant 3.200000e+01 : f32
    %413 = vector.broadcast %cst_167 : f32 to vector<16x1xf32>
    %414 = arith.divf %412, %413 : vector<16x1xf32>
    %415 = vector.broadcast %407 : vector<16x1xf32> to vector<16x32xf32>
    %416 = arith.subf %399, %415 : vector<16x32xf32>
    %cst_168 = arith.constant 9.99999974E-6 : f32
    %417 = vector.broadcast %cst_168 : f32 to vector<16x1xf32>
    %418 = arith.addf %414, %417 : vector<16x1xf32>
    %419 = math.rsqrt %418 : vector<16x1xf32>
    %420 = vector.broadcast %419 : vector<16x1xf32> to vector<16x32xf32>
    %421 = arith.mulf %416, %420 : vector<16x32xf32>
    %422 = vector.broadcast %401 : vector<1x32xf32> to vector<16x32xf32>
    %423 = arith.mulf %421, %422 : vector<16x32xf32>
    %424 = vector.broadcast %403 : vector<1x32xf32> to vector<16x32xf32>
    %425 = arith.addf %423, %424 : vector<16x32xf32>
    %426 = vector.shape_cast %425 : vector<16x32xf32> to vector<2x8x32xf32>
    %c0_169 = arith.constant 0 : index
    %c0_170 = arith.constant 0 : index
    %427 = vector.load %arg7[%c0_169, %c0_170] : memref<8x1xf32, #tpu.memory_space<vmem>>, vector<8x1xf32>
    %428 = vector.shape_cast %427 : vector<8x1xf32> to vector<1x8x1xf32>
    %429 = vector.broadcast %428 : vector<1x8x1xf32> to vector<2x8x32xf32>
    %430 = arith.mulf %426, %429 : vector<2x8x32xf32>
    %cst_171 = arith.constant dense<0.000000e+00> : vector<2x32xf32>
    %431 = vector.multi_reduction <add>, %430, %cst_171 [1] : vector<2x8x32xf32> to vector<2x32xf32>
    %c0_172 = arith.constant 0 : index
    %c0_173 = arith.constant 0 : index
    %432 = vector.load %arg8[%c0_172, %c0_173] : memref<1x1xf32, #tpu.memory_space<vmem>>, vector<1x1xf32>
    %433 = vector.broadcast %432 : vector<1x1xf32> to vector<2x32xf32>
    %434 = arith.addf %431, %433 : vector<2x32xf32>
    %435 = vector.shape_cast %434 : vector<2x32xf32> to vector<1x2x32xf32>
    %c0_174 = arith.constant 0 : index
    %c0_175 = arith.constant 0 : index
    %c0_176 = arith.constant 0 : index
    %436 = vector.load %arg3[%c0_174, %c0_175, %c0_176] : memref<1x1x2xf32, #tpu.memory_space<vmem>>, vector<1x1x2xf32>
    %437 = vector.shape_cast %435 : vector<1x2x32xf32> to vector<2x32xf32>
    %c2 = arith.constant 2 : index
    %c0_177 = arith.constant 0 : index
    %c0_178 = arith.constant 0 : index
    %438 = vector.load %arg10[%c2, %c0_177, %c0_178] : memref<4x32x96xbf16, #tpu.memory_space<vmem>>, vector<1x32x96xbf16>
    %439 = vector.shape_cast %438 : vector<1x32x96xbf16> to vector<32x96xbf16>
    %440 = arith.truncf %437 : vector<2x32xf32> to vector<2x32xbf16>
    %cst_179 = arith.constant dense<0.000000e+00> : vector<2x96xf32>
    %441 = tpu.matmul %440, %439, %cst_179 {dimension_numbers = #tpu.dot_dimension_numbers<[1], [0], [0], [1], [0, 0, 1, 1], [], []>} : vector<2x32xbf16>, vector<32x96xbf16>, vector<2x96xf32> -> vector<2x96xf32>
    %c2_180 = arith.constant 2 : index
    %c0_181 = arith.constant 0 : index
    %c0_182 = arith.constant 0 : index
    %442 = vector.load %arg11[%c2_180, %c0_181, %c0_182] : memref<4x1x96xf32, #tpu.memory_space<vmem>>, vector<1x1x96xf32>
    %443 = vector.shape_cast %442 : vector<1x1x96xf32> to vector<1x96xf32>
    %444 = vector.broadcast %443 : vector<1x96xf32> to vector<2x96xf32>
    %445 = arith.addf %441, %444 : vector<2x96xf32>
    %446 = vector.extract_strided_slice %445 {offsets = [0, 0], sizes = [2, 32], strides = [1, 1]} : vector<2x96xf32> to vector<2x32xf32>
    %447 = vector.shape_cast %446 : vector<2x32xf32> to vector<1x2x32xf32>
    %448 = vector.extract_strided_slice %445 {offsets = [0, 32], sizes = [2, 32], strides = [1, 1]} : vector<2x96xf32> to vector<2x32xf32>
    %449 = vector.shape_cast %448 : vector<2x32xf32> to vector<1x2x32xf32>
    %450 = vector.extract_strided_slice %445 {offsets = [0, 64], sizes = [2, 32], strides = [1, 1]} : vector<2x96xf32> to vector<2x32xf32>
    %451 = vector.shape_cast %450 : vector<2x32xf32> to vector<1x2x32xf32>
    %452 = vector.extract_strided_slice %447 {offsets = [0, 0, 0], sizes = [1, 2, 8], strides = [1, 1, 1]} : vector<1x2x32xf32> to vector<1x2x8xf32>
    %453 = arith.truncf %452 : vector<1x2x8xf32> to vector<1x2x8xbf16>
    %454 = vector.extract_strided_slice %449 {offsets = [0, 0, 0], sizes = [1, 2, 8], strides = [1, 1, 1]} : vector<1x2x32xf32> to vector<1x2x8xf32>
    %455 = arith.truncf %454 : vector<1x2x8xf32> to vector<1x2x8xbf16>
    %456 = vector.extract_strided_slice %451 {offsets = [0, 0, 0], sizes = [1, 2, 8], strides = [1, 1, 1]} : vector<1x2x32xf32> to vector<1x2x8xf32>
    %457 = arith.truncf %456 : vector<1x2x8xf32> to vector<1x2x8xbf16>
    "tpu.trace_start"() <{level = 10 : i32, message = "bqd,bkd->bqk"}> : () -> ()
    %cst_183 = arith.constant dense<0.000000e+00> : vector<1x2x2xf32>
    %458 = tpu.matmul %453, %455, %cst_183 {dimension_numbers = #tpu.dot_dimension_numbers<[2], [2], [1], [1], [0, 0, 0, 1, 1, 1], [0], [0]>} : vector<1x2x8xbf16>, vector<1x2x8xbf16>, vector<1x2x2xf32> -> vector<1x2x2xf32>
    "tpu.trace_stop"() : () -> ()
    %cst_184 = arith.constant 0.353553385 : f32
    %459 = vector.broadcast %cst_184 : f32 to vector<1x2x2xf32>
    %460 = arith.mulf %458, %459 : vector<1x2x2xf32>
    %cst_185 = arith.constant 0.000000e+00 : f32
    %461 = vector.broadcast %cst_185 : f32 to vector<1x1x2xf32>
    %462 = arith.cmpf ogt, %436, %461 : vector<1x1x2xf32>
    %cst_186 = arith.constant -1.000000e+09 : f32
    %463 = vector.shape_cast %462 : vector<1x1x2xi1> to vector<1x1x2xi1>
    %464 = vector.broadcast %463 : vector<1x1x2xi1> to vector<1x2x2xi1>
    %465 = vector.broadcast %cst_186 : f32 to vector<1x2x2xf32>
    %466 = arith.select %464, %460, %465 : vector<1x2x2xi1>, vector<1x2x2xf32>
    %cst_187 = arith.constant dense<0xFF800000> : vector<1x2xf32>
    %467 = vector.multi_reduction <maximumf>, %466, %cst_187 [2] : vector<1x2x2xf32> to vector<1x2xf32>
    %468 = vector.shape_cast %467 : vector<1x2xf32> to vector<1x2x1xf32>
    %469 = vector.broadcast %468 : vector<1x2x1xf32> to vector<1x2x2xf32>
    %470 = arith.subf %466, %469 : vector<1x2x2xf32>
    %471 = math.exp %470 : vector<1x2x2xf32>
    %cst_188 = arith.constant dense<0.000000e+00> : vector<1x2xf32>
    %472 = vector.multi_reduction <add>, %471, %cst_188 [2] : vector<1x2x2xf32> to vector<1x2xf32>
    %473 = vector.shape_cast %472 : vector<1x2xf32> to vector<1x2x1xf32>
    %474 = tpu.reciprocal %473 {approx = true} : vector<1x2x1xf32> -> vector<1x2x1xf32>
    %475 = vector.broadcast %474 : vector<1x2x1xf32> to vector<1x2x2xf32>
    %476 = arith.mulf %471, %475 : vector<1x2x2xf32>
    %477 = arith.truncf %476 : vector<1x2x2xf32> to vector<1x2x2xbf16>
    "tpu.trace_start"() <{level = 10 : i32, message = "bqk,bkd->bqd"}> : () -> ()
    %cst_189 = arith.constant dense<0.000000e+00> : vector<1x2x8xf32>
    %478 = tpu.matmul %477, %457, %cst_189 {dimension_numbers = #tpu.dot_dimension_numbers<[2], [1], [1], [2], [0, 0, 0, 1, 1, 2], [0], [0]>} : vector<1x2x2xbf16>, vector<1x2x8xbf16>, vector<1x2x8xf32> -> vector<1x2x8xf32>
    "tpu.trace_stop"() : () -> ()
    %479 = vector.extract_strided_slice %447 {offsets = [0, 0, 8], sizes = [1, 2, 8], strides = [1, 1, 1]} : vector<1x2x32xf32> to vector<1x2x8xf32>
    %480 = arith.truncf %479 : vector<1x2x8xf32> to vector<1x2x8xbf16>
    %481 = vector.extract_strided_slice %449 {offsets = [0, 0, 8], sizes = [1, 2, 8], strides = [1, 1, 1]} : vector<1x2x32xf32> to vector<1x2x8xf32>
    %482 = arith.truncf %481 : vector<1x2x8xf32> to vector<1x2x8xbf16>
    %483 = vector.extract_strided_slice %451 {offsets = [0, 0, 8], sizes = [1, 2, 8], strides = [1, 1, 1]} : vector<1x2x32xf32> to vector<1x2x8xf32>
    %484 = arith.truncf %483 : vector<1x2x8xf32> to vector<1x2x8xbf16>
    "tpu.trace_start"() <{level = 10 : i32, message = "bqd,bkd->bqk"}> : () -> ()
    %cst_190 = arith.constant dense<0.000000e+00> : vector<1x2x2xf32>
    %485 = tpu.matmul %480, %482, %cst_190 {dimension_numbers = #tpu.dot_dimension_numbers<[2], [2], [1], [1], [0, 0, 0, 1, 1, 1], [0], [0]>} : vector<1x2x8xbf16>, vector<1x2x8xbf16>, vector<1x2x2xf32> -> vector<1x2x2xf32>
    "tpu.trace_stop"() : () -> ()
    %cst_191 = arith.constant 0.353553385 : f32
    %486 = vector.broadcast %cst_191 : f32 to vector<1x2x2xf32>
    %487 = arith.mulf %485, %486 : vector<1x2x2xf32>
    %cst_192 = arith.constant 0.000000e+00 : f32
    %488 = vector.broadcast %cst_192 : f32 to vector<1x1x2xf32>
    %489 = arith.cmpf ogt, %436, %488 : vector<1x1x2xf32>
    %cst_193 = arith.constant -1.000000e+09 : f32
    %490 = vector.shape_cast %489 : vector<1x1x2xi1> to vector<1x1x2xi1>
    %491 = vector.broadcast %490 : vector<1x1x2xi1> to vector<1x2x2xi1>
    %492 = vector.broadcast %cst_193 : f32 to vector<1x2x2xf32>
    %493 = arith.select %491, %487, %492 : vector<1x2x2xi1>, vector<1x2x2xf32>
    %cst_194 = arith.constant dense<0xFF800000> : vector<1x2xf32>
    %494 = vector.multi_reduction <maximumf>, %493, %cst_194 [2] : vector<1x2x2xf32> to vector<1x2xf32>
    %495 = vector.shape_cast %494 : vector<1x2xf32> to vector<1x2x1xf32>
    %496 = vector.broadcast %495 : vector<1x2x1xf32> to vector<1x2x2xf32>
    %497 = arith.subf %493, %496 : vector<1x2x2xf32>
    %498 = math.exp %497 : vector<1x2x2xf32>
    %cst_195 = arith.constant dense<0.000000e+00> : vector<1x2xf32>
    %499 = vector.multi_reduction <add>, %498, %cst_195 [2] : vector<1x2x2xf32> to vector<1x2xf32>
    %500 = vector.shape_cast %499 : vector<1x2xf32> to vector<1x2x1xf32>
    %501 = tpu.reciprocal %500 {approx = true} : vector<1x2x1xf32> -> vector<1x2x1xf32>
    %502 = vector.broadcast %501 : vector<1x2x1xf32> to vector<1x2x2xf32>
    %503 = arith.mulf %498, %502 : vector<1x2x2xf32>
    %504 = arith.truncf %503 : vector<1x2x2xf32> to vector<1x2x2xbf16>
    "tpu.trace_start"() <{level = 10 : i32, message = "bqk,bkd->bqd"}> : () -> ()
    %cst_196 = arith.constant dense<0.000000e+00> : vector<1x2x8xf32>
    %505 = tpu.matmul %504, %484, %cst_196 {dimension_numbers = #tpu.dot_dimension_numbers<[2], [1], [1], [2], [0, 0, 0, 1, 1, 2], [0], [0]>} : vector<1x2x2xbf16>, vector<1x2x8xbf16>, vector<1x2x8xf32> -> vector<1x2x8xf32>
    "tpu.trace_stop"() : () -> ()
    %506 = vector.extract_strided_slice %447 {offsets = [0, 0, 16], sizes = [1, 2, 8], strides = [1, 1, 1]} : vector<1x2x32xf32> to vector<1x2x8xf32>
    %507 = arith.truncf %506 : vector<1x2x8xf32> to vector<1x2x8xbf16>
    %508 = vector.extract_strided_slice %449 {offsets = [0, 0, 16], sizes = [1, 2, 8], strides = [1, 1, 1]} : vector<1x2x32xf32> to vector<1x2x8xf32>
    %509 = arith.truncf %508 : vector<1x2x8xf32> to vector<1x2x8xbf16>
    %510 = vector.extract_strided_slice %451 {offsets = [0, 0, 16], sizes = [1, 2, 8], strides = [1, 1, 1]} : vector<1x2x32xf32> to vector<1x2x8xf32>
    %511 = arith.truncf %510 : vector<1x2x8xf32> to vector<1x2x8xbf16>
    "tpu.trace_start"() <{level = 10 : i32, message = "bqd,bkd->bqk"}> : () -> ()
    %cst_197 = arith.constant dense<0.000000e+00> : vector<1x2x2xf32>
    %512 = tpu.matmul %507, %509, %cst_197 {dimension_numbers = #tpu.dot_dimension_numbers<[2], [2], [1], [1], [0, 0, 0, 1, 1, 1], [0], [0]>} : vector<1x2x8xbf16>, vector<1x2x8xbf16>, vector<1x2x2xf32> -> vector<1x2x2xf32>
    "tpu.trace_stop"() : () -> ()
    %cst_198 = arith.constant 0.353553385 : f32
    %513 = vector.broadcast %cst_198 : f32 to vector<1x2x2xf32>
    %514 = arith.mulf %512, %513 : vector<1x2x2xf32>
    %cst_199 = arith.constant 0.000000e+00 : f32
    %515 = vector.broadcast %cst_199 : f32 to vector<1x1x2xf32>
    %516 = arith.cmpf ogt, %436, %515 : vector<1x1x2xf32>
    %cst_200 = arith.constant -1.000000e+09 : f32
    %517 = vector.shape_cast %516 : vector<1x1x2xi1> to vector<1x1x2xi1>
    %518 = vector.broadcast %517 : vector<1x1x2xi1> to vector<1x2x2xi1>
    %519 = vector.broadcast %cst_200 : f32 to vector<1x2x2xf32>
    %520 = arith.select %518, %514, %519 : vector<1x2x2xi1>, vector<1x2x2xf32>
    %cst_201 = arith.constant dense<0xFF800000> : vector<1x2xf32>
    %521 = vector.multi_reduction <maximumf>, %520, %cst_201 [2] : vector<1x2x2xf32> to vector<1x2xf32>
    %522 = vector.shape_cast %521 : vector<1x2xf32> to vector<1x2x1xf32>
    %523 = vector.broadcast %522 : vector<1x2x1xf32> to vector<1x2x2xf32>
    %524 = arith.subf %520, %523 : vector<1x2x2xf32>
    %525 = math.exp %524 : vector<1x2x2xf32>
    %cst_202 = arith.constant dense<0.000000e+00> : vector<1x2xf32>
    %526 = vector.multi_reduction <add>, %525, %cst_202 [2] : vector<1x2x2xf32> to vector<1x2xf32>
    %527 = vector.shape_cast %526 : vector<1x2xf32> to vector<1x2x1xf32>
    %528 = tpu.reciprocal %527 {approx = true} : vector<1x2x1xf32> -> vector<1x2x1xf32>
    %529 = vector.broadcast %528 : vector<1x2x1xf32> to vector<1x2x2xf32>
    %530 = arith.mulf %525, %529 : vector<1x2x2xf32>
    %531 = arith.truncf %530 : vector<1x2x2xf32> to vector<1x2x2xbf16>
    "tpu.trace_start"() <{level = 10 : i32, message = "bqk,bkd->bqd"}> : () -> ()
    %cst_203 = arith.constant dense<0.000000e+00> : vector<1x2x8xf32>
    %532 = tpu.matmul %531, %511, %cst_203 {dimension_numbers = #tpu.dot_dimension_numbers<[2], [1], [1], [2], [0, 0, 0, 1, 1, 2], [0], [0]>} : vector<1x2x2xbf16>, vector<1x2x8xbf16>, vector<1x2x8xf32> -> vector<1x2x8xf32>
    "tpu.trace_stop"() : () -> ()
    %533 = vector.extract_strided_slice %447 {offsets = [0, 0, 24], sizes = [1, 2, 8], strides = [1, 1, 1]} : vector<1x2x32xf32> to vector<1x2x8xf32>
    %534 = arith.truncf %533 : vector<1x2x8xf32> to vector<1x2x8xbf16>
    %535 = vector.extract_strided_slice %449 {offsets = [0, 0, 24], sizes = [1, 2, 8], strides = [1, 1, 1]} : vector<1x2x32xf32> to vector<1x2x8xf32>
    %536 = arith.truncf %535 : vector<1x2x8xf32> to vector<1x2x8xbf16>
    %537 = vector.extract_strided_slice %451 {offsets = [0, 0, 24], sizes = [1, 2, 8], strides = [1, 1, 1]} : vector<1x2x32xf32> to vector<1x2x8xf32>
    %538 = arith.truncf %537 : vector<1x2x8xf32> to vector<1x2x8xbf16>
    "tpu.trace_start"() <{level = 10 : i32, message = "bqd,bkd->bqk"}> : () -> ()
    %cst_204 = arith.constant dense<0.000000e+00> : vector<1x2x2xf32>
    %539 = tpu.matmul %534, %536, %cst_204 {dimension_numbers = #tpu.dot_dimension_numbers<[2], [2], [1], [1], [0, 0, 0, 1, 1, 1], [0], [0]>} : vector<1x2x8xbf16>, vector<1x2x8xbf16>, vector<1x2x2xf32> -> vector<1x2x2xf32>
    "tpu.trace_stop"() : () -> ()
    %cst_205 = arith.constant 0.353553385 : f32
    %540 = vector.broadcast %cst_205 : f32 to vector<1x2x2xf32>
    %541 = arith.mulf %539, %540 : vector<1x2x2xf32>
    %cst_206 = arith.constant 0.000000e+00 : f32
    %542 = vector.broadcast %cst_206 : f32 to vector<1x1x2xf32>
    %543 = arith.cmpf ogt, %436, %542 : vector<1x1x2xf32>
    %cst_207 = arith.constant -1.000000e+09 : f32
    %544 = vector.shape_cast %543 : vector<1x1x2xi1> to vector<1x1x2xi1>
    %545 = vector.broadcast %544 : vector<1x1x2xi1> to vector<1x2x2xi1>
    %546 = vector.broadcast %cst_207 : f32 to vector<1x2x2xf32>
    %547 = arith.select %545, %541, %546 : vector<1x2x2xi1>, vector<1x2x2xf32>
    %cst_208 = arith.constant dense<0xFF800000> : vector<1x2xf32>
    %548 = vector.multi_reduction <maximumf>, %547, %cst_208 [2] : vector<1x2x2xf32> to vector<1x2xf32>
    %549 = vector.shape_cast %548 : vector<1x2xf32> to vector<1x2x1xf32>
    %550 = vector.broadcast %549 : vector<1x2x1xf32> to vector<1x2x2xf32>
    %551 = arith.subf %547, %550 : vector<1x2x2xf32>
    %552 = math.exp %551 : vector<1x2x2xf32>
    %cst_209 = arith.constant dense<0.000000e+00> : vector<1x2xf32>
    %553 = vector.multi_reduction <add>, %552, %cst_209 [2] : vector<1x2x2xf32> to vector<1x2xf32>
    %554 = vector.shape_cast %553 : vector<1x2xf32> to vector<1x2x1xf32>
    %555 = tpu.reciprocal %554 {approx = true} : vector<1x2x1xf32> -> vector<1x2x1xf32>
    %556 = vector.broadcast %555 : vector<1x2x1xf32> to vector<1x2x2xf32>
    %557 = arith.mulf %552, %556 : vector<1x2x2xf32>
    %558 = arith.truncf %557 : vector<1x2x2xf32> to vector<1x2x2xbf16>
    "tpu.trace_start"() <{level = 10 : i32, message = "bqk,bkd->bqd"}> : () -> ()
    %cst_210 = arith.constant dense<0.000000e+00> : vector<1x2x8xf32>
    %559 = tpu.matmul %558, %538, %cst_210 {dimension_numbers = #tpu.dot_dimension_numbers<[2], [1], [1], [2], [0, 0, 0, 1, 1, 2], [0], [0]>} : vector<1x2x2xbf16>, vector<1x2x8xbf16>, vector<1x2x8xf32> -> vector<1x2x8xf32>
    "tpu.trace_stop"() : () -> ()
    %560 = tpu.concatenate %478, %505, %532, %559 in 2 : vector<1x2x8xf32>, vector<1x2x8xf32>, vector<1x2x8xf32>, vector<1x2x8xf32> -> vector<1x2x32xf32>
    %561 = vector.shape_cast %560 : vector<1x2x32xf32> to vector<2x32xf32>
    %c2_211 = arith.constant 2 : index
    %c0_212 = arith.constant 0 : index
    %c0_213 = arith.constant 0 : index
    %562 = vector.load %arg12[%c2_211, %c0_212, %c0_213] : memref<4x32x32xbf16, #tpu.memory_space<vmem>>, vector<1x32x32xbf16>
    %563 = vector.shape_cast %562 : vector<1x32x32xbf16> to vector<32x32xbf16>
    %564 = arith.truncf %561 : vector<2x32xf32> to vector<2x32xbf16>
    %cst_214 = arith.constant dense<0.000000e+00> : vector<2x32xf32>
    %565 = tpu.matmul %564, %563, %cst_214 {dimension_numbers = #tpu.dot_dimension_numbers<[1], [0], [0], [1], [0, 0, 1, 1], [], []>} : vector<2x32xbf16>, vector<32x32xbf16>, vector<2x32xf32> -> vector<2x32xf32>
    %c2_215 = arith.constant 2 : index
    %c0_216 = arith.constant 0 : index
    %c0_217 = arith.constant 0 : index
    %566 = vector.load %arg13[%c2_215, %c0_216, %c0_217] : memref<4x1x32xf32, #tpu.memory_space<vmem>>, vector<1x1x32xf32>
    %567 = vector.shape_cast %566 : vector<1x1x32xf32> to vector<1x32xf32>
    %568 = vector.broadcast %567 : vector<1x32xf32> to vector<2x32xf32>
    %569 = arith.addf %565, %568 : vector<2x32xf32>
    %570 = arith.addf %569, %437 : vector<2x32xf32>
    %c2_218 = arith.constant 2 : index
    %c0_219 = arith.constant 0 : index
    %c0_220 = arith.constant 0 : index
    %571 = vector.load %arg14[%c2_218, %c0_219, %c0_220] : memref<4x1x32xf32, #tpu.memory_space<vmem>>, vector<1x1x32xf32>
    %572 = vector.shape_cast %571 : vector<1x1x32xf32> to vector<1x32xf32>
    %c2_221 = arith.constant 2 : index
    %c0_222 = arith.constant 0 : index
    %c0_223 = arith.constant 0 : index
    %573 = vector.load %arg15[%c2_221, %c0_222, %c0_223] : memref<4x1x32xf32, #tpu.memory_space<vmem>>, vector<1x1x32xf32>
    %574 = vector.shape_cast %573 : vector<1x1x32xf32> to vector<1x32xf32>
    %cst_224 = arith.constant dense<0.000000e+00> : vector<2xf32>
    %575 = vector.multi_reduction <add>, %570, %cst_224 [1] : vector<2x32xf32> to vector<2xf32>
    %576 = vector.shape_cast %575 : vector<2xf32> to vector<2x1xf32>
    %cst_225 = arith.constant 3.200000e+01 : f32
    %577 = vector.broadcast %cst_225 : f32 to vector<2x1xf32>
    %578 = arith.divf %576, %577 : vector<2x1xf32>
    %579 = vector.broadcast %578 : vector<2x1xf32> to vector<2x32xf32>
    %580 = arith.subf %570, %579 : vector<2x32xf32>
    %581 = arith.mulf %580, %580 : vector<2x32xf32>
    %cst_226 = arith.constant dense<0.000000e+00> : vector<2xf32>
    %582 = vector.multi_reduction <add>, %581, %cst_226 [1] : vector<2x32xf32> to vector<2xf32>
    %583 = vector.shape_cast %582 : vector<2xf32> to vector<2x1xf32>
    %cst_227 = arith.constant 3.200000e+01 : f32
    %584 = vector.broadcast %cst_227 : f32 to vector<2x1xf32>
    %585 = arith.divf %583, %584 : vector<2x1xf32>
    %586 = vector.broadcast %578 : vector<2x1xf32> to vector<2x32xf32>
    %587 = arith.subf %570, %586 : vector<2x32xf32>
    %cst_228 = arith.constant 9.99999974E-6 : f32
    %588 = vector.broadcast %cst_228 : f32 to vector<2x1xf32>
    %589 = arith.addf %585, %588 : vector<2x1xf32>
    %590 = math.rsqrt %589 : vector<2x1xf32>
    %591 = vector.broadcast %590 : vector<2x1xf32> to vector<2x32xf32>
    %592 = arith.mulf %587, %591 : vector<2x32xf32>
    %593 = vector.broadcast %572 : vector<1x32xf32> to vector<2x32xf32>
    %594 = arith.mulf %592, %593 : vector<2x32xf32>
    %595 = vector.broadcast %574 : vector<1x32xf32> to vector<2x32xf32>
    %596 = arith.addf %594, %595 : vector<2x32xf32>
    %c2_229 = arith.constant 2 : index
    %c0_230 = arith.constant 0 : index
    %c0_231 = arith.constant 0 : index
    %597 = vector.load %arg16[%c2_229, %c0_230, %c0_231] : memref<4x32x64xbf16, #tpu.memory_space<vmem>>, vector<1x32x64xbf16>
    %598 = vector.shape_cast %597 : vector<1x32x64xbf16> to vector<32x64xbf16>
    %599 = arith.truncf %596 : vector<2x32xf32> to vector<2x32xbf16>
    %cst_232 = arith.constant dense<0.000000e+00> : vector<2x64xf32>
    %600 = tpu.matmul %599, %598, %cst_232 {dimension_numbers = #tpu.dot_dimension_numbers<[1], [0], [0], [1], [0, 0, 1, 1], [], []>} : vector<2x32xbf16>, vector<32x64xbf16>, vector<2x64xf32> -> vector<2x64xf32>
    %c2_233 = arith.constant 2 : index
    %c0_234 = arith.constant 0 : index
    %c0_235 = arith.constant 0 : index
    %601 = vector.load %arg17[%c2_233, %c0_234, %c0_235] : memref<4x1x64xf32, #tpu.memory_space<vmem>>, vector<1x1x64xf32>
    %602 = vector.shape_cast %601 : vector<1x1x64xf32> to vector<1x64xf32>
    %603 = vector.broadcast %602 : vector<1x64xf32> to vector<2x64xf32>
    %604 = arith.addf %600, %603 : vector<2x64xf32>
    %cst_236 = arith.constant 0.000000e+00 : f32
    %605 = vector.broadcast %cst_236 : f32 to vector<2x64xf32>
    %606 = arith.maximumf %604, %605 : vector<2x64xf32>
    %c2_237 = arith.constant 2 : index
    %c0_238 = arith.constant 0 : index
    %c0_239 = arith.constant 0 : index
    %607 = vector.load %arg18[%c2_237, %c0_238, %c0_239] : memref<4x64x32xbf16, #tpu.memory_space<vmem>>, vector<1x64x32xbf16>
    %608 = vector.shape_cast %607 : vector<1x64x32xbf16> to vector<64x32xbf16>
    %609 = arith.truncf %606 : vector<2x64xf32> to vector<2x64xbf16>
    %cst_240 = arith.constant dense<0.000000e+00> : vector<2x32xf32>
    %610 = tpu.matmul %609, %608, %cst_240 {dimension_numbers = #tpu.dot_dimension_numbers<[1], [0], [0], [1], [0, 0, 1, 1], [], []>} : vector<2x64xbf16>, vector<64x32xbf16>, vector<2x32xf32> -> vector<2x32xf32>
    %c2_241 = arith.constant 2 : index
    %c0_242 = arith.constant 0 : index
    %c0_243 = arith.constant 0 : index
    %611 = vector.load %arg19[%c2_241, %c0_242, %c0_243] : memref<4x1x32xf32, #tpu.memory_space<vmem>>, vector<1x1x32xf32>
    %612 = vector.shape_cast %611 : vector<1x1x32xf32> to vector<1x32xf32>
    %613 = vector.broadcast %612 : vector<1x32xf32> to vector<2x32xf32>
    %614 = arith.addf %610, %613 : vector<2x32xf32>
    %615 = arith.addf %614, %596 : vector<2x32xf32>
    %c2_244 = arith.constant 2 : index
    %c0_245 = arith.constant 0 : index
    %c0_246 = arith.constant 0 : index
    %616 = vector.load %arg20[%c2_244, %c0_245, %c0_246] : memref<4x1x32xf32, #tpu.memory_space<vmem>>, vector<1x1x32xf32>
    %617 = vector.shape_cast %616 : vector<1x1x32xf32> to vector<1x32xf32>
    %c2_247 = arith.constant 2 : index
    %c0_248 = arith.constant 0 : index
    %c0_249 = arith.constant 0 : index
    %618 = vector.load %arg21[%c2_247, %c0_248, %c0_249] : memref<4x1x32xf32, #tpu.memory_space<vmem>>, vector<1x1x32xf32>
    %619 = vector.shape_cast %618 : vector<1x1x32xf32> to vector<1x32xf32>
    %cst_250 = arith.constant dense<0.000000e+00> : vector<2xf32>
    %620 = vector.multi_reduction <add>, %615, %cst_250 [1] : vector<2x32xf32> to vector<2xf32>
    %621 = vector.shape_cast %620 : vector<2xf32> to vector<2x1xf32>
    %cst_251 = arith.constant 3.200000e+01 : f32
    %622 = vector.broadcast %cst_251 : f32 to vector<2x1xf32>
    %623 = arith.divf %621, %622 : vector<2x1xf32>
    %624 = vector.broadcast %623 : vector<2x1xf32> to vector<2x32xf32>
    %625 = arith.subf %615, %624 : vector<2x32xf32>
    %626 = arith.mulf %625, %625 : vector<2x32xf32>
    %cst_252 = arith.constant dense<0.000000e+00> : vector<2xf32>
    %627 = vector.multi_reduction <add>, %626, %cst_252 [1] : vector<2x32xf32> to vector<2xf32>
    %628 = vector.shape_cast %627 : vector<2xf32> to vector<2x1xf32>
    %cst_253 = arith.constant 3.200000e+01 : f32
    %629 = vector.broadcast %cst_253 : f32 to vector<2x1xf32>
    %630 = arith.divf %628, %629 : vector<2x1xf32>
    %631 = vector.broadcast %623 : vector<2x1xf32> to vector<2x32xf32>
    %632 = arith.subf %615, %631 : vector<2x32xf32>
    %cst_254 = arith.constant 9.99999974E-6 : f32
    %633 = vector.broadcast %cst_254 : f32 to vector<2x1xf32>
    %634 = arith.addf %630, %633 : vector<2x1xf32>
    %635 = math.rsqrt %634 : vector<2x1xf32>
    %636 = vector.broadcast %635 : vector<2x1xf32> to vector<2x32xf32>
    %637 = arith.mulf %632, %636 : vector<2x32xf32>
    %638 = vector.broadcast %617 : vector<1x32xf32> to vector<2x32xf32>
    %639 = arith.mulf %637, %638 : vector<2x32xf32>
    %640 = vector.broadcast %619 : vector<1x32xf32> to vector<2x32xf32>
    %641 = arith.addf %639, %640 : vector<2x32xf32>
    %642 = vector.shape_cast %641 : vector<2x32xf32> to vector<1x2x32xf32>
    %643 = vector.shape_cast %642 : vector<1x2x32xf32> to vector<2x32xf32>
    %c3 = arith.constant 3 : index
    %c0_255 = arith.constant 0 : index
    %c0_256 = arith.constant 0 : index
    %644 = vector.load %arg10[%c3, %c0_255, %c0_256] : memref<4x32x96xbf16, #tpu.memory_space<vmem>>, vector<1x32x96xbf16>
    %645 = vector.shape_cast %644 : vector<1x32x96xbf16> to vector<32x96xbf16>
    %646 = arith.truncf %643 : vector<2x32xf32> to vector<2x32xbf16>
    %cst_257 = arith.constant dense<0.000000e+00> : vector<2x96xf32>
    %647 = tpu.matmul %646, %645, %cst_257 {dimension_numbers = #tpu.dot_dimension_numbers<[1], [0], [0], [1], [0, 0, 1, 1], [], []>} : vector<2x32xbf16>, vector<32x96xbf16>, vector<2x96xf32> -> vector<2x96xf32>
    %c3_258 = arith.constant 3 : index
    %c0_259 = arith.constant 0 : index
    %c0_260 = arith.constant 0 : index
    %648 = vector.load %arg11[%c3_258, %c0_259, %c0_260] : memref<4x1x96xf32, #tpu.memory_space<vmem>>, vector<1x1x96xf32>
    %649 = vector.shape_cast %648 : vector<1x1x96xf32> to vector<1x96xf32>
    %650 = vector.broadcast %649 : vector<1x96xf32> to vector<2x96xf32>
    %651 = arith.addf %647, %650 : vector<2x96xf32>
    %652 = vector.extract_strided_slice %651 {offsets = [0, 0], sizes = [2, 32], strides = [1, 1]} : vector<2x96xf32> to vector<2x32xf32>
    %653 = vector.shape_cast %652 : vector<2x32xf32> to vector<1x2x32xf32>
    %654 = vector.extract_strided_slice %651 {offsets = [0, 32], sizes = [2, 32], strides = [1, 1]} : vector<2x96xf32> to vector<2x32xf32>
    %655 = vector.shape_cast %654 : vector<2x32xf32> to vector<1x2x32xf32>
    %656 = vector.extract_strided_slice %651 {offsets = [0, 64], sizes = [2, 32], strides = [1, 1]} : vector<2x96xf32> to vector<2x32xf32>
    %657 = vector.shape_cast %656 : vector<2x32xf32> to vector<1x2x32xf32>
    %658 = vector.extract_strided_slice %653 {offsets = [0, 0, 0], sizes = [1, 2, 8], strides = [1, 1, 1]} : vector<1x2x32xf32> to vector<1x2x8xf32>
    %659 = arith.truncf %658 : vector<1x2x8xf32> to vector<1x2x8xbf16>
    %660 = vector.extract_strided_slice %655 {offsets = [0, 0, 0], sizes = [1, 2, 8], strides = [1, 1, 1]} : vector<1x2x32xf32> to vector<1x2x8xf32>
    %661 = arith.truncf %660 : vector<1x2x8xf32> to vector<1x2x8xbf16>
    %662 = vector.extract_strided_slice %657 {offsets = [0, 0, 0], sizes = [1, 2, 8], strides = [1, 1, 1]} : vector<1x2x32xf32> to vector<1x2x8xf32>
    %663 = arith.truncf %662 : vector<1x2x8xf32> to vector<1x2x8xbf16>
    "tpu.trace_start"() <{level = 10 : i32, message = "bqd,bkd->bqk"}> : () -> ()
    %cst_261 = arith.constant dense<0.000000e+00> : vector<1x2x2xf32>
    %664 = tpu.matmul %659, %661, %cst_261 {dimension_numbers = #tpu.dot_dimension_numbers<[2], [2], [1], [1], [0, 0, 0, 1, 1, 1], [0], [0]>} : vector<1x2x8xbf16>, vector<1x2x8xbf16>, vector<1x2x2xf32> -> vector<1x2x2xf32>
    "tpu.trace_stop"() : () -> ()
    %cst_262 = arith.constant 0.353553385 : f32
    %665 = vector.broadcast %cst_262 : f32 to vector<1x2x2xf32>
    %666 = arith.mulf %664, %665 : vector<1x2x2xf32>
    %cst_263 = arith.constant 0.000000e+00 : f32
    %667 = vector.broadcast %cst_263 : f32 to vector<1x1x2xf32>
    %668 = arith.cmpf ogt, %436, %667 : vector<1x1x2xf32>
    %cst_264 = arith.constant -1.000000e+09 : f32
    %669 = vector.shape_cast %668 : vector<1x1x2xi1> to vector<1x1x2xi1>
    %670 = vector.broadcast %669 : vector<1x1x2xi1> to vector<1x2x2xi1>
    %671 = vector.broadcast %cst_264 : f32 to vector<1x2x2xf32>
    %672 = arith.select %670, %666, %671 : vector<1x2x2xi1>, vector<1x2x2xf32>
    %cst_265 = arith.constant dense<0xFF800000> : vector<1x2xf32>
    %673 = vector.multi_reduction <maximumf>, %672, %cst_265 [2] : vector<1x2x2xf32> to vector<1x2xf32>
    %674 = vector.shape_cast %673 : vector<1x2xf32> to vector<1x2x1xf32>
    %675 = vector.broadcast %674 : vector<1x2x1xf32> to vector<1x2x2xf32>
    %676 = arith.subf %672, %675 : vector<1x2x2xf32>
    %677 = math.exp %676 : vector<1x2x2xf32>
    %cst_266 = arith.constant dense<0.000000e+00> : vector<1x2xf32>
    %678 = vector.multi_reduction <add>, %677, %cst_266 [2] : vector<1x2x2xf32> to vector<1x2xf32>
    %679 = vector.shape_cast %678 : vector<1x2xf32> to vector<1x2x1xf32>
    %680 = tpu.reciprocal %679 {approx = true} : vector<1x2x1xf32> -> vector<1x2x1xf32>
    %681 = vector.broadcast %680 : vector<1x2x1xf32> to vector<1x2x2xf32>
    %682 = arith.mulf %677, %681 : vector<1x2x2xf32>
    %683 = arith.truncf %682 : vector<1x2x2xf32> to vector<1x2x2xbf16>
    "tpu.trace_start"() <{level = 10 : i32, message = "bqk,bkd->bqd"}> : () -> ()
    %cst_267 = arith.constant dense<0.000000e+00> : vector<1x2x8xf32>
    %684 = tpu.matmul %683, %663, %cst_267 {dimension_numbers = #tpu.dot_dimension_numbers<[2], [1], [1], [2], [0, 0, 0, 1, 1, 2], [0], [0]>} : vector<1x2x2xbf16>, vector<1x2x8xbf16>, vector<1x2x8xf32> -> vector<1x2x8xf32>
    "tpu.trace_stop"() : () -> ()
    %685 = vector.extract_strided_slice %653 {offsets = [0, 0, 8], sizes = [1, 2, 8], strides = [1, 1, 1]} : vector<1x2x32xf32> to vector<1x2x8xf32>
    %686 = arith.truncf %685 : vector<1x2x8xf32> to vector<1x2x8xbf16>
    %687 = vector.extract_strided_slice %655 {offsets = [0, 0, 8], sizes = [1, 2, 8], strides = [1, 1, 1]} : vector<1x2x32xf32> to vector<1x2x8xf32>
    %688 = arith.truncf %687 : vector<1x2x8xf32> to vector<1x2x8xbf16>
    %689 = vector.extract_strided_slice %657 {offsets = [0, 0, 8], sizes = [1, 2, 8], strides = [1, 1, 1]} : vector<1x2x32xf32> to vector<1x2x8xf32>
    %690 = arith.truncf %689 : vector<1x2x8xf32> to vector<1x2x8xbf16>
    "tpu.trace_start"() <{level = 10 : i32, message = "bqd,bkd->bqk"}> : () -> ()
    %cst_268 = arith.constant dense<0.000000e+00> : vector<1x2x2xf32>
    %691 = tpu.matmul %686, %688, %cst_268 {dimension_numbers = #tpu.dot_dimension_numbers<[2], [2], [1], [1], [0, 0, 0, 1, 1, 1], [0], [0]>} : vector<1x2x8xbf16>, vector<1x2x8xbf16>, vector<1x2x2xf32> -> vector<1x2x2xf32>
    "tpu.trace_stop"() : () -> ()
    %cst_269 = arith.constant 0.353553385 : f32
    %692 = vector.broadcast %cst_269 : f32 to vector<1x2x2xf32>
    %693 = arith.mulf %691, %692 : vector<1x2x2xf32>
    %cst_270 = arith.constant 0.000000e+00 : f32
    %694 = vector.broadcast %cst_270 : f32 to vector<1x1x2xf32>
    %695 = arith.cmpf ogt, %436, %694 : vector<1x1x2xf32>
    %cst_271 = arith.constant -1.000000e+09 : f32
    %696 = vector.shape_cast %695 : vector<1x1x2xi1> to vector<1x1x2xi1>
    %697 = vector.broadcast %696 : vector<1x1x2xi1> to vector<1x2x2xi1>
    %698 = vector.broadcast %cst_271 : f32 to vector<1x2x2xf32>
    %699 = arith.select %697, %693, %698 : vector<1x2x2xi1>, vector<1x2x2xf32>
    %cst_272 = arith.constant dense<0xFF800000> : vector<1x2xf32>
    %700 = vector.multi_reduction <maximumf>, %699, %cst_272 [2] : vector<1x2x2xf32> to vector<1x2xf32>
    %701 = vector.shape_cast %700 : vector<1x2xf32> to vector<1x2x1xf32>
    %702 = vector.broadcast %701 : vector<1x2x1xf32> to vector<1x2x2xf32>
    %703 = arith.subf %699, %702 : vector<1x2x2xf32>
    %704 = math.exp %703 : vector<1x2x2xf32>
    %cst_273 = arith.constant dense<0.000000e+00> : vector<1x2xf32>
    %705 = vector.multi_reduction <add>, %704, %cst_273 [2] : vector<1x2x2xf32> to vector<1x2xf32>
    %706 = vector.shape_cast %705 : vector<1x2xf32> to vector<1x2x1xf32>
    %707 = tpu.reciprocal %706 {approx = true} : vector<1x2x1xf32> -> vector<1x2x1xf32>
    %708 = vector.broadcast %707 : vector<1x2x1xf32> to vector<1x2x2xf32>
    %709 = arith.mulf %704, %708 : vector<1x2x2xf32>
    %710 = arith.truncf %709 : vector<1x2x2xf32> to vector<1x2x2xbf16>
    "tpu.trace_start"() <{level = 10 : i32, message = "bqk,bkd->bqd"}> : () -> ()
    %cst_274 = arith.constant dense<0.000000e+00> : vector<1x2x8xf32>
    %711 = tpu.matmul %710, %690, %cst_274 {dimension_numbers = #tpu.dot_dimension_numbers<[2], [1], [1], [2], [0, 0, 0, 1, 1, 2], [0], [0]>} : vector<1x2x2xbf16>, vector<1x2x8xbf16>, vector<1x2x8xf32> -> vector<1x2x8xf32>
    "tpu.trace_stop"() : () -> ()
    %712 = vector.extract_strided_slice %653 {offsets = [0, 0, 16], sizes = [1, 2, 8], strides = [1, 1, 1]} : vector<1x2x32xf32> to vector<1x2x8xf32>
    %713 = arith.truncf %712 : vector<1x2x8xf32> to vector<1x2x8xbf16>
    %714 = vector.extract_strided_slice %655 {offsets = [0, 0, 16], sizes = [1, 2, 8], strides = [1, 1, 1]} : vector<1x2x32xf32> to vector<1x2x8xf32>
    %715 = arith.truncf %714 : vector<1x2x8xf32> to vector<1x2x8xbf16>
    %716 = vector.extract_strided_slice %657 {offsets = [0, 0, 16], sizes = [1, 2, 8], strides = [1, 1, 1]} : vector<1x2x32xf32> to vector<1x2x8xf32>
    %717 = arith.truncf %716 : vector<1x2x8xf32> to vector<1x2x8xbf16>
    "tpu.trace_start"() <{level = 10 : i32, message = "bqd,bkd->bqk"}> : () -> ()
    %cst_275 = arith.constant dense<0.000000e+00> : vector<1x2x2xf32>
    %718 = tpu.matmul %713, %715, %cst_275 {dimension_numbers = #tpu.dot_dimension_numbers<[2], [2], [1], [1], [0, 0, 0, 1, 1, 1], [0], [0]>} : vector<1x2x8xbf16>, vector<1x2x8xbf16>, vector<1x2x2xf32> -> vector<1x2x2xf32>
    "tpu.trace_stop"() : () -> ()
    %cst_276 = arith.constant 0.353553385 : f32
    %719 = vector.broadcast %cst_276 : f32 to vector<1x2x2xf32>
    %720 = arith.mulf %718, %719 : vector<1x2x2xf32>
    %cst_277 = arith.constant 0.000000e+00 : f32
    %721 = vector.broadcast %cst_277 : f32 to vector<1x1x2xf32>
    %722 = arith.cmpf ogt, %436, %721 : vector<1x1x2xf32>
    %cst_278 = arith.constant -1.000000e+09 : f32
    %723 = vector.shape_cast %722 : vector<1x1x2xi1> to vector<1x1x2xi1>
    %724 = vector.broadcast %723 : vector<1x1x2xi1> to vector<1x2x2xi1>
    %725 = vector.broadcast %cst_278 : f32 to vector<1x2x2xf32>
    %726 = arith.select %724, %720, %725 : vector<1x2x2xi1>, vector<1x2x2xf32>
    %cst_279 = arith.constant dense<0xFF800000> : vector<1x2xf32>
    %727 = vector.multi_reduction <maximumf>, %726, %cst_279 [2] : vector<1x2x2xf32> to vector<1x2xf32>
    %728 = vector.shape_cast %727 : vector<1x2xf32> to vector<1x2x1xf32>
    %729 = vector.broadcast %728 : vector<1x2x1xf32> to vector<1x2x2xf32>
    %730 = arith.subf %726, %729 : vector<1x2x2xf32>
    %731 = math.exp %730 : vector<1x2x2xf32>
    %cst_280 = arith.constant dense<0.000000e+00> : vector<1x2xf32>
    %732 = vector.multi_reduction <add>, %731, %cst_280 [2] : vector<1x2x2xf32> to vector<1x2xf32>
    %733 = vector.shape_cast %732 : vector<1x2xf32> to vector<1x2x1xf32>
    %734 = tpu.reciprocal %733 {approx = true} : vector<1x2x1xf32> -> vector<1x2x1xf32>
    %735 = vector.broadcast %734 : vector<1x2x1xf32> to vector<1x2x2xf32>
    %736 = arith.mulf %731, %735 : vector<1x2x2xf32>
    %737 = arith.truncf %736 : vector<1x2x2xf32> to vector<1x2x2xbf16>
    "tpu.trace_start"() <{level = 10 : i32, message = "bqk,bkd->bqd"}> : () -> ()
    %cst_281 = arith.constant dense<0.000000e+00> : vector<1x2x8xf32>
    %738 = tpu.matmul %737, %717, %cst_281 {dimension_numbers = #tpu.dot_dimension_numbers<[2], [1], [1], [2], [0, 0, 0, 1, 1, 2], [0], [0]>} : vector<1x2x2xbf16>, vector<1x2x8xbf16>, vector<1x2x8xf32> -> vector<1x2x8xf32>
    "tpu.trace_stop"() : () -> ()
    %739 = vector.extract_strided_slice %653 {offsets = [0, 0, 24], sizes = [1, 2, 8], strides = [1, 1, 1]} : vector<1x2x32xf32> to vector<1x2x8xf32>
    %740 = arith.truncf %739 : vector<1x2x8xf32> to vector<1x2x8xbf16>
    %741 = vector.extract_strided_slice %655 {offsets = [0, 0, 24], sizes = [1, 2, 8], strides = [1, 1, 1]} : vector<1x2x32xf32> to vector<1x2x8xf32>
    %742 = arith.truncf %741 : vector<1x2x8xf32> to vector<1x2x8xbf16>
    %743 = vector.extract_strided_slice %657 {offsets = [0, 0, 24], sizes = [1, 2, 8], strides = [1, 1, 1]} : vector<1x2x32xf32> to vector<1x2x8xf32>
    %744 = arith.truncf %743 : vector<1x2x8xf32> to vector<1x2x8xbf16>
    "tpu.trace_start"() <{level = 10 : i32, message = "bqd,bkd->bqk"}> : () -> ()
    %cst_282 = arith.constant dense<0.000000e+00> : vector<1x2x2xf32>
    %745 = tpu.matmul %740, %742, %cst_282 {dimension_numbers = #tpu.dot_dimension_numbers<[2], [2], [1], [1], [0, 0, 0, 1, 1, 1], [0], [0]>} : vector<1x2x8xbf16>, vector<1x2x8xbf16>, vector<1x2x2xf32> -> vector<1x2x2xf32>
    "tpu.trace_stop"() : () -> ()
    %cst_283 = arith.constant 0.353553385 : f32
    %746 = vector.broadcast %cst_283 : f32 to vector<1x2x2xf32>
    %747 = arith.mulf %745, %746 : vector<1x2x2xf32>
    %cst_284 = arith.constant 0.000000e+00 : f32
    %748 = vector.broadcast %cst_284 : f32 to vector<1x1x2xf32>
    %749 = arith.cmpf ogt, %436, %748 : vector<1x1x2xf32>
    %cst_285 = arith.constant -1.000000e+09 : f32
    %750 = vector.shape_cast %749 : vector<1x1x2xi1> to vector<1x1x2xi1>
    %751 = vector.broadcast %750 : vector<1x1x2xi1> to vector<1x2x2xi1>
    %752 = vector.broadcast %cst_285 : f32 to vector<1x2x2xf32>
    %753 = arith.select %751, %747, %752 : vector<1x2x2xi1>, vector<1x2x2xf32>
    %cst_286 = arith.constant dense<0xFF800000> : vector<1x2xf32>
    %754 = vector.multi_reduction <maximumf>, %753, %cst_286 [2] : vector<1x2x2xf32> to vector<1x2xf32>
    %755 = vector.shape_cast %754 : vector<1x2xf32> to vector<1x2x1xf32>
    %756 = vector.broadcast %755 : vector<1x2x1xf32> to vector<1x2x2xf32>
    %757 = arith.subf %753, %756 : vector<1x2x2xf32>
    %758 = math.exp %757 : vector<1x2x2xf32>
    %cst_287 = arith.constant dense<0.000000e+00> : vector<1x2xf32>
    %759 = vector.multi_reduction <add>, %758, %cst_287 [2] : vector<1x2x2xf32> to vector<1x2xf32>
    %760 = vector.shape_cast %759 : vector<1x2xf32> to vector<1x2x1xf32>
    %761 = tpu.reciprocal %760 {approx = true} : vector<1x2x1xf32> -> vector<1x2x1xf32>
    %762 = vector.broadcast %761 : vector<1x2x1xf32> to vector<1x2x2xf32>
    %763 = arith.mulf %758, %762 : vector<1x2x2xf32>
    %764 = arith.truncf %763 : vector<1x2x2xf32> to vector<1x2x2xbf16>
    "tpu.trace_start"() <{level = 10 : i32, message = "bqk,bkd->bqd"}> : () -> ()
    %cst_288 = arith.constant dense<0.000000e+00> : vector<1x2x8xf32>
    %765 = tpu.matmul %764, %744, %cst_288 {dimension_numbers = #tpu.dot_dimension_numbers<[2], [1], [1], [2], [0, 0, 0, 1, 1, 2], [0], [0]>} : vector<1x2x2xbf16>, vector<1x2x8xbf16>, vector<1x2x8xf32> -> vector<1x2x8xf32>
    "tpu.trace_stop"() : () -> ()
    %766 = tpu.concatenate %684, %711, %738, %765 in 2 : vector<1x2x8xf32>, vector<1x2x8xf32>, vector<1x2x8xf32>, vector<1x2x8xf32> -> vector<1x2x32xf32>
    %767 = vector.shape_cast %766 : vector<1x2x32xf32> to vector<2x32xf32>
    %c3_289 = arith.constant 3 : index
    %c0_290 = arith.constant 0 : index
    %c0_291 = arith.constant 0 : index
    %768 = vector.load %arg12[%c3_289, %c0_290, %c0_291] : memref<4x32x32xbf16, #tpu.memory_space<vmem>>, vector<1x32x32xbf16>
    %769 = vector.shape_cast %768 : vector<1x32x32xbf16> to vector<32x32xbf16>
    %770 = arith.truncf %767 : vector<2x32xf32> to vector<2x32xbf16>
    %cst_292 = arith.constant dense<0.000000e+00> : vector<2x32xf32>
    %771 = tpu.matmul %770, %769, %cst_292 {dimension_numbers = #tpu.dot_dimension_numbers<[1], [0], [0], [1], [0, 0, 1, 1], [], []>} : vector<2x32xbf16>, vector<32x32xbf16>, vector<2x32xf32> -> vector<2x32xf32>
    %c3_293 = arith.constant 3 : index
    %c0_294 = arith.constant 0 : index
    %c0_295 = arith.constant 0 : index
    %772 = vector.load %arg13[%c3_293, %c0_294, %c0_295] : memref<4x1x32xf32, #tpu.memory_space<vmem>>, vector<1x1x32xf32>
    %773 = vector.shape_cast %772 : vector<1x1x32xf32> to vector<1x32xf32>
    %774 = vector.broadcast %773 : vector<1x32xf32> to vector<2x32xf32>
    %775 = arith.addf %771, %774 : vector<2x32xf32>
    %776 = arith.addf %775, %643 : vector<2x32xf32>
    %c3_296 = arith.constant 3 : index
    %c0_297 = arith.constant 0 : index
    %c0_298 = arith.constant 0 : index
    %777 = vector.load %arg14[%c3_296, %c0_297, %c0_298] : memref<4x1x32xf32, #tpu.memory_space<vmem>>, vector<1x1x32xf32>
    %778 = vector.shape_cast %777 : vector<1x1x32xf32> to vector<1x32xf32>
    %c3_299 = arith.constant 3 : index
    %c0_300 = arith.constant 0 : index
    %c0_301 = arith.constant 0 : index
    %779 = vector.load %arg15[%c3_299, %c0_300, %c0_301] : memref<4x1x32xf32, #tpu.memory_space<vmem>>, vector<1x1x32xf32>
    %780 = vector.shape_cast %779 : vector<1x1x32xf32> to vector<1x32xf32>
    %cst_302 = arith.constant dense<0.000000e+00> : vector<2xf32>
    %781 = vector.multi_reduction <add>, %776, %cst_302 [1] : vector<2x32xf32> to vector<2xf32>
    %782 = vector.shape_cast %781 : vector<2xf32> to vector<2x1xf32>
    %cst_303 = arith.constant 3.200000e+01 : f32
    %783 = vector.broadcast %cst_303 : f32 to vector<2x1xf32>
    %784 = arith.divf %782, %783 : vector<2x1xf32>
    %785 = vector.broadcast %784 : vector<2x1xf32> to vector<2x32xf32>
    %786 = arith.subf %776, %785 : vector<2x32xf32>
    %787 = arith.mulf %786, %786 : vector<2x32xf32>
    %cst_304 = arith.constant dense<0.000000e+00> : vector<2xf32>
    %788 = vector.multi_reduction <add>, %787, %cst_304 [1] : vector<2x32xf32> to vector<2xf32>
    %789 = vector.shape_cast %788 : vector<2xf32> to vector<2x1xf32>
    %cst_305 = arith.constant 3.200000e+01 : f32
    %790 = vector.broadcast %cst_305 : f32 to vector<2x1xf32>
    %791 = arith.divf %789, %790 : vector<2x1xf32>
    %792 = vector.broadcast %784 : vector<2x1xf32> to vector<2x32xf32>
    %793 = arith.subf %776, %792 : vector<2x32xf32>
    %cst_306 = arith.constant 9.99999974E-6 : f32
    %794 = vector.broadcast %cst_306 : f32 to vector<2x1xf32>
    %795 = arith.addf %791, %794 : vector<2x1xf32>
    %796 = math.rsqrt %795 : vector<2x1xf32>
    %797 = vector.broadcast %796 : vector<2x1xf32> to vector<2x32xf32>
    %798 = arith.mulf %793, %797 : vector<2x32xf32>
    %799 = vector.broadcast %778 : vector<1x32xf32> to vector<2x32xf32>
    %800 = arith.mulf %798, %799 : vector<2x32xf32>
    %801 = vector.broadcast %780 : vector<1x32xf32> to vector<2x32xf32>
    %802 = arith.addf %800, %801 : vector<2x32xf32>
    %c3_307 = arith.constant 3 : index
    %c0_308 = arith.constant 0 : index
    %c0_309 = arith.constant 0 : index
    %803 = vector.load %arg16[%c3_307, %c0_308, %c0_309] : memref<4x32x64xbf16, #tpu.memory_space<vmem>>, vector<1x32x64xbf16>
    %804 = vector.shape_cast %803 : vector<1x32x64xbf16> to vector<32x64xbf16>
    %805 = arith.truncf %802 : vector<2x32xf32> to vector<2x32xbf16>
    %cst_310 = arith.constant dense<0.000000e+00> : vector<2x64xf32>
    %806 = tpu.matmul %805, %804, %cst_310 {dimension_numbers = #tpu.dot_dimension_numbers<[1], [0], [0], [1], [0, 0, 1, 1], [], []>} : vector<2x32xbf16>, vector<32x64xbf16>, vector<2x64xf32> -> vector<2x64xf32>
    %c3_311 = arith.constant 3 : index
    %c0_312 = arith.constant 0 : index
    %c0_313 = arith.constant 0 : index
    %807 = vector.load %arg17[%c3_311, %c0_312, %c0_313] : memref<4x1x64xf32, #tpu.memory_space<vmem>>, vector<1x1x64xf32>
    %808 = vector.shape_cast %807 : vector<1x1x64xf32> to vector<1x64xf32>
    %809 = vector.broadcast %808 : vector<1x64xf32> to vector<2x64xf32>
    %810 = arith.addf %806, %809 : vector<2x64xf32>
    %cst_314 = arith.constant 0.000000e+00 : f32
    %811 = vector.broadcast %cst_314 : f32 to vector<2x64xf32>
    %812 = arith.maximumf %810, %811 : vector<2x64xf32>
    %c3_315 = arith.constant 3 : index
    %c0_316 = arith.constant 0 : index
    %c0_317 = arith.constant 0 : index
    %813 = vector.load %arg18[%c3_315, %c0_316, %c0_317] : memref<4x64x32xbf16, #tpu.memory_space<vmem>>, vector<1x64x32xbf16>
    %814 = vector.shape_cast %813 : vector<1x64x32xbf16> to vector<64x32xbf16>
    %815 = arith.truncf %812 : vector<2x64xf32> to vector<2x64xbf16>
    %cst_318 = arith.constant dense<0.000000e+00> : vector<2x32xf32>
    %816 = tpu.matmul %815, %814, %cst_318 {dimension_numbers = #tpu.dot_dimension_numbers<[1], [0], [0], [1], [0, 0, 1, 1], [], []>} : vector<2x64xbf16>, vector<64x32xbf16>, vector<2x32xf32> -> vector<2x32xf32>
    %c3_319 = arith.constant 3 : index
    %c0_320 = arith.constant 0 : index
    %c0_321 = arith.constant 0 : index
    %817 = vector.load %arg19[%c3_319, %c0_320, %c0_321] : memref<4x1x32xf32, #tpu.memory_space<vmem>>, vector<1x1x32xf32>
    %818 = vector.shape_cast %817 : vector<1x1x32xf32> to vector<1x32xf32>
    %819 = vector.broadcast %818 : vector<1x32xf32> to vector<2x32xf32>
    %820 = arith.addf %816, %819 : vector<2x32xf32>
    %821 = arith.addf %820, %802 : vector<2x32xf32>
    %c3_322 = arith.constant 3 : index
    %c0_323 = arith.constant 0 : index
    %c0_324 = arith.constant 0 : index
    %822 = vector.load %arg20[%c3_322, %c0_323, %c0_324] : memref<4x1x32xf32, #tpu.memory_space<vmem>>, vector<1x1x32xf32>
    %823 = vector.shape_cast %822 : vector<1x1x32xf32> to vector<1x32xf32>
    %c3_325 = arith.constant 3 : index
    %c0_326 = arith.constant 0 : index
    %c0_327 = arith.constant 0 : index
    %824 = vector.load %arg21[%c3_325, %c0_326, %c0_327] : memref<4x1x32xf32, #tpu.memory_space<vmem>>, vector<1x1x32xf32>
    %825 = vector.shape_cast %824 : vector<1x1x32xf32> to vector<1x32xf32>
    %cst_328 = arith.constant dense<0.000000e+00> : vector<2xf32>
    %826 = vector.multi_reduction <add>, %821, %cst_328 [1] : vector<2x32xf32> to vector<2xf32>
    %827 = vector.shape_cast %826 : vector<2xf32> to vector<2x1xf32>
    %cst_329 = arith.constant 3.200000e+01 : f32
    %828 = vector.broadcast %cst_329 : f32 to vector<2x1xf32>
    %829 = arith.divf %827, %828 : vector<2x1xf32>
    %830 = vector.broadcast %829 : vector<2x1xf32> to vector<2x32xf32>
    %831 = arith.subf %821, %830 : vector<2x32xf32>
    %832 = arith.mulf %831, %831 : vector<2x32xf32>
    %cst_330 = arith.constant dense<0.000000e+00> : vector<2xf32>
    %833 = vector.multi_reduction <add>, %832, %cst_330 [1] : vector<2x32xf32> to vector<2xf32>
    %834 = vector.shape_cast %833 : vector<2xf32> to vector<2x1xf32>
    %cst_331 = arith.constant 3.200000e+01 : f32
    %835 = vector.broadcast %cst_331 : f32 to vector<2x1xf32>
    %836 = arith.divf %834, %835 : vector<2x1xf32>
    %837 = vector.broadcast %829 : vector<2x1xf32> to vector<2x32xf32>
    %838 = arith.subf %821, %837 : vector<2x32xf32>
    %cst_332 = arith.constant 9.99999974E-6 : f32
    %839 = vector.broadcast %cst_332 : f32 to vector<2x1xf32>
    %840 = arith.addf %836, %839 : vector<2x1xf32>
    %841 = math.rsqrt %840 : vector<2x1xf32>
    %842 = vector.broadcast %841 : vector<2x1xf32> to vector<2x32xf32>
    %843 = arith.mulf %838, %842 : vector<2x32xf32>
    %844 = vector.broadcast %823 : vector<1x32xf32> to vector<2x32xf32>
    %845 = arith.mulf %843, %844 : vector<2x32xf32>
    %846 = vector.broadcast %825 : vector<1x32xf32> to vector<2x32xf32>
    %847 = arith.addf %845, %846 : vector<2x32xf32>
    %848 = vector.shape_cast %847 : vector<2x32xf32> to vector<1x2x32xf32>
    %cst_333 = arith.constant dense<0.000000e+00> : vector<1x32xf32>
    %849 = vector.multi_reduction <add>, %848, %cst_333 [1] : vector<1x2x32xf32> to vector<1x32xf32>
    %cst_334 = arith.constant 2.000000e+00 : f32
    %850 = vector.broadcast %cst_334 : f32 to vector<1x32xf32>
    %851 = arith.divf %849, %850 : vector<1x32xf32>
    %c0_335 = arith.constant 0 : index
    %c0_336 = arith.constant 0 : index
    %852 = vector.load %arg9[%c0_335, %c0_336] : memref<32x5xbf16, #tpu.memory_space<vmem>>, vector<32x5xbf16>
    %853 = arith.truncf %851 : vector<1x32xf32> to vector<1x32xbf16>
    %cst_337 = arith.constant dense<0.000000e+00> : vector<1x5xf32>
    %854 = tpu.matmul %853, %852, %cst_337 {dimension_numbers = #tpu.dot_dimension_numbers<[1], [0], [0], [1], [0, 0, 1, 1], [], []>} : vector<1x32xbf16>, vector<32x5xbf16>, vector<1x5xf32> -> vector<1x5xf32>
    %c0_338 = arith.constant 0 : index
    %c0_339 = arith.constant 0 : index
    %c0_340 = arith.constant 0 : index
    %855 = vector.load %arg22[%c0_338, %c0_339, %c0_340] : memref<1x1x5xf32, #tpu.memory_space<vmem>>, vector<1x1x5xf32>
    %856 = vector.shape_cast %855 : vector<1x1x5xf32> to vector<1x5xf32>
    %857 = vector.shape_cast %854 : vector<1x5xf32> to vector<1x1x5xf32>
    tpu.vector_store %arg22[%c0_338, %c0_339, %c0_340], %857 {strides = array<i32>} : memref<1x1x5xf32, #tpu.memory_space<vmem>>, vector<1x1x5xf32>,
    return
  }
  func.func @transform_0(%arg0: i32) -> (i32, i32, i32) {
    %c0_i32 = arith.constant 0 : i32
    %c0_i32_0 = arith.constant 0 : i32
    %c0_i32_1 = arith.constant 0 : i32
    return %arg0, %c0_i32, %c0_i32_0 : i32, i32, i32
  }
  func.func @transform_1(%arg0: i32) -> (i32, i32, i32, i32) {
    %c0_i32 = arith.constant 0 : i32
    %c0_i32_0 = arith.constant 0 : i32
    %c0_i32_1 = arith.constant 0 : i32
    %c0_i32_2 = arith.constant 0 : i32
    return %arg0, %c0_i32, %c0_i32_0, %c0_i32_1 : i32, i32, i32, i32
  }
  func.func @transform_2(%arg0: i32) -> (i32, i32, i32) {
    %c0_i32 = arith.constant 0 : i32
    %c0_i32_0 = arith.constant 0 : i32
    %c0_i32_1 = arith.constant 0 : i32
    return %arg0, %c0_i32, %c0_i32_0 : i32, i32, i32
  }
  func.func @transform_3(%arg0: i32) -> (i32, i32) {
    %c0_i32 = arith.constant 0 : i32
    %c0_i32_0 = arith.constant 0 : i32
    %c0_i32_1 = arith.constant 0 : i32
    return %c0_i32, %c0_i32_0 : i32, i32
  }
  func.func @transform_4(%arg0: i32) -> (i32, i32) {
    %c0_i32 = arith.constant 0 : i32
    %c0_i32_0 = arith.constant 0 : i32
    %c0_i32_1 = arith.constant 0 : i32
    return %c0_i32, %c0_i32_0 : i32, i32
  }
  func.func @transform_5(%arg0: i32) -> (i32, i32) {
    %c0_i32 = arith.constant 0 : i32
    %c0_i32_0 = arith.constant 0 : i32
    %c0_i32_1 = arith.constant 0 : i32
    return %c0_i32, %c0_i32_0 : i32, i32
  }
  func.func @transform_6(%arg0: i32) -> (i32, i32) {
    %c0_i32 = arith.constant 0 : i32
    %c0_i32_0 = arith.constant 0 : i32
    %c0_i32_1 = arith.constant 0 : i32
    return %c0_i32, %c0_i32_0 : i32, i32
  }
  func.func @transform_7(%arg0: i32) -> (i32, i32) {
    %c0_i32 = arith.constant 0 : i32
    %c0_i32_0 = arith.constant 0 : i32
    %c0_i32_1 = arith.constant 0 : i32
    return %c0_i32, %c0_i32_0 : i32, i32
  }
  func.func @transform_8(%arg0: i32) -> (i32, i32) {
    %c0_i32 = arith.constant 0 : i32
    %c0_i32_0 = arith.constant 0 : i32
    %c0_i32_1 = arith.constant 0 : i32
    return %c0_i32, %c0_i32_0 : i32, i32
  }
  func.func @transform_9(%arg0: i32) -> (i32, i32, i32) {
    %c0_i32 = arith.constant 0 : i32
    %c0_i32_0 = arith.constant 0 : i32
    %c0_i32_1 = arith.constant 0 : i32
    %c0_i32_2 = arith.constant 0 : i32
    return %c0_i32, %c0_i32_0, %c0_i32_1 : i32, i32, i32
  }
  func.func @transform_10(%arg0: i32) -> (i32, i32, i32) {
    %c0_i32 = arith.constant 0 : i32
    %c0_i32_0 = arith.constant 0 : i32
    %c0_i32_1 = arith.constant 0 : i32
    %c0_i32_2 = arith.constant 0 : i32
    return %c0_i32, %c0_i32_0, %c0_i32_1 : i32, i32, i32
  }
  func.func @transform_11(%arg0: i32) -> (i32, i32, i32) {
    %c0_i32 = arith.constant 0 : i32
    %c0_i32_0 = arith.constant 0 : i32
    %c0_i32_1 = arith.constant 0 : i32
    %c0_i32_2 = arith.constant 0 : i32
    return %c0_i32, %c0_i32_0, %c0_i32_1 : i32, i32, i32
  }
  func.func @transform_12(%arg0: i32) -> (i32, i32, i32) {
    %c0_i32 = arith.constant 0 : i32
    %c0_i32_0 = arith.constant 0 : i32
    %c0_i32_1 = arith.constant 0 : i32
    %c0_i32_2 = arith.constant 0 : i32
    return %c0_i32, %c0_i32_0, %c0_i32_1 : i32, i32, i32
  }
  func.func @transform_13(%arg0: i32) -> (i32, i32, i32) {
    %c0_i32 = arith.constant 0 : i32
    %c0_i32_0 = arith.constant 0 : i32
    %c0_i32_1 = arith.constant 0 : i32
    %c0_i32_2 = arith.constant 0 : i32
    return %c0_i32, %c0_i32_0, %c0_i32_1 : i32, i32, i32
  }
  func.func @transform_14(%arg0: i32) -> (i32, i32, i32) {
    %c0_i32 = arith.constant 0 : i32
    %c0_i32_0 = arith.constant 0 : i32
    %c0_i32_1 = arith.constant 0 : i32
    %c0_i32_2 = arith.constant 0 : i32
    return %c0_i32, %c0_i32_0, %c0_i32_1 : i32, i32, i32
  }
  func.func @transform_15(%arg0: i32) -> (i32, i32, i32) {
    %c0_i32 = arith.constant 0 : i32
    %c0_i32_0 = arith.constant 0 : i32
    %c0_i32_1 = arith.constant 0 : i32
    %c0_i32_2 = arith.constant 0 : i32
    return %c0_i32, %c0_i32_0, %c0_i32_1 : i32, i32, i32
  }
  func.func @transform_16(%arg0: i32) -> (i32, i32, i32) {
    %c0_i32 = arith.constant 0 : i32
    %c0_i32_0 = arith.constant 0 : i32
    %c0_i32_1 = arith.constant 0 : i32
    %c0_i32_2 = arith.constant 0 : i32
    return %c0_i32, %c0_i32_0, %c0_i32_1 : i32, i32, i32
  }
  func.func @transform_17(%arg0: i32) -> (i32, i32, i32) {
    %c0_i32 = arith.constant 0 : i32
    %c0_i32_0 = arith.constant 0 : i32
    %c0_i32_1 = arith.constant 0 : i32
    %c0_i32_2 = arith.constant 0 : i32
    return %c0_i32, %c0_i32_0, %c0_i32_1 : i32, i32, i32
  }
  func.func @transform_18(%arg0: i32) -> (i32, i32, i32) {
    %c0_i32 = arith.constant 0 : i32
    %c0_i32_0 = arith.constant 0 : i32
    %c0_i32_1 = arith.constant 0 : i32
    %c0_i32_2 = arith.constant 0 : i32
    return %c0_i32, %c0_i32_0, %c0_i32_1 : i32, i32, i32
  }
  func.func @transform_19(%arg0: i32) -> (i32, i32, i32) {
    %c0_i32 = arith.constant 0 : i32
    %c0_i32_0 = arith.constant 0 : i32
    %c0_i32_1 = arith.constant 0 : i32
    %c0_i32_2 = arith.constant 0 : i32
    return %c0_i32, %c0_i32_0, %c0_i32_1 : i32, i32, i32
  }
  func.func @transform_20(%arg0: i32) -> (i32, i32, i32) {
    %c0_i32 = arith.constant 0 : i32
    %c0_i32_0 = arith.constant 0 : i32
    %c0_i32_1 = arith.constant 0 : i32
    %c0_i32_2 = arith.constant 0 : i32
    return %c0_i32, %c0_i32_0, %c0_i32_1 : i32, i32, i32
  }
  func.func @transform_21(%arg0: i32) -> (i32, i32, i32) {
    %c0_i32 = arith.constant 0 : i32
    %c0_i32_0 = arith.constant 0 : i32
    %c0_i32_1 = arith.constant 0 : i32
    return %arg0, %c0_i32, %c0_i32_0 : i32, i32, i32
  }
}

</mosaic_0001>

<bundles_post_ra>
// kernel: forward.1
= control target key start
LH: loop header
LB: loop body
LE: loop exit
PB: predicated region body
PF: predicated region fallthrough
CT: control target
= control target key end

     0   :  { %s7602_s0 = inlined_call_operand.vmem [shape: f32[2,16,4], index: 0, kind: input, shape index: {}]   ;;  %s7603_s1 = inlined_call_operand.vmem [shape: f32[2,2,1,8], index: 1, kind: input, shape index: {}]   ;;  %s7604_s2 = inlined_call_operand.vmem [shape: f32[2,1,2], index: 2, kind: input, shape index: {}]   ;;  %s7605_s3 = inlined_call_operand.vmem [shape: f32[8,32], index: 3, kind: input, shape index: {}]   ;;  %s7606_s4 = inlined_call_operand.vmem [shape: bf16[4,32], index: 4, kind: input, shape index: {}]   ;;  %s7607_s5 = inlined_call_operand.vmem [shape: f32[1,32], index: 5, kind: input, shape index: {}]   ;;  %s7608_s6 = inlined_call_operand.vmem [shape: f32[8,1], index: 6, kind: input, shape index: {}]   ;;  %s7609_s7 = inlined_call_operand.<no memory space> [shape: f32[1,1], index: 7, kind: input, shape index: {}]   ;;  %s7610_s8 = inlined_call_operand.vmem [shape: bf16[32,5], index: 8, kind: input, shape index: {}]   ;;  %s7611_s9 = inlined_call_operand.vmem [shape: bf16[4,32,96], index: 9, kind: input, shape index: {}]   ;;  %s7612_s10 = inlined_call_operand.vmem [shape: f32[4,1,96], index: 10, kind: input, shape index: {}]   ;;  %s7613_s11 = inlined_call_operand.vmem [shape: bf16[4,32,32], index: 11, kind: input, shape index: {}]   ;;  %s7614_s12 = inlined_call_operand.vmem [shape: f32[4,1,32], index: 12, kind: input, shape index: {}]   ;;  %s7615_s13 = inlined_call_operand.vmem [shape: f32[4,1,32], index: 13, kind: input, shape index: {}]   ;;  %s7616_s14 = inlined_call_operand.vmem [shape: f32[4,1,32], index: 14, kind: input, shape index: {}]   ;;  %s7617_s15 = inlined_call_operand.vmem [shape: bf16[4,32,64], index: 15, kind: input, shape index: {}]   ;;  %s7618_s16 = inlined_call_operand.vmem [shape: f32[4,1,64], index: 16, kind: input, shape index: {}]   ;;  %s7619_s17 = inlined_call_operand.vmem [shape: bf16[4,64,32], index: 17, kind: input, shape index: {}]   ;;  %s7620_s18 = inlined_call_operand.vmem [shape: f32[4,1,32], index: 18, kind: input, shape index: {}]   ;;  %s7621_s19 = inlined_call_operand.vmem [shape: f32[4,1,32], index: 19, kind: input, shape index: {}]   ;;  %s7622_s20 = inlined_call_operand.vmem [shape: f32[4,1,32], index: 20, kind: input, shape index: {}]   ;;  %s7623_s21 = inlined_call_operand.hbm [shape: f32[2,1,5], index: 21, kind: output, shape index: {}]  }
   0x1   :  { %7667 = sst [smem:[#allocation15_spill]] %s7602_s0  ;;  %v26_v0 = vstv %s7609_s7 }
   0x2   :  { %7668 = sst [smem:[#allocation16_spill]] %s7603_s1  ;;  %27 = vst [vmem:[#allocation2] sm:$0x1] %v26_v0 }
   0x3   :  { %7669 = sst [smem:[#allocation17_spill]] %s7604_s2 }
   0x4   :  { %7670 = sst [smem:[#allocation18_spill]] %s7605_s3 }
   0x5   :  { %7671 = sst [smem:[#allocation19_spill]] %s7606_s4 }
   0x6   :  { %7672 = sst [smem:[#allocation20_spill]] %s7607_s5 }
   0x7   :  { %7673 = sst [smem:[#allocation21_spill]] %s7608_s6 }
   0x8   :  { %7674 = sst [smem:[#allocation22_spill]] %s7610_s8 }
   0x9   :  { %7675 = sst [smem:[#allocation23_spill]] %s7614_s12 }
   0xa   :  { %7676 = sst [smem:[#allocation24_spill]] %s7616_s14 }
   0xb   :  { %7677 = sst [smem:[#allocation25_spill]] %s7623_s21 }
   0xc   :  { %28 = vsyncpa [#allocation4], 0 }
   0xd   :  { %30 = vsyncpa [#allocation4 + $0x1], 0  ;;  %s6543_s26 = smov 0   ;;  %s6545_s27 = smov 0  }
   0xe   :  { %s6547_s3 = smov 0   ;;  %s6549_s28 = smov 0  }
   0xf LB: > { %7678 = sst [smem:[#allocation6_spill]] %s6398_s26  ;;  %s6564_s7 = sadd.s32 4294967295, %s6410_s28   ;;  %s6410_s28 = sphi %s6549_s28, %s7730_s28   ;;  %s6406_s3 = sphi %s6547_s3, %s7733_s3   ;;  %s6402_s27 = sphi %s6545_s27, %s7732_s27   ;;  %s6398_s26 = sphi %s6543_s26, %s7731_s26  }
  0x10   : > { %7679 = sst [smem:[#allocation7_spill]] %s6402_s27  ;;  %s5260_s29 = sadd.s32 4294967294, %s6410_s28  }
  0x11   : > { %7680 = sst [smem:[#allocation8_spill]] %s6406_s3  ;;  %s6568_s0 = sadd.s32 1, %s6410_s28  }
  0x12   : > { %7681 = sst [smem:[#allocation9_spill]] %s6410_s28  ;;  %s499_s4 = sadd.s32 1, %s6406_s3 }
  0x13   : > { %7682 = sst [smem:[#allocation10_spill]] %s6564_s7  ;;  %s496_s30 = ssub.s32 %s6410_s28, %s6568_s0 }
  0x14   : > { %7683 = sst [smem:[#allocation11_spill]] %s6568_s0  ;;  %p509_p0 = scmp.ne.s32.totalorder %s6406_s3, %s6402_s27 }
  0x15   : > { %p497_p1 = scmp.eq.s32.totalorder %s496_s30, 0  ;;  %p510_p2 = scmp.eq.s32.totalorder %s6564_s7, 1 }
  0x16   : > { %p515_p3 = scmp.ne.s32.totalorder %s6402_s27, %s6398_s26  ;;  %p516_p4 = scmp.eq.s32.totalorder %s5260_s29, 1 }
  0x17   : > { %s6579_s5 = scalar_select %p497_p1, %s6406_s3, %s499_s4  }
  0x18   : > { %p6581_p5 = por %p510_p2, %p509_p0  ;;  %p6585_p6 = por %p516_p4, %p515_p3 }
  0x19   : > { %7684 = sst [smem:[#allocation12_spill]] %s6579_s5  ;;  %p5263_p7 = scmp.ge.s32.totalorder %s6410_s28, 1 }
  0x1a   : > { %s7685_s22 = scalar_select %p6581_p5, 1, 0 }
  0x1b   : > { %s7687_s23 = scalar_select %p6585_p6, 1, 0 }
  0x1c   : > { %7686 = sst [smem:[#allocation13_spill]] %s7685_s22  ;;  %p609_p8 = scmp.lt.s32.totalorder %s6410_s28, 3 }
  0x1d   : > { %7688 = sst [smem:[#allocation14_spill]] %s7687_s23 }
  0x1e   : > { %p610_p9 = pnand %p5263_p7, %p609_p8 }
  0x1f   : > { %s7689_s2 = sld [smem:[#allocation19_spill]] (!%p610_p9)  ;;  %p675_p10 = scmp.lt.s32.totalorder (!%p610_p9), %s6564_s7, 1 }
  0x20   : > { %613 = sbr.rel (%p610_p9) target bundleno = 13179 (0x337b), region = 104  ;;  %s7690_s1 = sld [smem:[#allocation15_spill]] (!%p610_p9) }
  0x21   : > { %s7691_s30 = sld [smem:[#allocation20_spill]] (!%p610_p9)  ;;  %s7649_s3 = smov (!%p610_p9), 88  }
  0x22   : > { %s7647_s0 = smov (!%p610_p9), 120   ;;  %s7641_s4 = smov (!%p610_p9), 80  }
  0x23   : > { %s7698_s12 = sld [smem:[#allocation23_spill]] (!%p610_p9)  ;;  %s7709_s23 = smov (!%p610_p9), 8  }
  0x24   : > { %s7699_s14 = sld [smem:[#allocation24_spill]] (!%p610_p9)  ;;  %s7710_s26 = smov (!%p610_p9), 16  }
  0x25   : > { %v690_v1 = vld [vmem:[%s7689_s2] sm:$0x3]  ;;  %vm703_vm0 = vcmask 1041408   ;;  %v6412_v2 = vmov 0.0   ;;  %vm6413_vm1 = vmmov 0   ;;  %s6599_s25 = scalar_select %p675_p10, %s6564_s7, 1  ;;  %v929_v34 = vlaneseq }
  0x26   : > { %5654 = vmatprep.subr.bf16.mxu0 %v6412_v2  ;;  %v705_v3 = vsel %vm703_vm0, %v690_v1, 0  ;;  %5656 = vmatprep.mubr.msk.bf16.mxu0 %vm6413_vm1, %v6412_v2  ;;  %vm699_vm2 = vcmask 31744   ;;  %v6188_v7 = vld [vmem:[%s7611_s9 + $0x8] sm:$0xff]   ;;  %v6189_v8 = vld [vmem:[%s7611_s9] sm:$0xff]   ;;  %vm777_vm3 = vcmask 261120   ;;  %s7653_s2 = smov 96  }
  0x27   : > { %5655 = vmatpush3.bf16.msra.mxu0 %v705_v3  ;;  %5660 = vmatprep.subr.bf16.mxu1 %v6412_v2  ;;  %s5496_s29 = sshll.u32 %s6599_s25, 4  ;;  %v5267_v9 = vld [vmem:[%s7691_s30] ss:$0 sm:$0xff]  ;;  %vm827_vm4 = vcmask 64512   ;;  %v6415_v33 = vmov 0   ;;  %v930_v36 = vshrl.u32 %v929_v34, 7 }
  0x28   : > { %5664 = vmatprep.mubr.msk.bf16.mxu1 %vm6413_vm1, %v6412_v2  ;;  %5668 = vmatprep.subr.bf16.mxu0 %v6412_v2  ;;  %s679_s24 = scalar_lea.vmem %s7690_s1, %s5496_s29  ;;  %v5269_v20 = vld [vmem:[%s7612_s10] ss:$0 sm:$0xff]  ;;  %s5266_s29 = sshll.u32 %s6599_s25, 1  ;;  %vm970_vm9 = vcmask 1043456   ;;  %vm1760_vm10 = vcmask 130048   ;;  %vm1763_vm11 = vcmask 195584  }
  0x29   : > { %v688_v4 = vld [vmem:[%s679_s24] sm:$0xff]  ;;  %v689_v5 = vld [vmem:[%s679_s24 + $0x8] sm:$0xff]  ;;  %5661 = vmatpush3.bf16.msra.mxu1 %v6188_v7  ;;  %s7692_s24 = sld [smem:[#allocation18_spill]]  ;;  %6186 = vset.pattern.permute.xlu1 %v6415_v33  ;;  %v6663_v38 = vsub.s32 0, %v930_v36  ;;  %s7627_s30 = smov 112   ;;  %vm1991_vm12 = vcmask 523264  }
  0x2a   : > { %v691_v6 = vpack.c.bf16 %v689_v5, %v688_v4  ;;  %5662 = vmatprep.subr.bf16.mxu1 %v6412_v2  ;;  %6187 = vset.pattern.permute.xlu0 %v6415_v33  ;;  %s7693_s1 = sld [smem:[#allocation16_spill]]  ;;  %s7711_s27 = smov 24   ;;  %vm3456_vm13 = vcmask 1041409   ;;  %vm3573_vm0 = vcmask 9216  }
  0x2b   : > { %s7712_s6 = sld [smem:[#allocation21_spill]]  ;;  %s7713_s28 = smov 96  }
  0x2c   : > { %5657 = vmatmul.mubr.msk.bf16.vlgmr.msra.gmra.mxu0 %vm699_vm2, %v691_v6  ;;  %s7714_s22 = sld [smem:[#allocation17_spill]]  ;;  %vm3592_vm2 = vcmask 1040384  }
  0x2d   : > { %5670 = vmatprep.mubr.msk.bf16.mxu0 %vm6413_vm1, %v6412_v2  ;;  %5663 = vmatpush3.bf16.msra.mxu1 %v6189_v8 }
  0x2e   : > { %5674 = vmatprep.subr.bf16.mxu1 %v6412_v2 }
  0x2f   : > { %v748_v13 = vld [vmem:[%s7692_s24] sm:$0xff]  ;;  %s7651_s24 = smov 64  }
  0x30   : > { %s683_s5 = scalar_lea.vmem %s7693_s1, %s5266_s29  ;;  %s7643_s29 = smov 56  }
  0x31   : > { %v751_v35 = vld [vmem:[%s683_s5] sm:$0x1]  ;;  %v752_v37 = vld [vmem:[%s683_s5 + $0x1] sm:$0x1]  ;;  %s7633_s1 = smov 48   ;;  %s7631_s5 = smov 72  }
  0x32   : > { %vm925_vm5 = vcmp.gt.f32.partialorder %v751_v35, 0.0  ;;  %vm926_vm6 = vcmp.gt.f32.partialorder %v752_v37, 0.0  ;;  %s686_s8 = scalar_lea.vmem %s7714_s22, %s6599_s25  ;;  %s7717_s25 = smov 64  }
  0x33   : > { %v927_v39 = vsel %vm925_vm5, 1, %v6415_v33  ;;  %v928_v41 = vsel %vm926_vm6, 1, %v6415_v33  ;;  %vm3588_vm5 = vcmask 15360   ;;  %vm4065_vm6 = vcmask 254976   ;;  %s7719_s22 = sld [smem:[#allocation24_spill]] }
  0x34   : > { %v932_v40 = vrot.slane %v927_v39, %v6663_v38  ;;  %v936_v44 = vrot.slane %v928_v41, %v6663_v38 }
  0x36   : > { %vm6668_vm7 = vcmp.eq.s32.totalorder %v932_v40, 1  ;;  %vm6676_vm8 = vcmp.eq.s32.totalorder %v936_v44, 1 }
  0xec   : > { %v741_v10 = vpop.f32.mrf.mxu0 }
  0xed   : > { %v742_v12 = vadd.f32 %v5267_v9, %v741_v10 }
  0xee   : > { %v5658_v11 = vpop.f32.mrf.mxu0 }
  0xef   : > { %v6625_v17 = vadd.f32 %v748_v13, %v742_v12 }
  0xf0   : > { %v744_v14 = vpop.f32.mrf.mxu0 }
  0xf1   : > { %v745_v15 = vadd.f32 %v5267_v9, %v744_v14 }
  0xf2   : > { %v5659_v16 = vpop.f32.mrf.mxu0 }
  0xf3   : > { %v6627_v18 = vadd.f32 %v748_v13, %v745_v15 }
  0xf5   : > { %v757_v19 = vpack.c.bf16 %v6627_v18, %v6625_v17 }
  0xf7   : > { %5665 = vmatmul.mubr.msk.bf16.vlgmr.msra.gmra.mxu1 %vm777_vm3, %v757_v19 }
  0xf8   : > { %5676 = vmatprep.mubr.msk.bf16.mxu1 %vm6413_vm1, %v6412_v2 }
 0x1b7   : > { %v815_v21 = vpop.f32.mrf.mxu1 }
 0x1b8   : > { %v816_v22 = vadd.f32 %v5269_v20, %v815_v21 }
 0x1b9   : > { %v5666_v23 = vpop.f32.mrf.mxu1 }
 0x1ba   : > { %v6637_v24 = vpack.c.bf16 %v816_v22, %v816_v22 }
 0x1bb   : > { %v818_v25 = vpop.f32.mrf.mxu1 }
 0x1bc   : > { %v819_v26 = vadd.f32 %v5269_v20, %v818_v25  ;;  %825 = vrot.lane.b32.xlu0 %v6637_v24, %s7653_s2 }
 0x1bd   : > { %v5667_v27 = vpop.f32.mrf.mxu1 }
 0x1be   : > { %v6641_v28 = vpack.c.bf16 %v819_v26, %v819_v26 }
 0x1c0   : > { %875 = vrot.lane.b32.xlu0 %v6641_v28, %s7653_s2 }
 0x22e   : > { %v826_v29 = vpop.permute.xlu0 %825 }
 0x22f   : > { %v832_v30 = vsel %vm827_vm4, %v826_v29, 0 }
 0x230   : > { %5669 = vmatpush3.bf16.xpose.msra.mxu0 %v832_v30 }
 0x231   : > { %5680 = vmatprep.subr.bf16.mxu0 %v6412_v2 }
 0x232   : > { %v876_v31 = vpop.permute.xlu0 %875 }
 0x233   : > { %v881_v32 = vsel %vm827_vm4, %v876_v31, 0 }
 0x234   : > { %5675 = vmatpush3.bf16.xpose.msra.mxu1 %v881_v32 }
 0x235   : > { %5686 = vmatprep.subr.bf16.mxu1 %v6412_v2 }
 0x237   : > { %5671 = vmatmul.mubr.msk.bf16.vlgmr.msra.gmra.mxu0 %vm827_vm4, %v6637_v24 }
 0x238   : > { %5682 = vmatprep.mubr.msk.bf16.mxu0 %vm6413_vm1, %v6412_v2 }
 0x23b   : > { %5677 = vmatmul.mubr.msk.bf16.vlgmr.msra.gmra.mxu1 %vm827_vm4, %v6641_v28 }
 0x23c   : > { %5688 = vmatprep.mubr.msk.bf16.mxu1 %vm6413_vm1, %v6412_v2 }
 0x2f7   : > { %v868_v42 = vpop.f32.mrf.mxu0 }
 0x2f8   : > { %v923_v45 = vmul.f32 0.35355338, %v868_v42 }
 0x2f9   : > { %v5672_v46 = vpop.f32.mrf.mxu0 }
 0x2fa   : > { %v939_v47 = vsel %vm6668_vm7, %v923_v45, -1e+09 }
 0x2fb   : > { %v871_v48 = vpop.f32.mrf.mxu0  ;;  %v917_v49 = vpop.f32.mrf.mxu1  ;;  %v941_v50 = vsel %vm827_vm4, %v939_v47, -inf }
 0x2fc   : > { %v924_v52 = vmul.f32 0.35355338, %v917_v49  ;;  %942 = vmax.xlane.f32.xlu1 %v941_v50 }
 0x2fd   : > { %v5673_v53 = vpop.f32.mrf.mxu0  ;;  %v5678_v54 = vpop.f32.mrf.mxu1 }
 0x2fe   : > { %v940_v55 = vsel %vm6676_vm8, %v924_v52, -1e+09 }
 0x2ff   : > { %v920_v56 = vpop.f32.mrf.mxu1  ;;  %v944_v57 = vsel %vm827_vm4, %v940_v55, -inf }
 0x300   : > { %945 = vmax.xlane.f32.xlu1 %v944_v57 }
 0x301   : > { %v5679_v58 = vpop.f32.mrf.mxu1 }
 0x311   : > { %965 = vrot.lane.b32.xlu1 %v6637_v24, %s7651_s24 }
 0x315   : > { %1014 = vrot.lane.b32.xlu1 %v6641_v28, %s7651_s24 }
 0x319   : > { %1064 = vrot.lane.b32.xlu1 %v6637_v24, %s7649_s3 }
 0x385   : > { %v943_v59 = vpop.xlane.xlu1 %942 }
 0x386   : > { %v947_v60 = vsub.f32 %v939_v47, %v943_v59 }
 0x388   : > { %v949_v61 = vmul.f32 1.442695, %v947_v60 }
 0x389   : > { %v946_v62 = vpop.xlane.xlu1 %945 }
 0x38a   : > { %6230 = vpow2.f32 %v949_v61  ;;  %v948_v63 = vsub.f32 %v940_v55, %v946_v62 }
 0x38c   : > { %v951_v0 = vmul.f32 1.442695, %v948_v63 }
 0x38d   : > { %v966_v1 = vpop.permute.xlu1 %965 }
 0x38e   : > { %6232 = vpow2.f32 %v951_v0  ;;  %v972_v3 = vsel %vm970_vm9, %v966_v1, 0 }
 0x38f   : > { %5681 = vmatpush3.bf16.msra.mxu0 %v972_v3 }
 0x390   : > { %5692 = vmatprep.subr.bf16.mxu0 %v6412_v2 }
 0x391   : > { %v1015_v4 = vpop.permute.xlu1 %1014 }
 0x392   : > { %v1020_v5 = vsel %vm970_vm9, %v1015_v4, 0 }
 0x393   : > { %5687 = vmatpush3.bf16.msra.mxu1 %v1020_v5 }
 0x394   : > { %5698 = vmatprep.subr.bf16.mxu1 %v6412_v2 }
 0x395   : > { %v1065_v10 = vpop.permute.xlu1 %1064 }
 0x396   : > { %v1070_v19 = vsel %vm827_vm4, %v1065_v10, 0 }
 0x397   : > { %v6231_v6 = vpop.eup %6230 }
 0x398   : > { %v953_v7 = vsel %vm827_vm4, %v6231_v6, 0.0 }
 0x399   : > { %954 = vadd.xlane.f32.xlu0 %v953_v7 }
 0x39b   : > { %v6233_v8 = vpop.eup %6232 }
 0x39c   : > { %v956_v9 = vsel %vm827_vm4, %v6233_v8, 0.0 }
 0x39d   : > { %957 = vadd.xlane.f32.xlu1 %v956_v9 }
 0x3ae   : > { %1114 = vrot.lane.b32.xlu1 %v6641_v28, %s7649_s3  ;;  %s7704_s3 = smov 112  }
 0x3af   : > { %1062 = vrot.lane.b32.xlu0 %v6637_v24, %s7647_s0 }
 0x3b2   : > { %1112 = vrot.lane.b32.xlu1 %v6641_v28, %s7647_s0  ;;  %s7706_s0 = smov 72  }
 0x422   : > { %v955_v11 = vpop.xlane.xlu0 %954 }
 0x423   : > { %6234 = vrcp.f32 %v955_v11 }
 0x426   : > { %v958_v12 = vpop.xlane.xlu1 %957  ;;  %v1063_v25 = vpop.permute.xlu0 %1062 }
 0x427   : > { %6236 = vrcp.f32 %v958_v12 }
 0x42a   : > { %v1115_v21 = vpop.permute.xlu1 %1114 }
 0x42b   : > { %v1120_v23 = vsel %vm827_vm4, %v1115_v21, 0 }
 0x42e   : > { %v1113_v26 = vpop.permute.xlu1 %1112 }
 0x430   : > { %v6235_v13 = vpop.eup %6234 }
 0x431   : > { %v961_v14 = vmul.f32 %v6235_v13, %v6231_v6 }
 0x433   : > { %v963_v15 = vpack.c.bf16 %v961_v14, %v961_v14 }
 0x434   : > { %v6237_v16 = vpop.eup %6236 }
 0x435   : > { %5683 = vmatmul.mubr.msk.bf16.vlgmr.msra.gmra.mxu0 %vm827_vm4, %v963_v15  ;;  %v962_v20 = vmul.f32 %v6237_v16, %v6233_v8 }
 0x436   : > { %5693 = vmatpush3.bf16.xpose.msra.mxu0 %v1070_v19  ;;  %5694 = vmatprep.mubr.msk.bf16.mxu0 %vm6413_vm1, %v6412_v2 }
 0x437   : > { %v964_v22 = vpack.c.bf16 %v962_v20, %v962_v20  ;;  %5704 = vmatprep.subr.bf16.mxu0 %v6412_v2 }
 0x439   : > { %5689 = vmatmul.mubr.msk.bf16.vlgmr.msra.gmra.mxu1 %vm827_vm4, %v964_v22 }
 0x43a   : > { %5699 = vmatpush3.bf16.xpose.msra.mxu1 %v1120_v23  ;;  %5700 = vmatprep.mubr.msk.bf16.mxu1 %vm6413_vm1, %v6412_v2 }
 0x43b   : > { %5710 = vmatprep.subr.bf16.mxu1 %v6412_v2 }
 0x43d   : > { %5695 = vmatmul.mubr.msk.bf16.vlgmr.msra.gmra.mxu0 %vm827_vm4, %v1063_v25 }
 0x43e   : > { %5706 = vmatprep.mubr.msk.bf16.mxu0 %vm6413_vm1, %v6412_v2 }
 0x441   : > { %5701 = vmatmul.mubr.msk.bf16.vlgmr.msra.gmra.mxu1 %vm827_vm4, %v1113_v26 }
 0x442   : > { %5712 = vmatprep.mubr.msk.bf16.mxu1 %vm6413_vm1, %v6412_v2 }
 0x4f5   : > { %v6717_v27 = vpop.f32.mrf.mxu0 }
 0x4f7   : > { %v5684_v29 = vpop.f32.mrf.mxu0 }
 0x4f9   : > { %v1011_v30 = vpop.f32.mrf.mxu0  ;;  %v6719_v31 = vpop.f32.mrf.mxu1 }
 0x4fb   : > { %v5685_v32 = vpop.f32.mrf.mxu0  ;;  %v5690_v34 = vpop.f32.mrf.mxu1 }
 0x4fd   : > { %v1059_v35 = vpop.f32.mrf.mxu1  ;;  %v1106_v36 = vpop.f32.mrf.mxu0 }
 0x4fe   : > { %v1162_v37 = vmul.f32 0.35355338, %v1106_v36 }
 0x4ff   : > { %v5691_v39 = vpop.f32.mrf.mxu1  ;;  %v5696_v40 = vpop.f32.mrf.mxu0 }
 0x500   : > { %v1164_v41 = vsel %vm6668_vm7, %v1162_v37, -1e+09 }
 0x501   : > { %v1109_v42 = vpop.f32.mrf.mxu0  ;;  %v1156_v44 = vpop.f32.mrf.mxu1  ;;  %v1166_v45 = vsel %vm827_vm4, %v1164_v41, -inf }
 0x502   : > { %v1163_v46 = vmul.f32 0.35355338, %v1156_v44  ;;  %1167 = vmax.xlane.f32.xlu1 %v1166_v45 }
 0x503   : > { %v5697_v47 = vpop.f32.mrf.mxu0  ;;  %v5702_v48 = vpop.f32.mrf.mxu1 }
 0x504   : > { %v1165_v49 = vsel %vm6676_vm8, %v1163_v46, -1e+09 }
 0x505   : > { %v1159_v50 = vpop.f32.mrf.mxu1  ;;  %v1169_v52 = vsel %vm827_vm4, %v1165_v49, -inf }
 0x506   : > { %1170 = vmax.xlane.f32.xlu0 %v1169_v52 }
 0x507   : > { %v5703_v53 = vpop.f32.mrf.mxu1 }
 0x513   : > { %1190 = vrot.lane.b32.xlu1 %v6637_v24, %s7643_s29 }
 0x517   : > { %1288 = vrot.lane.b32.xlu1 %v6637_v24, %s7641_s4 }
 0x51c   : > { %1238 = vrot.lane.b32.xlu0 %v6641_v28, %s7643_s29  ;;  %s7645_s29 = smov 24  }
 0x520   : > { %1286 = vrot.lane.b32.xlu0 %v6637_v24, %s7627_s30 }
 0x58b   : > { %v1168_v54 = vpop.xlane.xlu1 %1167 }
 0x58c   : > { %v1172_v55 = vsub.f32 %v1164_v41, %v1168_v54 }
 0x58e   : > { %v1174_v56 = vmul.f32 1.442695, %v1172_v55 }
 0x58f   : > { %v1171_v57 = vpop.xlane.xlu0 %1170  ;;  %v1191_v58 = vpop.permute.xlu1 %1190 }
 0x590   : > { %6238 = vpow2.f32 %v1174_v56  ;;  %v1173_v59 = vsub.f32 %v1165_v49, %v1171_v57  ;;  %v1196_v60 = vsel %vm970_vm9, %v1191_v58, 0 }
 0x591   : > { %5705 = vmatpush3.bf16.msra.mxu0 %v1196_v60 }
 0x592   : > { %v1176_v61 = vmul.f32 1.442695, %v1173_v59  ;;  %5716 = vmatprep.subr.bf16.mxu0 %v6412_v2 }
 0x593   : > { %v1239_v62 = vpop.permute.xlu0 %1238  ;;  %v1289_v5 = vpop.permute.xlu1 %1288 }
 0x594   : > { %6240 = vpow2.f32 %v1176_v61  ;;  %v1244_v63 = vsel %vm970_vm9, %v1239_v62, 0  ;;  %v1294_v12 = vsel %vm827_vm4, %v1289_v5, 0 }
 0x595   : > { %5711 = vmatpush3.bf16.msra.mxu1 %v1244_v63 }
 0x596   : > { %5722 = vmatprep.subr.bf16.mxu1 %v6412_v2 }
 0x597   : > { %v1287_v19 = vpop.permute.xlu0 %1286 }
 0x59d   : > { %v6239_v0 = vpop.eup %6238 }
 0x59e   : > { %v1178_v1 = vsel %vm827_vm4, %v6239_v0, 0.0 }
 0x59f   : > { %1179 = vadd.xlane.f32.xlu1 %v1178_v1 }
 0x5a1   : > { %v6241_v3 = vpop.eup %6240 }
 0x5a2   : > { %v1181_v4 = vsel %vm827_vm4, %v6241_v3, 0.0 }
 0x5a3   : > { %1182 = vadd.xlane.f32.xlu1 %v1181_v4 }
 0x5b4   : > { %1338 = vrot.lane.b32.xlu1 %v6641_v28, %s7641_s4  ;;  %s7701_s4 = smov 120  }
 0x5b8   : > { %1336 = vrot.lane.b32.xlu1 %v6641_v28, %s7627_s30  ;;  %s7629_s30 = smov 104  }
 0x628   : > { %v1180_v6 = vpop.xlane.xlu1 %1179 }
 0x629   : > { %6242 = vrcp.f32 %v1180_v6 }
 0x62c   : > { %v1183_v7 = vpop.xlane.xlu1 %1182 }
 0x62d   : > { %6244 = vrcp.f32 %v1183_v7 }
 0x630   : > { %v1339_v14 = vpop.permute.xlu1 %1338 }
 0x631   : > { %v1344_v16 = vsel %vm827_vm4, %v1339_v14, 0 }
 0x634   : > { %v1337_v20 = vpop.permute.xlu1 %1336 }
 0x636   : > { %v6243_v8 = vpop.eup %6242 }
 0x637   : > { %v1186_v9 = vmul.f32 %v6243_v8, %v6239_v0 }
 0x639   : > { %v1188_v10 = vpack.c.bf16 %v1186_v9, %v1186_v9 }
 0x63a   : > { %v6245_v11 = vpop.eup %6244 }
 0x63b   : > { %5707 = vmatmul.mubr.msk.bf16.vlgmr.msra.gmra.mxu0 %vm827_vm4, %v1188_v10  ;;  %v1187_v13 = vmul.f32 %v6245_v11, %v6241_v3 }
 0x63c   : > { %5717 = vmatpush3.bf16.xpose.msra.mxu0 %v1294_v12  ;;  %5718 = vmatprep.mubr.msk.bf16.mxu0 %vm6413_vm1, %v6412_v2 }
 0x63d   : > { %v1189_v15 = vpack.c.bf16 %v1187_v13, %v1187_v13  ;;  %5728 = vmatprep.subr.bf16.mxu0 %v6412_v2 }
 0x63f   : > { %5713 = vmatmul.mubr.msk.bf16.vlgmr.msra.gmra.mxu1 %vm827_vm4, %v1189_v15 }
 0x640   : > { %5723 = vmatpush3.bf16.xpose.msra.mxu1 %v1344_v16  ;;  %5724 = vmatprep.mubr.msk.bf16.mxu1 %vm6413_vm1, %v6412_v2 }
 0x641   : > { %5734 = vmatprep.subr.bf16.mxu1 %v6412_v2 }
 0x643   : > { %5719 = vmatmul.mubr.msk.bf16.vlgmr.msra.gmra.mxu0 %vm827_vm4, %v1287_v19 }
 0x644   : > { %5730 = vmatprep.mubr.msk.bf16.mxu0 %vm6413_vm1, %v6412_v2 }
 0x647   : > { %5725 = vmatmul.mubr.msk.bf16.vlgmr.msra.gmra.mxu1 %vm827_vm4, %v1337_v20 }
 0x648   : > { %5736 = vmatprep.mubr.msk.bf16.mxu1 %vm6413_vm1, %v6412_v2 }
 0x6fb   : > { %v6761_v21 = vpop.f32.mrf.mxu0 }
 0x6fd   : > { %v5708_v22 = vpop.f32.mrf.mxu0 }
 0x6ff   : > { %v1235_v23 = vpop.f32.mrf.mxu0  ;;  %v6763_v25 = vpop.f32.mrf.mxu1 }
 0x700   : > { %v6156_v26 = vpack.i.bf16 %v6763_v25, %v6761_v21 }
 0x701   : > { %v5709_v29 = vpop.f32.mrf.mxu0  ;;  %v5714_v30 = vpop.f32.mrf.mxu1 }
 0x703   : > { %v1283_v32 = vpop.f32.mrf.mxu1  ;;  %v1330_v34 = vpop.f32.mrf.mxu0 }
 0x704   : > { %v1386_v35 = vmul.f32 0.35355338, %v1330_v34 }
 0x705   : > { %v5715_v36 = vpop.f32.mrf.mxu1  ;;  %v5720_v37 = vpop.f32.mrf.mxu0 }
 0x706   : > { %v1388_v39 = vsel %vm6668_vm7, %v1386_v35, -1e+09 }
 0x707   : > { %v1333_v40 = vpop.f32.mrf.mxu0  ;;  %v1380_v41 = vpop.f32.mrf.mxu1  ;;  %v1390_v42 = vsel %vm827_vm4, %v1388_v39, -inf }
 0x708   : > { %v1387_v44 = vmul.f32 0.35355338, %v1380_v41  ;;  %1391 = vmax.xlane.f32.xlu0 %v1390_v42 }
 0x709   : > { %v5721_v45 = vpop.f32.mrf.mxu0  ;;  %v5726_v46 = vpop.f32.mrf.mxu1 }
 0x70a   : > { %v1389_v47 = vsel %vm6676_vm8, %v1387_v44, -1e+09 }
 0x70b   : > { %v1383_v48 = vpop.f32.mrf.mxu1  ;;  %v1393_v49 = vsel %vm827_vm4, %v1389_v47, -inf }
 0x70c   : > { %1394 = vmax.xlane.f32.xlu1 %v1393_v49 }
 0x70d   : > { %v5727_v50 = vpop.f32.mrf.mxu1 }
 0x71d   : > { %1414 = vrot.lane.b32.xlu1 %v6637_v24, %s7633_s1 }
 0x721   : > { %1512 = vrot.lane.b32.xlu1 %v6637_v24, %s7631_s5 }
 0x725   : > { %1562 = vrot.lane.b32.xlu1 %v6641_v28, %s7631_s5  ;;  %s7637_s5 = smov 8  }
 0x729   : > { %1560 = vrot.lane.b32.xlu1 %v6641_v28, %s7629_s30 }
 0x791   : > { %v1392_v52 = vpop.xlane.xlu0 %1391 }
 0x792   : > { %v1396_v53 = vsub.f32 %v1388_v39, %v1392_v52 }
 0x794   : > { %v1398_v54 = vmul.f32 1.442695, %v1396_v53 }
 0x795   : > { %v1395_v55 = vpop.xlane.xlu1 %1394 }
 0x796   : > { %6246 = vpow2.f32 %v1398_v54  ;;  %v1397_v56 = vsub.f32 %v1389_v47, %v1395_v55 }
 0x798   : > { %v1400_v57 = vmul.f32 1.442695, %v1397_v56 }
 0x799   : > { %v1415_v58 = vpop.permute.xlu1 %1414 }
 0x79a   : > { %6248 = vpow2.f32 %v1400_v57  ;;  %v1420_v59 = vsel %vm970_vm9, %v1415_v58, 0 }
 0x79b   : > { %5729 = vmatpush3.bf16.msra.mxu0 %v1420_v59 }
 0x79c   : > { %5740 = vmatprep.subr.bf16.mxu0 %v6412_v2 }
 0x79d   : > { %v1513_v6 = vpop.permute.xlu1 %1512 }
 0x79e   : > { %v1518_v10 = vsel %vm827_vm4, %v1513_v6, 0 }
 0x7a1   : > { %v1563_v12 = vpop.permute.xlu1 %1562 }
 0x7a2   : > { %v1568_v14 = vsel %vm827_vm4, %v1563_v12, 0 }
 0x7a3   : > { %v6247_v60 = vpop.eup %6246 }
 0x7a4   : > { %v1402_v61 = vsel %vm827_vm4, %v6247_v60, 0.0 }
 0x7a5   : > { %1403 = vadd.xlane.f32.xlu0 %v1402_v61  ;;  %v1561_v16 = vpop.permute.xlu1 %1560 }
 0x7a7   : > { %v6249_v62 = vpop.eup %6248 }
 0x7a8   : > { %v1405_v63 = vsel %vm827_vm4, %v6249_v62, 0.0 }
 0x7a9   : > { %1406 = vadd.xlane.f32.xlu0 %v1405_v63 }
 0x7bf   : > { %1462 = vrot.lane.b32.xlu0 %v6641_v28, %s7633_s1  ;;  %s7635_s1 = smov 16  }
 0x7c3   : > { %1510 = vrot.lane.b32.xlu0 %v6637_v24, %s7629_s30  ;;  %s7639_s30 = smov 40  }
 0x82e   : > { %v1404_v0 = vpop.xlane.xlu0 %1403 }
 0x82f   : > { %6250 = vrcp.f32 %v1404_v0 }
 0x832   : > { %v1407_v1 = vpop.xlane.xlu0 %1406 }
 0x833   : > { %6252 = vrcp.f32 %v1407_v1 }
 0x836   : > { %v1463_v3 = vpop.permute.xlu0 %1462 }
 0x837   : > { %v1468_v4 = vsel %vm970_vm9, %v1463_v3, 0 }
 0x838   : > { %5735 = vmatpush3.bf16.msra.mxu1 %v1468_v4 }
 0x839   : > { %5746 = vmatprep.subr.bf16.mxu1 %v6412_v2 }
 0x83a   : > { %v1511_v15 = vpop.permute.xlu0 %1510 }
 0x83c   : > { %v6251_v5 = vpop.eup %6250 }
 0x83d   : > { %v1410_v7 = vmul.f32 %v6251_v5, %v6247_v60 }
 0x83f   : > { %v1412_v8 = vpack.c.bf16 %v1410_v7, %v1410_v7  ;;  %v6190_v7 = vld [vmem:[%s7613_s11 + $0x8] sm:$0xff]  }
 0x840   : > { %v6253_v9 = vpop.eup %6252 }
 0x841   : > { %5731 = vmatmul.mubr.msk.bf16.vlgmr.msra.gmra.mxu0 %vm827_vm4, %v1412_v8  ;;  %v1411_v11 = vmul.f32 %v6253_v9, %v6249_v62  ;;  %v6191_v8 = vld [vmem:[%s7613_s11] sm:$0xff]  }
 0x842   : > { %5741 = vmatpush3.bf16.xpose.msra.mxu0 %v1518_v10  ;;  %5742 = vmatprep.mubr.msk.bf16.mxu0 %vm6413_vm1, %v6412_v2 }
 0x843   : > { %v1413_v13 = vpack.c.bf16 %v1411_v11, %v1411_v11  ;;  %5752 = vmatprep.subr.bf16.mxu0 %v6412_v2 }
 0x845   : > { %5737 = vmatmul.mubr.msk.bf16.vlgmr.msra.gmra.mxu1 %vm827_vm4, %v1413_v13 }
 0x846   : > { %5747 = vmatpush3.bf16.xpose.msra.mxu1 %v1568_v14  ;;  %5748 = vmatprep.mubr.msk.bf16.mxu1 %vm6413_vm1, %v6412_v2 }
 0x847   : > { %5758 = vmatprep.subr.bf16.mxu1 %v6412_v2 }
 0x849   : > { %5743 = vmatmul.mubr.msk.bf16.vlgmr.msra.gmra.mxu0 %vm827_vm4, %v1511_v15 }
 0x84a   : > { %5754 = vmatprep.mubr.msk.bf16.mxu0 %vm6413_vm1, %v6412_v2 }
 0x84d   : > { %5749 = vmatmul.mubr.msk.bf16.vlgmr.msra.gmra.mxu1 %vm827_vm4, %v1561_v16 }
 0x84e   : > { %5760 = vmatprep.mubr.msk.bf16.mxu1 %vm6413_vm1, %v6412_v2 }
 0x901   : > { %v1456_v19 = vpop.f32.mrf.mxu0 }
 0x903   : > { %v5732_v20 = vpop.f32.mrf.mxu0 }
 0x905   : > { %v1459_v22 = vpop.f32.mrf.mxu0  ;;  %v1504_v23 = vpop.f32.mrf.mxu1 }
 0x906   : > { %v6161_v52 = vpack.i.bf16 %v1504_v23, %v1456_v19 }
 0x907   : > { %v5733_v29 = vpop.f32.mrf.mxu0  ;;  %v5738_v30 = vpop.f32.mrf.mxu1 }
 0x909   : > { %v1507_v32 = vpop.f32.mrf.mxu1  ;;  %v1554_v34 = vpop.f32.mrf.mxu0 }
 0x90a   : > { %v1610_v35 = vmul.f32 0.35355338, %v1554_v34 }
 0x90b   : > { %v5739_v36 = vpop.f32.mrf.mxu1  ;;  %v5744_v37 = vpop.f32.mrf.mxu0 }
 0x90c   : > { %v1612_v39 = vsel %vm6668_vm7, %v1610_v35, -1e+09 }
 0x90d   : > { %v1557_v40 = vpop.f32.mrf.mxu0  ;;  %v1604_v41 = vpop.f32.mrf.mxu1  ;;  %v1614_v42 = vsel %vm827_vm4, %v1612_v39, -inf }
 0x90e   : > { %v1611_v44 = vmul.f32 0.35355338, %v1604_v41  ;;  %1615 = vmax.xlane.f32.xlu0 %v1614_v42 }
 0x90f   : > { %v5745_v45 = vpop.f32.mrf.mxu0  ;;  %v5750_v46 = vpop.f32.mrf.mxu1 }
 0x910   : > { %v1613_v47 = vsel %vm6676_vm8, %v1611_v44, -1e+09 }
 0x911   : > { %v1607_v48 = vpop.f32.mrf.mxu1  ;;  %v1617_v49 = vsel %vm827_vm4, %v1613_v47, -inf }
 0x912   : > { %1618 = vmax.xlane.f32.xlu1 %v1617_v49 }
 0x913   : > { %v5751_v50 = vpop.f32.mrf.mxu1 }
 0x923   : > { %1638 = vrot.lane.b32.xlu1 %v6637_v24, %s7639_s30 }
 0x927   : > { %6157 = vrot.lane.b32.xlu1 %v6156_v26, %s7637_s5  ;;  %s7705_s5 = smov 48  }
 0x92b   : > { %6162 = vrot.lane.b32.xlu1 %v6161_v52, %s7635_s1  ;;  %s7703_s1 = smov 80  }
 0x997   : > { %v1616_v53 = vpop.xlane.xlu0 %1615 }
 0x998   : > { %v1620_v54 = vsub.f32 %v1612_v39, %v1616_v53 }
 0x99a   : > { %v1622_v55 = vmul.f32 1.442695, %v1620_v54 }
 0x99b   : > { %v1619_v56 = vpop.xlane.xlu1 %1618 }
 0x99c   : > { %6254 = vpow2.f32 %v1622_v55  ;;  %v1621_v57 = vsub.f32 %v1613_v47, %v1619_v56 }
 0x99e   : > { %v1624_v58 = vmul.f32 1.442695, %v1621_v57 }
 0x99f   : > { %v1639_v59 = vpop.permute.xlu1 %1638 }
 0x9a0   : > { %6256 = vpow2.f32 %v1624_v58  ;;  %v1644_v24 = vsel %vm970_vm9, %v1639_v59, 0 }
 0x9a1   : > { %5753 = vmatpush3.bf16.msra.mxu0 %v1644_v24 }
 0x9a2   : > { %5764 = vmatprep.subr.bf16.mxu0 %v6412_v2 }
 0x9a3   : > { %v6158_v20 = vpop.permute.xlu1 %6157 }
 0x9a4   : > { %v6160_v23 = vunpack.i.h.bf16 %v6158_v20  ;;  %v6159_v29 = vunpack.i.l.bf16 %v6158_v20  ;;  %v6197_v20 = vld [vmem:[%s7619_s17] sm:$0xff]  }
 0x9a6   : > { %v1759_v35 = vsel %vm827_vm4, %v6719_v31, %v6160_v23  ;;  %v1758_v36 = vsel %vm827_vm4, %v6717_v27, %v6159_v29  ;;  %v5289_v27 = vld [vmem:[%s7698_s12] ss:$0 sm:$0xff] }
 0x9a7   : > { %v6163_v22 = vpop.permute.xlu1 %6162 }
 0x9a8   : > { %v6165_v30 = vunpack.i.h.bf16 %v6163_v22  ;;  %v6164_v32 = vunpack.i.l.bf16 %v6163_v22  ;;  %v5295_v22 = vld [vmem:[%s7618_s16] ss:$0 sm:$0xff] }
 0x9a9   : > { %v6255_v21 = vpop.eup %6254 }
 0x9aa   : > { %v1626_v25 = vsel %vm827_vm4, %v6255_v21, 0.0  ;;  %v1762_v40 = vsel %vm1760_vm10, %v1759_v35, %v6165_v30  ;;  %v1761_v41 = vsel %vm1760_vm10, %v1758_v36, %v6164_v32 }
 0x9ab   : > { %1627 = vadd.xlane.f32.xlu0 %v1626_v25 }
 0x9ad   : > { %v6257_v26 = vpop.eup %6256 }
 0x9ae   : > { %v1629_v60 = vsel %vm827_vm4, %v6257_v26, 0.0 }
 0x9af   : > { %1630 = vadd.xlane.f32.xlu0 %v1629_v60 }
 0x9c5   : > { %1686 = vrot.lane.b32.xlu0 %v6641_v28, %s7639_s30  ;;  %s7702_s30 = smov 56  }
 0xa34   : > { %v1628_v61 = vpop.xlane.xlu0 %1627 }
 0xa35   : > { %6258 = vrcp.f32 %v1628_v61  ;;  %v6193_v61 = vld [vmem:[%s7617_s15] sm:$0xff]  }
 0xa38   : > { %v1631_v62 = vpop.xlane.xlu0 %1630 }
 0xa39   : > { %6260 = vrcp.f32 %v1631_v62  ;;  %v6194_v62 = vld [vmem:[%s7619_s17 + $0x18] sm:$0xff]  }
 0xa3c   : > { %v1687_v63 = vpop.permute.xlu0 %1686 }
 0xa3d   : > { %v1692_v0 = vsel %vm970_vm9, %v1687_v63, 0 }
 0xa3e   : > { %5759 = vmatpush3.bf16.msra.mxu1 %v1692_v0 }
 0xa3f   : > { %5772 = vmatprep.subr.bf16.mxu1 %v6412_v2 }
 0xa42   : > { %v6259_v1 = vpop.eup %6258 }
 0xa43   : > { %v1634_v3 = vmul.f32 %v6259_v1, %v6255_v21 }
 0xa45   : > { %v1636_v4 = vpack.c.bf16 %v1634_v3, %v1634_v3 }
 0xa46   : > { %v6261_v5 = vpop.eup %6260 }
 0xa47   : > { %5755 = vmatmul.mubr.msk.bf16.vlgmr.msra.gmra.mxu0 %vm827_vm4, %v1636_v4  ;;  %v1635_v6 = vmul.f32 %v6261_v5, %v6257_v26 }
 0xa48   : > { %5768 = vmatprep.mubr.msk.bf16.mxu0 %vm6413_vm1, %v6412_v2  ;;  %5765 = vmatpush3.bf16.msra.mxu0 %v6190_v7  ;;  %v5293_v7 = vld [vmem:[%s7615_s13] ss:$0 sm:$0xff] }
 0xa49   : > { %v1637_v28 = vpack.c.bf16 %v1635_v6, %v1635_v6  ;;  %5766 = vmatprep.subr.bf16.mxu0 %v6412_v2 }
 0xa4b   : > { %5761 = vmatmul.mubr.msk.bf16.vlgmr.msra.gmra.mxu1 %vm827_vm4, %v1637_v28 }
 0xa4c   : > { %5776 = vmatprep.mubr.msk.bf16.mxu1 %vm6413_vm1, %v6412_v2  ;;  %5767 = vmatpush3.bf16.msra.mxu0 %v6191_v8 }
 0xa4d   : > { %5780 = vmatprep.subr.bf16.mxu0 %v6412_v2 }
 0xb07   : > { %v1680_v9 = vpop.f32.mrf.mxu0 }
 0xb09   : > { %v5756_v10 = vpop.f32.mrf.mxu0 }
 0xb0b   : > { %v1683_v11 = vpop.f32.mrf.mxu0  ;;  %v1728_v12 = vpop.f32.mrf.mxu1 }
 0xb0c   : > { %v6166_v13 = vpack.i.bf16 %v1728_v12, %v1680_v9  ;;  %v5294_v11 = vld [vmem:[%s7699_s14] ss:$0 sm:$0xff] }
 0xb0d   : > { %v5757_v14 = vpop.f32.mrf.mxu0  ;;  %v5762_v15 = vpop.f32.mrf.mxu1 }
 0xb0e   : > { %6167 = vrot.lane.b32.xlu0 %v6166_v13, %s7645_s29  ;;  %s7700_s29 = smov 88  }
 0xb0f   : > { %v1731_v16 = vpop.f32.mrf.mxu1 }
 0xb10   : > { %v6195_v16 = vld [vmem:[%s7619_s17 + $0x10] sm:$0xff]  }
 0xb11   : > { %v5763_v19 = vpop.f32.mrf.mxu1 }
 0xb12   : > { %v6196_v19 = vld [vmem:[%s7619_s17 + $0x8] sm:$0xff]  }
 0xb80   : > { %v6168_v34 = vpop.permute.xlu0 %6167 }
 0xb81   : > { %v6170_v37 = vunpack.i.h.bf16 %v6168_v34  ;;  %v6169_v39 = vunpack.i.l.bf16 %v6168_v34 }
 0xb83   : > { %v1765_v42 = vsel %vm1763_vm11, %v1762_v40, %v6170_v37  ;;  %v1764_v44 = vsel %vm1763_vm11, %v1761_v41, %v6169_v39  ;;  %v5299_v40 = vld [vmem:[%s7620_s18] ss:$0 sm:$0xff] }
 0xb84   : > { %v1770_v45 = vpack.c.bf16 %v1765_v42, %v1764_v44 }
 0xb86   : > { %5769 = vmatmul.mubr.msk.bf16.vlgmr.msra.gmra.mxu0 %vm777_vm3, %v1770_v45 }
 0xb87   : > { %5788 = vmatprep.mubr.msk.bf16.mxu0 %vm6413_vm1, %v6412_v2  ;;  %5781 = vmatpush3.bf16.msra.mxu0 %v6194_v62 }
 0xb88   : > { %5782 = vmatprep.subr.bf16.mxu0 %v6412_v2 }
 0xb8b   : > { %5783 = vmatpush3.bf16.msra.mxu0 %v6195_v16 }
 0xb8c   : > { %5784 = vmatprep.subr.bf16.mxu0 %v6412_v2 }
 0xb8f   : > { %5785 = vmatpush3.bf16.msra.mxu0 %v6196_v19 }
 0xb90   : > { %5786 = vmatprep.subr.bf16.mxu0 %v6412_v2 }
 0xb93   : > { %5787 = vmatpush3.bf16.msra.mxu0 %v6197_v20 }
 0xb94   : > { %5806 = vmatprep.subr.bf16.mxu0 %v6412_v2 }
 0xc46   : > { %v1827_v31 = vpop.f32.mrf.mxu0 }
 0xc47   : > { %v1828_v46 = vadd.f32 %v5289_v27, %v1827_v31 }
 0xc48   : > { %v5770_v47 = vpop.f32.mrf.mxu0 }
 0xc49   : > { %v1834_v48 = vadd.f32 %v1828_v46, %v6625_v17 }
 0xc4a   : > { %v1830_v49 = vpop.f32.mrf.mxu0 }
 0xc4b   : > { %v1831_v50 = vadd.f32 %v5289_v27, %v1830_v49  ;;  %v1838_v52 = vsel %vm777_vm3, %v1834_v48, 0.0 }
 0xc4c   : > { %1839 = vadd.xlane.f32.xlu1 %v1838_v52  ;;  %v5771_v53 = vpop.f32.mrf.mxu0 }
 0xc4d   : > { %v1835_v54 = vadd.f32 %v1831_v50, %v6627_v18  ;;  %v6192_v18 = vld [vmem:[%s7617_s15 + $0x8] sm:$0xff]  }
 0xc4e   : > { %5773 = vmatpush3.bf16.msra.mxu1 %v6192_v18 }
 0xc4f   : > { %v1841_v55 = vsel %vm777_vm3, %v1835_v54, 0.0  ;;  %5774 = vmatprep.subr.bf16.mxu1 %v6412_v2 }
 0xc50   : > { %1842 = vadd.xlane.f32.xlu0 %v1841_v55 }
 0xc52   : > { %5775 = vmatpush3.bf16.msra.mxu1 %v6193_v61 }
 0xc53   : > { %5792 = vmatprep.subr.bf16.mxu1 %v6412_v2 }
 0xcd5   : > { %v1840_v56 = vpop.xlane.xlu1 %1839 }
 0xcd6   : > { %v1845_v57 = vmul.f32 0.03125, %v1840_v56 }
 0xcd8   : > { %v1847_v58 = vsub.f32 %v1834_v48, %v1845_v57 }
 0xcd9   : > { %v1843_v59 = vpop.xlane.xlu0 %1842 }
 0xcda   : > { %v1846_v24 = vmul.f32 0.03125, %v1843_v59  ;;  %v1849_v21 = vmul.f32 %v1847_v58, %v1847_v58 }
 0xcdc   : > { %v1848_v25 = vsub.f32 %v1835_v54, %v1846_v24  ;;  %v1851_v17 = vsel %vm777_vm3, %v1849_v21, 0.0  ;;  %v6198_v21 = vld [vmem:[%s7611_s9 + $0x18] sm:$0xff]  }
 0xcdd   : > { %1852 = vadd.xlane.f32.xlu0 %v1851_v17 }
 0xcde   : > { %v1850_v26 = vmul.f32 %v1848_v25, %v1848_v25 }
 0xce0   : > { %v1854_v60 = vsel %vm777_vm3, %v1850_v26, 0.0 }
 0xce1   : > { %1855 = vadd.xlane.f32.xlu1 %v1854_v60 }
 0xd66   : > { %v1853_v63 = vpop.xlane.xlu0 %1852 }
 0xd67   : > { %v1857_v0 = vmul.f32 0.03125, %v1853_v63 }
 0xd69   : > { %v1859_v1 = vadd.f32 1e-05, %v1857_v0 }
 0xd6a   : > { %v1856_v3 = vpop.xlane.xlu1 %1855 }
 0xd6b   : > { %6262 = vrsqrt.f32 %v1859_v1  ;;  %v1858_v4 = vmul.f32 0.03125, %v1856_v3  ;;  %v5305_v1 = vld [vmem:[%s7621_s19] ss:$0 sm:$0xff] }
 0xd6d   : > { %v1860_v5 = vadd.f32 1e-05, %v1858_v4 }
 0xd6f   : > { %6264 = vrsqrt.f32 %v1860_v5 }
 0xd78   : > { %v6263_v6 = vpop.eup %6262 }
 0xd79   : > { %v1863_v28 = vmul.f32 %v6263_v6, %v1847_v58  ;;  %v5306_v6 = vld [vmem:[%s7622_s20] ss:$0 sm:$0xff] }
 0xd7b   : > { %v1871_v10 = vmul.f32 %v5293_v7, %v1863_v28 }
 0xd7c   : > { %v6265_v8 = vpop.eup %6264 }
 0xd7d   : > { %v1864_v9 = vmul.f32 %v6265_v8, %v1848_v25  ;;  %v1879_v13 = vadd.f32 %v5294_v11, %v1871_v10  ;;  %v6199_v25 = vld [vmem:[%s7611_s9 + $0x10] sm:$0xff]   ;;  %v5312_v10 = vld [vmem:[%s7612_s10 + $0x1] ss:$0 sm:$0xff] }
 0xd7f   : > { %v1872_v12 = vmul.f32 %v5293_v7, %v1864_v9 }
 0xd81   : > { %v1880_v14 = vadd.f32 %v5294_v11, %v1872_v12 }
 0xd83   : > { %v1885_v15 = vpack.c.bf16 %v1880_v14, %v1879_v13 }
 0xd85   : > { %5777 = vmatmul.mubr.msk.bf16.vlgmr.msra.gmra.mxu1 %vm777_vm3, %v1885_v15 }
 0xd86   : > { %5796 = vmatprep.mubr.msk.bf16.mxu1 %vm6413_vm1, %v6412_v2  ;;  %5793 = vmatpush3.bf16.msra.mxu1 %v6198_v21 }
 0xd87   : > { %5794 = vmatprep.subr.bf16.mxu1 %v6412_v2 }
 0xd8a   : > { %5795 = vmatpush3.bf16.msra.mxu1 %v6199_v25 }
 0xd8b   : > { %5800 = vmatprep.subr.bf16.mxu1 %v6412_v2 }
 0xe45   : > { %v1942_v23 = vpop.f32.mrf.mxu1 }
 0xe46   : > { %v1943_v30 = vadd.f32 %v5295_v22, %v1942_v23 }
 0xe47   : > { %v5778_v29 = vpop.f32.mrf.mxu1 }
 0xe48   : > { %v1949_v36 = vmax.f32 %v1943_v30, 0.0 }
 0xe49   : > { %v1945_v32 = vpop.f32.mrf.mxu1 }
 0xe4a   : > { %v1946_v34 = vadd.f32 %v5295_v22, %v1945_v32 }
 0xe4b   : > { %v5779_v35 = vpop.f32.mrf.mxu1 }
 0xe4c   : > { %v1950_v37 = vmax.f32 %v1946_v34, 0.0 }
 0xe4e   : > { %v1959_v39 = vpack.c.bf16 %v1950_v37, %v1949_v36 }
 0xe50   : > { %5789 = vmatmul.mubr.msk.bf16.vlgmr.msra.gmra.mxu0 %vm1991_vm12, %v1959_v39 }
 0xe51   : > { %5808 = vmatprep.mubr.msk.bf16.mxu0 %vm6413_vm1, %v6412_v2 }
 0xf10   : > { %v2029_v41 = vpop.f32.mrf.mxu0 }
 0xf11   : > { %v2030_v42 = vadd.f32 %v5299_v40, %v2029_v41 }
 0xf12   : > { %v5790_v44 = vpop.f32.mrf.mxu0 }
 0xf13   : > { %v2036_v45 = vadd.f32 %v2030_v42, %v1879_v13 }
 0xf14   : > { %v2032_v27 = vpop.f32.mrf.mxu0 }
 0xf15   : > { %v2033_v31 = vadd.f32 %v5299_v40, %v2032_v27  ;;  %v2040_v46 = vsel %vm777_vm3, %v2036_v45, 0.0 }
 0xf16   : > { %2041 = vadd.xlane.f32.xlu0 %v2040_v46  ;;  %v5791_v47 = vpop.f32.mrf.mxu0 }
 0xf17   : > { %v2037_v48 = vadd.f32 %v2033_v31, %v1880_v14 }
 0xf19   : > { %v2043_v49 = vsel %vm777_vm3, %v2037_v48, 0.0 }
 0xf1a   : > { %2044 = vadd.xlane.f32.xlu1 %v2043_v49 }
 0xf9f   : > { %v2042_v50 = vpop.xlane.xlu0 %2041 }
 0xfa0   : > { %v2046_v52 = vmul.f32 0.03125, %v2042_v50 }
 0xfa2   : > { %v2048_v53 = vsub.f32 %v2036_v45, %v2046_v52 }
 0xfa3   : > { %v2045_v54 = vpop.xlane.xlu1 %2044 }
 0xfa4   : > { %v2047_v55 = vmul.f32 0.03125, %v2045_v54  ;;  %v2050_v56 = vmul.f32 %v2048_v53, %v2048_v53 }
 0xfa6   : > { %v2049_v57 = vsub.f32 %v2037_v48, %v2047_v55  ;;  %v2052_v58 = vsel %vm777_vm3, %v2050_v56, 0.0 }
 0xfa7   : > { %2053 = vadd.xlane.f32.xlu0 %v2052_v58 }
 0xfa8   : > { %v2051_v59 = vmul.f32 %v2049_v57, %v2049_v57 }
 0xfaa   : > { %v2055_v24 = vsel %vm777_vm3, %v2051_v59, 0.0 }
 0xfab   : > { %2056 = vadd.xlane.f32.xlu1 %v2055_v24 }
0x1030   : > { %v2054_v17 = vpop.xlane.xlu0 %2053 }
0x1031   : > { %v2058_v26 = vmul.f32 0.03125, %v2054_v17 }
0x1033   : > { %v2060_v60 = vadd.f32 1e-05, %v2058_v26 }
0x1034   : > { %v2057_v18 = vpop.xlane.xlu1 %2056 }
0x1035   : > { %6266 = vrsqrt.f32 %v2060_v60  ;;  %v2059_v61 = vmul.f32 0.03125, %v2057_v18 }
0x1037   : > { %v2061_v62 = vadd.f32 1e-05, %v2059_v61 }
0x1039   : > { %6268 = vrsqrt.f32 %v2061_v62 }
0x1042   : > { %v6267_v63 = vpop.eup %6266 }
0x1043   : > { %v2064_v0 = vmul.f32 %v6267_v63, %v2048_v53 }
0x1045   : > { %v2072_v5 = vmul.f32 %v5305_v1, %v2064_v0 }
0x1046   : > { %v6269_v3 = vpop.eup %6268 }
0x1047   : > { %v2065_v4 = vmul.f32 %v6269_v3, %v2049_v57  ;;  %v6923_v7 = vadd.f32 %v5306_v6, %v2072_v5 }
0x1049   : > { %v2073_v28 = vmul.f32 %v5305_v1, %v2065_v4 }
0x104b   : > { %v6925_v8 = vadd.f32 %v5306_v6, %v2073_v28 }
0x104d   : > { %v2087_v9 = vpack.c.bf16 %v6925_v8, %v6923_v7 }
0x104f   : > { %5797 = vmatmul.mubr.msk.bf16.vlgmr.msra.gmra.mxu1 %vm777_vm3, %v2087_v9 }
0x1050   : > { %5802 = vmatprep.mubr.msk.bf16.mxu1 %vm6413_vm1, %v6412_v2 }
0x110f   : > { %v2145_v11 = vpop.f32.mrf.mxu1 }
0x1110   : > { %v2146_v12 = vadd.f32 %v5312_v10, %v2145_v11 }
0x1111   : > { %v5798_v13 = vpop.f32.mrf.mxu1 }
0x1112   : > { %v6935_v14 = vpack.c.bf16 %v2146_v12, %v2146_v12 }
0x1113   : > { %v2148_v15 = vpop.f32.mrf.mxu1 }
0x1114   : > { %v2149_v16 = vadd.f32 %v5312_v10, %v2148_v15  ;;  %2155 = vrot.lane.b32.xlu0 %v6935_v14, %s7653_s2 }
0x1115   : > { %v5799_v19 = vpop.f32.mrf.mxu1 }
0x1116   : > { %v6939_v20 = vpack.c.bf16 %v2149_v16, %v2149_v16 }
0x1118   : > { %2204 = vrot.lane.b32.xlu1 %v6939_v20, %s7653_s2  ;;  %s7708_s2 = smov 40  }
0x1186   : > { %v2156_v22 = vpop.permute.xlu0 %2155 }
0x1187   : > { %v2161_v23 = vsel %vm827_vm4, %v2156_v22, 0 }
0x1188   : > { %5801 = vmatpush3.bf16.xpose.msra.mxu1 %v2161_v23 }
0x1189   : > { %5812 = vmatprep.subr.bf16.mxu1 %v6412_v2 }
0x118a   : > { %v2205_v29 = vpop.permute.xlu1 %2204 }
0x118b   : > { %v2210_v30 = vsel %vm827_vm4, %v2205_v29, 0 }
0x118c   : > { %5807 = vmatpush3.bf16.xpose.msra.mxu0 %v2210_v30 }
0x118d   : > { %5818 = vmatprep.subr.bf16.mxu0 %v6412_v2 }
0x118f   : > { %5803 = vmatmul.mubr.msk.bf16.vlgmr.msra.gmra.mxu1 %vm827_vm4, %v6935_v14 }
0x1190   : > { %5814 = vmatprep.mubr.msk.bf16.mxu1 %vm6413_vm1, %v6412_v2 }
0x1193   : > { %5809 = vmatmul.mubr.msk.bf16.vlgmr.msra.gmra.mxu0 %vm827_vm4, %v6939_v20 }
0x1194   : > { %5820 = vmatprep.mubr.msk.bf16.mxu0 %vm6413_vm1, %v6412_v2 }
0x124f   : > { %v2197_v32 = vpop.f32.mrf.mxu1 }
0x1250   : > { %v2252_v34 = vmul.f32 0.35355338, %v2197_v32 }
0x1251   : > { %v5804_v35 = vpop.f32.mrf.mxu1 }
0x1252   : > { %v2254_v36 = vsel %vm6668_vm7, %v2252_v34, -1e+09 }
0x1253   : > { %v2200_v37 = vpop.f32.mrf.mxu1  ;;  %v2246_v39 = vpop.f32.mrf.mxu0  ;;  %v2256_v40 = vsel %vm827_vm4, %v2254_v36, -inf }
0x1254   : > { %v2253_v41 = vmul.f32 0.35355338, %v2246_v39  ;;  %2257 = vmax.xlane.f32.xlu1 %v2256_v40 }
0x1255   : > { %v5805_v42 = vpop.f32.mrf.mxu1  ;;  %v5810_v44 = vpop.f32.mrf.mxu0 }
0x1256   : > { %v2255_v45 = vsel %vm6676_vm8, %v2253_v41, -1e+09 }
0x1257   : > { %v2249_v27 = vpop.f32.mrf.mxu0  ;;  %v2259_v31 = vsel %vm827_vm4, %v2255_v45, -inf }
0x1258   : > { %2260 = vmax.xlane.f32.xlu0 %v2259_v31 }
0x1259   : > { %v5811_v46 = vpop.f32.mrf.mxu0 }
0x1265   : > { %2328 = vrot.lane.b32.xlu1 %v6939_v20, %s7651_s24 }
0x126e   : > { %2280 = vrot.lane.b32.xlu0 %v6935_v14, %s7651_s24  ;;  %s7707_s24 = smov 104  }
0x12dd   : > { %v2258_v47 = vpop.xlane.xlu1 %2257 }
0x12de   : > { %v2262_v48 = vsub.f32 %v2254_v36, %v2258_v47 }
0x12e0   : > { %v2264_v49 = vmul.f32 1.442695, %v2262_v48 }
0x12e1   : > { %v2329_v50 = vpop.permute.xlu1 %2328  ;;  %v2261_v52 = vpop.xlane.xlu0 %2260 }
0x12e2   : > { %6270 = vpow2.f32 %v2264_v49  ;;  %v2334_v53 = vsel %vm970_vm9, %v2329_v50, 0  ;;  %v2263_v54 = vsub.f32 %v2255_v45, %v2261_v52 }
0x12e3   : > { %5819 = vmatpush3.bf16.msra.mxu0 %v2334_v53 }
0x12e4   : > { %v2266_v55 = vmul.f32 1.442695, %v2263_v54  ;;  %5830 = vmatprep.subr.bf16.mxu0 %v6412_v2 }
0x12e5   : > { %v2281_v56 = vpop.permute.xlu0 %2280 }
0x12e6   : > { %6272 = vpow2.f32 %v2266_v55  ;;  %v2286_v57 = vsel %vm970_vm9, %v2281_v56, 0 }
0x12e7   : > { %5813 = vmatpush3.bf16.msra.mxu1 %v2286_v57 }
0x12e8   : > { %5824 = vmatprep.subr.bf16.mxu1 %v6412_v2 }
0x12ef   : > { %v6271_v58 = vpop.eup %6270 }
0x12f0   : > { %v2268_v59 = vsel %vm827_vm4, %v6271_v58, 0.0 }
0x12f1   : > { %2269 = vadd.xlane.f32.xlu0 %v2268_v59 }
0x12f3   : > { %v6273_v24 = vpop.eup %6272 }
0x12f4   : > { %v2271_v21 = vsel %vm827_vm4, %v6273_v24, 0.0 }
0x12f5   : > { %2272 = vadd.xlane.f32.xlu1 %v2271_v21 }
0x1306   : > { %2378 = vrot.lane.b32.xlu1 %v6935_v14, %s7700_s29 }
0x1307   : > { %2428 = vrot.lane.b32.xlu0 %v6939_v20, %s7700_s29 }
0x130a   : > { %2376 = vrot.lane.b32.xlu1 %v6935_v14, %s7701_s4 }
0x130b   : > { %2426 = vrot.lane.b32.xlu0 %v6939_v20, %s7701_s4 }
0x137a   : > { %v2270_v25 = vpop.xlane.xlu0 %2269 }
0x137b   : > { %6274 = vrcp.f32 %v2270_v25 }
0x137e   : > { %v2273_v17 = vpop.xlane.xlu1 %2272  ;;  %v2429_v1 = vpop.permute.xlu0 %2428 }
0x137f   : > { %6276 = vrcp.f32 %v2273_v17  ;;  %v2434_v4 = vsel %vm827_vm4, %v2429_v1, 0 }
0x1382   : > { %v2379_v18 = vpop.permute.xlu1 %2378  ;;  %v2427_v6 = vpop.permute.xlu0 %2426 }
0x1383   : > { %v2384_v63 = vsel %vm827_vm4, %v2379_v18, 0 }
0x1386   : > { %v2377_v5 = vpop.permute.xlu1 %2376 }
0x1388   : > { %v6275_v26 = vpop.eup %6274 }
0x1389   : > { %v2276_v60 = vmul.f32 %v6275_v26, %v6271_v58 }
0x138b   : > { %v2278_v61 = vpack.c.bf16 %v2276_v60, %v2276_v60 }
0x138c   : > { %v6277_v62 = vpop.eup %6276 }
0x138d   : > { %5815 = vmatmul.mubr.msk.bf16.vlgmr.msra.gmra.mxu1 %vm827_vm4, %v2278_v61  ;;  %v2277_v0 = vmul.f32 %v6277_v62, %v6273_v24 }
0x138e   : > { %5825 = vmatpush3.bf16.xpose.msra.mxu1 %v2384_v63  ;;  %5826 = vmatprep.mubr.msk.bf16.mxu1 %vm6413_vm1, %v6412_v2 }
0x138f   : > { %v2279_v3 = vpack.c.bf16 %v2277_v0, %v2277_v0  ;;  %5836 = vmatprep.subr.bf16.mxu1 %v6412_v2 }
0x1391   : > { %5821 = vmatmul.mubr.msk.bf16.vlgmr.msra.gmra.mxu0 %vm827_vm4, %v2279_v3 }
0x1392   : > { %5831 = vmatpush3.bf16.xpose.msra.mxu0 %v2434_v4  ;;  %5832 = vmatprep.mubr.msk.bf16.mxu0 %vm6413_vm1, %v6412_v2 }
0x1393   : > { %5842 = vmatprep.subr.bf16.mxu0 %v6412_v2 }
0x1395   : > { %5827 = vmatmul.mubr.msk.bf16.vlgmr.msra.gmra.mxu1 %vm827_vm4, %v2377_v5 }
0x1396   : > { %5838 = vmatprep.mubr.msk.bf16.mxu1 %vm6413_vm1, %v6412_v2 }
0x1399   : > { %5833 = vmatmul.mubr.msk.bf16.vlgmr.msra.gmra.mxu0 %vm827_vm4, %v2427_v6 }
0x139a   : > { %5844 = vmatprep.mubr.msk.bf16.mxu0 %vm6413_vm1, %v6412_v2 }
0x144d   : > { %v6995_v28 = vpop.f32.mrf.mxu1 }
0x144f   : > { %v5816_v9 = vpop.f32.mrf.mxu1 }
0x1451   : > { %v2325_v10 = vpop.f32.mrf.mxu1  ;;  %v6997_v11 = vpop.f32.mrf.mxu0 }
0x1453   : > { %v5817_v12 = vpop.f32.mrf.mxu1  ;;  %v5822_v13 = vpop.f32.mrf.mxu0 }
0x1455   : > { %v2373_v15 = vpop.f32.mrf.mxu0  ;;  %v2420_v16 = vpop.f32.mrf.mxu1 }
0x1456   : > { %v2476_v19 = vmul.f32 0.35355338, %v2420_v16 }
0x1457   : > { %v5823_v22 = vpop.f32.mrf.mxu0  ;;  %v5828_v23 = vpop.f32.mrf.mxu1 }
0x1458   : > { %v2478_v29 = vsel %vm6668_vm7, %v2476_v19, -1e+09 }
0x1459   : > { %v2423_v30 = vpop.f32.mrf.mxu1  ;;  %v2470_v32 = vpop.f32.mrf.mxu0  ;;  %v2480_v34 = vsel %vm827_vm4, %v2478_v29, -inf }
0x145a   : > { %v2477_v35 = vmul.f32 0.35355338, %v2470_v32  ;;  %2481 = vmax.xlane.f32.xlu1 %v2480_v34 }
0x145b   : > { %v5829_v36 = vpop.f32.mrf.mxu1  ;;  %v5834_v37 = vpop.f32.mrf.mxu0 }
0x145c   : > { %v2479_v39 = vsel %vm6676_vm8, %v2477_v35, -1e+09 }
0x145d   : > { %v2473_v40 = vpop.f32.mrf.mxu0  ;;  %v2483_v41 = vsel %vm827_vm4, %v2479_v39, -inf }
0x145e   : > { %2484 = vmax.xlane.f32.xlu0 %v2483_v41 }
0x145f   : > { %v5835_v42 = vpop.f32.mrf.mxu0 }
0x146b   : > { %2552 = vrot.lane.b32.xlu1 %v6939_v20, %s7702_s30 }
0x1474   : > { %2504 = vrot.lane.b32.xlu0 %v6935_v14, %s7702_s30 }
0x14e3   : > { %v2482_v44 = vpop.xlane.xlu1 %2481 }
0x14e4   : > { %v2486_v45 = vsub.f32 %v2478_v29, %v2482_v44 }
0x14e6   : > { %v2488_v27 = vmul.f32 1.442695, %v2486_v45 }
0x14e7   : > { %v2553_v31 = vpop.permute.xlu1 %2552  ;;  %v2485_v46 = vpop.xlane.xlu0 %2484 }
0x14e8   : > { %6278 = vpow2.f32 %v2488_v27  ;;  %v2558_v47 = vsel %vm970_vm9, %v2553_v31, 0  ;;  %v2487_v48 = vsub.f32 %v2479_v39, %v2485_v46 }
0x14e9   : > { %5843 = vmatpush3.bf16.msra.mxu0 %v2558_v47 }
0x14ea   : > { %v2490_v49 = vmul.f32 1.442695, %v2487_v48  ;;  %5854 = vmatprep.subr.bf16.mxu0 %v6412_v2 }
0x14eb   : > { %v2505_v50 = vpop.permute.xlu0 %2504 }
0x14ec   : > { %6280 = vpow2.f32 %v2490_v49  ;;  %v2510_v52 = vsel %vm970_vm9, %v2505_v50, 0 }
0x14ed   : > { %5837 = vmatpush3.bf16.msra.mxu1 %v2510_v52 }
0x14ee   : > { %5848 = vmatprep.subr.bf16.mxu1 %v6412_v2 }
0x14f5   : > { %v6279_v53 = vpop.eup %6278 }
0x14f6   : > { %v2492_v54 = vsel %vm827_vm4, %v6279_v53, 0.0 }
0x14f7   : > { %2493 = vadd.xlane.f32.xlu0 %v2492_v54 }
0x14f9   : > { %v6281_v55 = vpop.eup %6280 }
0x14fa   : > { %v2495_v56 = vsel %vm827_vm4, %v6281_v55, 0.0 }
0x14fb   : > { %2496 = vadd.xlane.f32.xlu1 %v2495_v56 }
0x150c   : > { %2602 = vrot.lane.b32.xlu1 %v6935_v14, %s7703_s1 }
0x150d   : > { %2652 = vrot.lane.b32.xlu0 %v6939_v20, %s7703_s1 }
0x1510   : > { %2600 = vrot.lane.b32.xlu1 %v6935_v14, %s7704_s3 }
0x1511   : > { %2650 = vrot.lane.b32.xlu0 %v6939_v20, %s7704_s3 }
0x1580   : > { %v2494_v57 = vpop.xlane.xlu0 %2493 }
0x1581   : > { %6282 = vrcp.f32 %v2494_v57 }
0x1584   : > { %v2497_v58 = vpop.xlane.xlu1 %2496  ;;  %v2653_v18 = vpop.permute.xlu0 %2652 }
0x1585   : > { %6284 = vrcp.f32 %v2497_v58  ;;  %v2658_v62 = vsel %vm827_vm4, %v2653_v18, 0 }
0x1588   : > { %v2603_v21 = vpop.permute.xlu1 %2602  ;;  %v2651_v0 = vpop.permute.xlu0 %2650 }
0x1589   : > { %v2608_v26 = vsel %vm827_vm4, %v2603_v21, 0 }
0x158c   : > { %v2601_v63 = vpop.permute.xlu1 %2600 }
0x158e   : > { %v6283_v59 = vpop.eup %6282 }
0x158f   : > { %v2500_v24 = vmul.f32 %v6283_v59, %v6279_v53 }
0x1591   : > { %v2502_v25 = vpack.c.bf16 %v2500_v24, %v2500_v24 }
0x1592   : > { %v6285_v17 = vpop.eup %6284 }
0x1593   : > { %5839 = vmatmul.mubr.msk.bf16.vlgmr.msra.gmra.mxu1 %vm827_vm4, %v2502_v25  ;;  %v2501_v60 = vmul.f32 %v6285_v17, %v6281_v55 }
0x1594   : > { %5849 = vmatpush3.bf16.xpose.msra.mxu1 %v2608_v26  ;;  %5850 = vmatprep.mubr.msk.bf16.mxu1 %vm6413_vm1, %v6412_v2 }
0x1595   : > { %v2503_v61 = vpack.c.bf16 %v2501_v60, %v2501_v60  ;;  %5860 = vmatprep.subr.bf16.mxu1 %v6412_v2 }
0x1597   : > { %5845 = vmatmul.mubr.msk.bf16.vlgmr.msra.gmra.mxu0 %vm827_vm4, %v2503_v61 }
0x1598   : > { %5855 = vmatpush3.bf16.xpose.msra.mxu0 %v2658_v62  ;;  %5856 = vmatprep.mubr.msk.bf16.mxu0 %vm6413_vm1, %v6412_v2 }
0x1599   : > { %5866 = vmatprep.subr.bf16.mxu0 %v6412_v2 }
0x159b   : > { %5851 = vmatmul.mubr.msk.bf16.vlgmr.msra.gmra.mxu1 %vm827_vm4, %v2601_v63 }
0x159c   : > { %5862 = vmatprep.mubr.msk.bf16.mxu1 %vm6413_vm1, %v6412_v2 }
0x159f   : > { %5857 = vmatmul.mubr.msk.bf16.vlgmr.msra.gmra.mxu0 %vm827_vm4, %v2651_v0 }
0x15a0   : > { %5868 = vmatprep.mubr.msk.bf16.mxu0 %vm6413_vm1, %v6412_v2 }
0x1653   : > { %v7039_v1 = vpop.f32.mrf.mxu1 }
0x1655   : > { %v5840_v3 = vpop.f32.mrf.mxu1 }
0x1657   : > { %v2549_v4 = vpop.f32.mrf.mxu1  ;;  %v7041_v5 = vpop.f32.mrf.mxu0 }
0x1658   : > { %v6171_v6 = vpack.i.bf16 %v7041_v5, %v7039_v1 }
0x1659   : > { %v5841_v9 = vpop.f32.mrf.mxu1  ;;  %v5846_v10 = vpop.f32.mrf.mxu0 }
0x165b   : > { %v2597_v12 = vpop.f32.mrf.mxu0  ;;  %v2644_v13 = vpop.f32.mrf.mxu1 }
0x165c   : > { %v2700_v15 = vmul.f32 0.35355338, %v2644_v13 }
0x165d   : > { %v5847_v16 = vpop.f32.mrf.mxu0  ;;  %v5852_v19 = vpop.f32.mrf.mxu1 }
0x165e   : > { %v2702_v22 = vsel %vm6668_vm7, %v2700_v15, -1e+09 }
0x165f   : > { %v2647_v23 = vpop.f32.mrf.mxu1  ;;  %v2694_v29 = vpop.f32.mrf.mxu0  ;;  %v2704_v30 = vsel %vm827_vm4, %v2702_v22, -inf }
0x1660   : > { %v2701_v32 = vmul.f32 0.35355338, %v2694_v29  ;;  %2705 = vmax.xlane.f32.xlu1 %v2704_v30 }
0x1661   : > { %v5853_v34 = vpop.f32.mrf.mxu1  ;;  %v5858_v35 = vpop.f32.mrf.mxu0 }
0x1662   : > { %v2703_v36 = vsel %vm6676_vm8, %v2701_v32, -1e+09 }
0x1663   : > { %v2697_v37 = vpop.f32.mrf.mxu0  ;;  %v2707_v39 = vsel %vm827_vm4, %v2703_v36, -inf }
0x1664   : > { %2708 = vmax.xlane.f32.xlu0 %v2707_v39 }
0x1665   : > { %v5859_v40 = vpop.f32.mrf.mxu0 }
0x1671   : > { %2776 = vrot.lane.b32.xlu1 %v6939_v20, %s7705_s5 }
0x167a   : > { %2728 = vrot.lane.b32.xlu0 %v6935_v14, %s7705_s5 }
0x16e9   : > { %v2706_v41 = vpop.xlane.xlu1 %2705 }
0x16ea   : > { %v2710_v42 = vsub.f32 %v2702_v22, %v2706_v41 }
0x16ec   : > { %v2712_v44 = vmul.f32 1.442695, %v2710_v42 }
0x16ed   : > { %v2777_v45 = vpop.permute.xlu1 %2776  ;;  %v2709_v27 = vpop.xlane.xlu0 %2708 }
0x16ee   : > { %6286 = vpow2.f32 %v2712_v44  ;;  %v2782_v31 = vsel %vm970_vm9, %v2777_v45, 0  ;;  %v2711_v46 = vsub.f32 %v2703_v36, %v2709_v27 }
0x16ef   : > { %5867 = vmatpush3.bf16.msra.mxu0 %v2782_v31 }
0x16f0   : > { %v2714_v47 = vmul.f32 1.442695, %v2711_v46  ;;  %5878 = vmatprep.subr.bf16.mxu0 %v6412_v2 }
0x16f1   : > { %v2729_v48 = vpop.permute.xlu0 %2728 }
0x16f2   : > { %6288 = vpow2.f32 %v2714_v47  ;;  %v2734_v49 = vsel %vm970_vm9, %v2729_v48, 0 }
0x16f3   : > { %5861 = vmatpush3.bf16.msra.mxu1 %v2734_v49 }
0x16f4   : > { %5872 = vmatprep.subr.bf16.mxu1 %v6412_v2 }
0x16fb   : > { %v6287_v50 = vpop.eup %6286 }
0x16fc   : > { %v2716_v52 = vsel %vm827_vm4, %v6287_v50, 0.0 }
0x16fd   : > { %2717 = vadd.xlane.f32.xlu0 %v2716_v52 }
0x16ff   : > { %v6289_v53 = vpop.eup %6288 }
0x1700   : > { %v2719_v54 = vsel %vm827_vm4, %v6289_v53, 0.0 }
0x1701   : > { %2720 = vadd.xlane.f32.xlu1 %v2719_v54 }
0x1712   : > { %2826 = vrot.lane.b32.xlu1 %v6935_v14, %s7706_s0 }
0x1713   : > { %2876 = vrot.lane.b32.xlu0 %v6939_v20, %s7706_s0 }
0x1716   : > { %2824 = vrot.lane.b32.xlu1 %v6935_v14, %s7707_s24 }
0x1717   : > { %2874 = vrot.lane.b32.xlu0 %v6939_v20, %s7707_s24 }
0x1786   : > { %v2718_v55 = vpop.xlane.xlu0 %2717 }
0x1787   : > { %6290 = vrcp.f32 %v2718_v55 }
0x178a   : > { %v2721_v56 = vpop.xlane.xlu1 %2720  ;;  %v2877_v26 = vpop.permute.xlu0 %2876 }
0x178b   : > { %6292 = vrcp.f32 %v2721_v56  ;;  %v2882_v18 = vsel %vm827_vm4, %v2877_v26, 0 }
0x178e   : > { %v2827_v59 = vpop.permute.xlu1 %2826  ;;  %v2875_v62 = vpop.permute.xlu0 %2874 }
0x178f   : > { %v2832_v25 = vsel %vm827_vm4, %v2827_v59, 0 }
0x1792   : > { %v2825_v61 = vpop.permute.xlu1 %2824 }
0x1794   : > { %v6291_v57 = vpop.eup %6290 }
0x1795   : > { %v2724_v58 = vmul.f32 %v6291_v57, %v6287_v50  ;;  %v6200_v57 = vld [vmem:[%s7613_s11 + $0x18] sm:$0xff]  }
0x1797   : > { %v2726_v24 = vpack.c.bf16 %v2724_v58, %v2724_v58  ;;  %v6201_v58 = vld [vmem:[%s7613_s11 + $0x10] sm:$0xff]  }
0x1798   : > { %v6293_v21 = vpop.eup %6292 }
0x1799   : > { %5863 = vmatmul.mubr.msk.bf16.vlgmr.msra.gmra.mxu1 %vm827_vm4, %v2726_v24  ;;  %v2725_v17 = vmul.f32 %v6293_v21, %v6289_v53 }
0x179a   : > { %5873 = vmatpush3.bf16.xpose.msra.mxu1 %v2832_v25  ;;  %5874 = vmatprep.mubr.msk.bf16.mxu1 %vm6413_vm1, %v6412_v2 }
0x179b   : > { %v2727_v60 = vpack.c.bf16 %v2725_v17, %v2725_v17  ;;  %5884 = vmatprep.subr.bf16.mxu1 %v6412_v2 }
0x179d   : > { %5869 = vmatmul.mubr.msk.bf16.vlgmr.msra.gmra.mxu0 %vm827_vm4, %v2727_v60 }
0x179e   : > { %5879 = vmatpush3.bf16.xpose.msra.mxu0 %v2882_v18  ;;  %5880 = vmatprep.mubr.msk.bf16.mxu0 %vm6413_vm1, %v6412_v2 }
0x179f   : > { %5890 = vmatprep.subr.bf16.mxu0 %v6412_v2 }
0x17a1   : > { %5875 = vmatmul.mubr.msk.bf16.vlgmr.msra.gmra.mxu1 %vm827_vm4, %v2825_v61 }
0x17a2   : > { %5886 = vmatprep.mubr.msk.bf16.mxu1 %vm6413_vm1, %v6412_v2 }
0x17a5   : > { %5881 = vmatmul.mubr.msk.bf16.vlgmr.msra.gmra.mxu0 %vm827_vm4, %v2875_v62 }
0x17a6   : > { %5892 = vmatprep.mubr.msk.bf16.mxu0 %vm6413_vm1, %v6412_v2 }
0x1859   : > { %v2770_v63 = vpop.f32.mrf.mxu1 }
0x185b   : > { %v5864_v0 = vpop.f32.mrf.mxu1 }
0x185d   : > { %v2773_v3 = vpop.f32.mrf.mxu1  ;;  %v2818_v4 = vpop.f32.mrf.mxu0 }
0x185e   : > { %v6176_v9 = vpack.i.bf16 %v2818_v4, %v2770_v63 }
0x185f   : > { %v5865_v10 = vpop.f32.mrf.mxu1  ;;  %v5870_v12 = vpop.f32.mrf.mxu0 }
0x1861   : > { %v2821_v13 = vpop.f32.mrf.mxu0  ;;  %v2868_v15 = vpop.f32.mrf.mxu1 }
0x1862   : > { %v2924_v16 = vmul.f32 0.35355338, %v2868_v15 }
0x1863   : > { %v5871_v19 = vpop.f32.mrf.mxu0  ;;  %v5876_v22 = vpop.f32.mrf.mxu1 }
0x1864   : > { %v2926_v23 = vsel %vm6668_vm7, %v2924_v16, -1e+09 }
0x1865   : > { %v2871_v29 = vpop.f32.mrf.mxu1  ;;  %v2918_v30 = vpop.f32.mrf.mxu0  ;;  %v2928_v32 = vsel %vm827_vm4, %v2926_v23, -inf }
0x1866   : > { %v2925_v34 = vmul.f32 0.35355338, %v2918_v30  ;;  %2929 = vmax.xlane.f32.xlu1 %v2928_v32 }
0x1867   : > { %v5877_v35 = vpop.f32.mrf.mxu1  ;;  %v5882_v36 = vpop.f32.mrf.mxu0 }
0x1868   : > { %v2927_v37 = vsel %vm6676_vm8, %v2925_v34, -1e+09 }
0x1869   : > { %v2921_v39 = vpop.f32.mrf.mxu0  ;;  %v2931_v40 = vsel %vm827_vm4, %v2927_v37, -inf }
0x186a   : > { %2932 = vmax.xlane.f32.xlu0 %v2931_v40 }
0x186b   : > { %v5883_v41 = vpop.f32.mrf.mxu0 }
0x18ef   : > { %v2930_v42 = vpop.xlane.xlu1 %2929 }
0x18f0   : > { %v2934_v44 = vsub.f32 %v2926_v23, %v2930_v42 }
0x18f2   : > { %v2936_v43 = vmul.f32 1.442695, %v2934_v44 }
0x18f3   : > { %v2933_v45 = vpop.xlane.xlu0 %2932 }
0x18f4   : > { %6294 = vpow2.f32 %v2936_v43  ;;  %v2935_v27 = vsub.f32 %v2927_v37, %v2933_v45 }
0x18f6   : > { %v2938_v31 = vmul.f32 1.442695, %v2935_v27 }
0x18f8   : > { %6296 = vpow2.f32 %v2938_v31 }
0x1901   : > { %v6295_v46 = vpop.eup %6294 }
0x1902   : > { %v2940_v47 = vsel %vm827_vm4, %v6295_v46, 0.0 }
0x1903   : > { %2941 = vadd.xlane.f32.xlu0 %v2940_v47 }
0x1905   : > { %v6297_v48 = vpop.eup %6296 }
0x1906   : > { %v2943_v51 = vsel %vm827_vm4, %v6297_v48, 0.0 }
0x1907   : > { %2944 = vadd.xlane.f32.xlu1 %v2943_v51 }
0x1918   : > { %3000 = vrot.lane.b32.xlu1 %v6939_v20, %s7708_s2 }
0x1919   : > { %2952 = vrot.lane.b32.xlu0 %v6935_v14, %s7708_s2 }
0x191c   : > { %6172 = vrot.lane.b32.xlu1 %v6171_v6, %s7709_s23 }
0x191d   : > { %6177 = vrot.lane.b32.xlu0 %v6176_v9, %s7710_s26 }
0x198c   : > { %v2942_v49 = vpop.xlane.xlu0 %2941 }
0x198d   : > { %6298 = vrcp.f32 %v2942_v49  ;;  %v6203_v49 = vld [vmem:[%s7617_s15 + $0x10] sm:$0xff]  }
0x1990   : > { %v2945_v50 = vpop.xlane.xlu1 %2944  ;;  %v2953_v52 = vpop.permute.xlu0 %2952 }
0x1991   : > { %6300 = vrcp.f32 %v2945_v50  ;;  %v2958_v53 = vsel %vm970_vm9, %v2953_v52, 0  ;;  %v6204_v50 = vld [vmem:[%s7619_s17 + $0x38] sm:$0xff]  }
0x1992   : > { %5885 = vmatpush3.bf16.msra.mxu1 %v2958_v53 }
0x1993   : > { %5896 = vmatprep.subr.bf16.mxu1 %v6412_v2 }
0x1994   : > { %v3001_v20 = vpop.permute.xlu1 %3000  ;;  %v6178_v3 = vpop.permute.xlu0 %6177 }
0x1995   : > { %v3006_v14 = vsel %vm970_vm9, %v3001_v20, 0  ;;  %v6180_v10 = vunpack.i.h.bf16 %v6178_v3  ;;  %v6179_v12 = vunpack.i.l.bf16 %v6178_v3 }
0x1996   : > { %5891 = vmatpush3.bf16.msra.mxu0 %v3006_v14 }
0x1997   : > { %5904 = vmatprep.subr.bf16.mxu0 %v6412_v2 }
0x1998   : > { %v6173_v62 = vpop.permute.xlu1 %6172 }
0x1999   : > { %v6175_v63 = vunpack.i.h.bf16 %v6173_v62  ;;  %v6174_v0 = vunpack.i.l.bf16 %v6173_v62 }
0x199a   : > { %v6299_v1 = vpop.eup %6298 }
0x199b   : > { %v2948_v5 = vmul.f32 %v6299_v1, %v6295_v46  ;;  %v3073_v4 = vsel %vm827_vm4, %v6997_v11, %v6175_v63  ;;  %v3072_v9 = vsel %vm827_vm4, %v6995_v28, %v6174_v0  ;;  %v5337_v28 = vld [vmem:[%s7698_s12 + $0x1] ss:$0 sm:$0xff]  ;;  %s7718_s12 = sld [smem:[#allocation23_spill]] }
0x199c   : > { %v3074_v19 = vsel %vm1760_vm10, %v3072_v9, %v6179_v12  ;;  %v3075_v22 = vsel %vm1760_vm10, %v3073_v4, %v6180_v10 }
0x199d   : > { %v2950_v6 = vpack.c.bf16 %v2948_v5, %v2948_v5 }
0x199e   : > { %v6301_v54 = vpop.eup %6300 }
0x199f   : > { %5887 = vmatmul.mubr.msk.bf16.vlgmr.msra.gmra.mxu1 %vm827_vm4, %v2950_v6  ;;  %v2949_v55 = vmul.f32 %v6301_v54, %v6297_v48 }
0x19a0   : > { %5900 = vmatprep.mubr.msk.bf16.mxu1 %vm6413_vm1, %v6412_v2  ;;  %5897 = vmatpush3.bf16.msra.mxu1 %v6200_v57 }
0x19a1   : > { %v2951_v56 = vpack.c.bf16 %v2949_v55, %v2949_v55  ;;  %5898 = vmatprep.subr.bf16.mxu1 %v6412_v2  ;;  %v5343_v55 = vld [vmem:[%s7615_s13 + $0x1] ss:$0 sm:$0xff] }
0x19a3   : > { %5893 = vmatmul.mubr.msk.bf16.vlgmr.msra.gmra.mxu0 %vm827_vm4, %v2951_v56 }
0x19a4   : > { %5908 = vmatprep.mubr.msk.bf16.mxu0 %vm6413_vm1, %v6412_v2  ;;  %5899 = vmatpush3.bf16.msra.mxu1 %v6201_v58 }
0x19a5   : > { %5912 = vmatprep.subr.bf16.mxu1 %v6412_v2 }
0x1a5f   : > { %v2994_v59 = vpop.f32.mrf.mxu1 }
0x1a61   : > { %v5888_v24 = vpop.f32.mrf.mxu1 }
0x1a63   : > { %v2997_v21 = vpop.f32.mrf.mxu1  ;;  %v3042_v25 = vpop.f32.mrf.mxu0 }
0x1a64   : > { %v6181_v17 = vpack.i.bf16 %v3042_v25, %v2994_v59  ;;  %v5344_v59 = vld [vmem:[%s7699_s14 + $0x1] ss:$0 sm:$0xff]  ;;  %s7724_s14 = sld [smem:[#allocation10_spill]] }
0x1a65   : > { %v5889_v26 = vpop.f32.mrf.mxu1  ;;  %v5894_v60 = vpop.f32.mrf.mxu0 }
0x1a66   : > { %6182 = vrot.lane.b32.xlu1 %v6181_v17, %s7711_s27  ;;  %v6205_v26 = vld [vmem:[%s7619_s17 + $0x30] sm:$0xff]   ;;  %v6206_v60 = vld [vmem:[%s7619_s17 + $0x28] sm:$0xff]  }
0x1a67   : > { %v3045_v18 = vpop.f32.mrf.mxu0 }
0x1a68   : > { %v6207_v18 = vld [vmem:[%s7619_s17 + $0x20] sm:$0xff]  }
0x1a69   : > { %v5895_v61 = vpop.f32.mrf.mxu0 }
0x1a6a   : > { %v5350_v61 = vld [vmem:[%s7618_s16 + $0x1] ss:$0 sm:$0xff] }
0x1ad8   : > { %v6183_v13 = vpop.permute.xlu1 %6182 }
0x1ad9   : > { %v6185_v15 = vunpack.i.h.bf16 %v6183_v13  ;;  %v6184_v16 = vunpack.i.l.bf16 %v6183_v13 }
0x1adb   : > { %v3077_v23 = vsel %vm1763_vm11, %v3075_v22, %v6185_v15  ;;  %v3076_v29 = vsel %vm1763_vm11, %v3074_v19, %v6184_v16  ;;  %v5363_v15 = vld [vmem:[%s7620_s18 + $0x1] ss:$0 sm:$0xff] }
0x1adc   : > { %v3083_v30 = vpack.c.bf16 %v3077_v23, %v3076_v29 }
0x1ade   : > { %5901 = vmatmul.mubr.msk.bf16.vlgmr.msra.gmra.mxu1 %vm777_vm3, %v3083_v30 }
0x1adf   : > { %5920 = vmatprep.mubr.msk.bf16.mxu1 %vm6413_vm1, %v6412_v2  ;;  %5913 = vmatpush3.bf16.msra.mxu1 %v6204_v50 }
0x1ae0   : > { %5914 = vmatprep.subr.bf16.mxu1 %v6412_v2 }
0x1ae3   : > { %5915 = vmatpush3.bf16.msra.mxu1 %v6205_v26 }
0x1ae4   : > { %5916 = vmatprep.subr.bf16.mxu1 %v6412_v2 }
0x1ae7   : > { %5917 = vmatpush3.bf16.msra.mxu1 %v6206_v60 }
0x1ae8   : > { %5918 = vmatprep.subr.bf16.mxu1 %v6412_v2 }
0x1aeb   : > { %5919 = vmatpush3.bf16.msra.mxu1 %v6207_v18 }
0x1aec   : > { %5938 = vmatprep.subr.bf16.mxu1 %v6412_v2 }
0x1b9e   : > { %v3141_v11 = vpop.f32.mrf.mxu1 }
0x1b9f   : > { %v3142_v32 = vadd.f32 %v5337_v28, %v3141_v11 }
0x1ba0   : > { %v5902_v34 = vpop.f32.mrf.mxu1 }
0x1ba1   : > { %v3148_v35 = vadd.f32 %v3142_v32, %v6923_v7 }
0x1ba2   : > { %v3144_v36 = vpop.f32.mrf.mxu1 }
0x1ba3   : > { %v3145_v37 = vadd.f32 %v5337_v28, %v3144_v36  ;;  %v3154_v39 = vsel %vm777_vm3, %v3148_v35, 0.0 }
0x1ba4   : > { %3155 = vadd.xlane.f32.xlu0 %v3154_v39  ;;  %v5903_v40 = vpop.f32.mrf.mxu1 }
0x1ba5   : > { %v3149_v41 = vadd.f32 %v3145_v37, %v6925_v8  ;;  %v6202_v8 = vld [vmem:[%s7617_s15 + $0x18] sm:$0xff]  }
0x1ba6   : > { %5905 = vmatpush3.bf16.msra.mxu0 %v6202_v8 }
0x1ba7   : > { %v3157_v42 = vsel %vm777_vm3, %v3149_v41, 0.0  ;;  %5906 = vmatprep.subr.bf16.mxu0 %v6412_v2 }
0x1ba8   : > { %3158 = vadd.xlane.f32.xlu1 %v3157_v42 }
0x1baa   : > { %5907 = vmatpush3.bf16.msra.mxu0 %v6203_v49 }
0x1bab   : > { %5924 = vmatprep.subr.bf16.mxu0 %v6412_v2 }
0x1c2d   : > { %v3156_v44 = vpop.xlane.xlu0 %3155 }
0x1c2e   : > { %v3160_v43 = vmul.f32 0.03125, %v3156_v44 }
0x1c30   : > { %v3162_v45 = vsub.f32 %v3148_v35, %v3160_v43 }
0x1c31   : > { %v3159_v27 = vpop.xlane.xlu1 %3158 }
0x1c32   : > { %v3161_v31 = vmul.f32 0.03125, %v3159_v27  ;;  %v3164_v46 = vmul.f32 %v3162_v45, %v3162_v45  ;;  %v3402_v27 = vld [vmem:[%s7712_s6] sm:$0xff]  ;;  %s7723_s6 = sld [smem:[#allocation7_spill]] }
0x1c34   : > { %v3163_v47 = vsub.f32 %v3149_v41, %v3161_v31  ;;  %v3166_v7 = vsel %vm777_vm3, %v3164_v46, 0.0  ;;  %v5373_v31 = vld [vmem:[#allocation2] ss:$0 sm:$0xff]  ;;  %v6208_v46 = vld [vmem:[%s7611_s9 + $0x28] sm:$0xff]  }
0x1c35   : > { %3167 = vadd.xlane.f32.xlu0 %v3166_v7 }
0x1c36   : > { %v3165_v48 = vmul.f32 %v3163_v47, %v3163_v47 }
0x1c38   : > { %v3169_v51 = vsel %vm777_vm3, %v3165_v48, 0.0  ;;  %s673_s21 = sand.u32 1, %s7723_s6  }
0x1c39   : > { %3170 = vadd.xlane.f32.xlu0 %v3169_v51 }
0x1cbe   : > { %v3168_v52 = vpop.xlane.xlu0 %3167 }
0x1cbf   : > { %v3172_v53 = vmul.f32 0.03125, %v3168_v52 }
0x1cc1   : > { %v3174_v20 = vadd.f32 1e-05, %v3172_v53  ;;  %v5371_v53 = vld [vmem:[%s7621_s19 + $0x1] ss:$0 sm:$0xff] }
0x1cc2   : > { %v3171_v14 = vpop.xlane.xlu0 %3170 }
0x1cc3   : > { %6302 = vrsqrt.f32 %v3174_v20  ;;  %v3173_v1 = vmul.f32 0.03125, %v3171_v14  ;;  %v5372_v14 = vld [vmem:[%s7622_s20 + $0x1] ss:$0 sm:$0xff] }
0x1cc5   : > { %v3175_v5 = vadd.f32 1e-05, %v3173_v1 }
0x1cc7   : > { %6304 = vrsqrt.f32 %v3175_v5 }
0x1cd0   : > { %v6303_v6 = vpop.eup %6302 }
0x1cd1   : > { %v3178_v54 = vmul.f32 %v6303_v6, %v3162_v45 }
0x1cd3   : > { %v3186_v58 = vmul.f32 %v5343_v55, %v3178_v54 }
0x1cd4   : > { %v6305_v56 = vpop.eup %6304 }
0x1cd5   : > { %v3179_v57 = vmul.f32 %v6305_v56, %v3163_v47  ;;  %v3194_v21 = vadd.f32 %v5344_v59, %v3186_v58  ;;  %v6209_v47 = vld [vmem:[%s7611_s9 + $0x20] sm:$0xff]  }
0x1cd7   : > { %v3187_v24 = vmul.f32 %v5343_v55, %v3179_v57 }
0x1cd9   : > { %v3195_v25 = vadd.f32 %v5344_v59, %v3187_v24 }
0x1cdb   : > { %v3201_v17 = vpack.c.bf16 %v3195_v25, %v3194_v21 }
0x1cdd   : > { %5909 = vmatmul.mubr.msk.bf16.vlgmr.msra.gmra.mxu0 %vm777_vm3, %v3201_v17 }
0x1cde   : > { %5928 = vmatprep.mubr.msk.bf16.mxu0 %vm6413_vm1, %v6412_v2  ;;  %5925 = vmatpush3.bf16.msra.mxu0 %v6208_v46 }
0x1cdf   : > { %5926 = vmatprep.subr.bf16.mxu0 %v6412_v2 }
0x1ce2   : > { %5927 = vmatpush3.bf16.msra.mxu0 %v6209_v47 }
0x1ce3   : > { %5932 = vmatprep.subr.bf16.mxu0 %v6412_v2 }
0x1d9d   : > { %v3259_v62 = vpop.f32.mrf.mxu0 }
0x1d9e   : > { %v3260_v0 = vadd.f32 %v5350_v61, %v3259_v62 }
0x1d9f   : > { %v5910_v63 = vpop.f32.mrf.mxu0 }
0x1da0   : > { %v3266_v10 = vmax.f32 %v3260_v0, 0.0 }
0x1da1   : > { %v3262_v3 = vpop.f32.mrf.mxu0 }
0x1da2   : > { %v3263_v4 = vadd.f32 %v5350_v61, %v3262_v3 }
0x1da3   : > { %v5911_v9 = vpop.f32.mrf.mxu0 }
0x1da4   : > { %v3267_v12 = vmax.f32 %v3263_v4, 0.0 }
0x1da6   : > { %v3277_v13 = vpack.c.bf16 %v3267_v12, %v3266_v10 }
0x1da8   : > { %5921 = vmatmul.mubr.msk.bf16.vlgmr.msra.gmra.mxu1 %vm1991_vm12, %v3277_v13 }
0x1da9   : > { %5940 = vmatprep.mubr.msk.bf16.mxu1 %vm6413_vm1, %v6412_v2 }
0x1e68   : > { %v3347_v16 = vpop.f32.mrf.mxu1 }
0x1e69   : > { %v3348_v19 = vadd.f32 %v5363_v15, %v3347_v16 }
0x1e6a   : > { %v5922_v22 = vpop.f32.mrf.mxu1 }
0x1e6b   : > { %v3354_v23 = vadd.f32 %v3348_v19, %v3194_v21 }
0x1e6c   : > { %v3350_v29 = vpop.f32.mrf.mxu1 }
0x1e6d   : > { %v3351_v30 = vadd.f32 %v5363_v15, %v3350_v29  ;;  %v3360_v28 = vsel %vm777_vm3, %v3354_v23, 0.0 }
0x1e6e   : > { %3361 = vadd.xlane.f32.xlu1 %v3360_v28  ;;  %v5923_v11 = vpop.f32.mrf.mxu1  ;;  %v5379_v28 = vld [vmem:[%s7612_s10 + $0x2] ss:$0 sm:$0xff] }
0x1e6f   : > { %v3355_v32 = vadd.f32 %v3351_v30, %v3195_v25 }
0x1e71   : > { %v3363_v34 = vsel %vm777_vm3, %v3355_v32, 0.0 }
0x1e72   : > { %3364 = vadd.xlane.f32.xlu0 %v3363_v34 }
0x1ef7   : > { %v3362_v35 = vpop.xlane.xlu1 %3361 }
0x1ef8   : > { %v3366_v36 = vmul.f32 0.03125, %v3362_v35 }
0x1efa   : > { %v3368_v37 = vsub.f32 %v3354_v23, %v3366_v36 }
0x1efb   : > { %v3365_v39 = vpop.xlane.xlu0 %3364 }
0x1efc   : > { %v3367_v40 = vmul.f32 0.03125, %v3365_v39  ;;  %v3370_v41 = vmul.f32 %v3368_v37, %v3368_v37 }
0x1efe   : > { %v3369_v42 = vsub.f32 %v3355_v32, %v3367_v40  ;;  %v3372_v44 = vsel %vm777_vm3, %v3370_v41, 0.0 }
0x1eff   : > { %3373 = vadd.xlane.f32.xlu1 %v3372_v44 }
0x1f00   : > { %v3371_v43 = vmul.f32 %v3369_v42, %v3369_v42 }
0x1f02   : > { %v3375_v45 = vsel %vm777_vm3, %v3371_v43, 0.0 }
0x1f03   : > { %3376 = vadd.xlane.f32.xlu0 %v3375_v45 }
0x1f10   : > { %3405 = vperm.xlu1 %6186, %v3402_v27  }
0x1f19   : > { %3431 = vperm.xlu0 %6187, %v5373_v31  }
0x1f88   : > { %v3374_v7 = vpop.xlane.xlu1 %3373 }
0x1f89   : > { %v3378_v48 = vmul.f32 0.03125, %v3374_v7  ;;  %v3436_v7 = vld [vmem:[%s686_s8] sm:$0x1] }
0x1f8a   : > { %vm3565_vm14 = vcmp.gt.f32.partialorder %v3436_v7, 0.0 }
0x1f8b   : > { %v3380_v51 = vadd.f32 1e-05, %v3378_v48  ;;  %v3566_v48 = vsel %vm3565_vm14, 1, %v6415_v33 }
0x1f8c   : > { %v3377_v8 = vpop.xlane.xlu0 %3376  ;;  %v3406_v6 = vpop.permute.xlu1 %3405 }
0x1f8d   : > { %6306 = vrsqrt.f32 %v3380_v51  ;;  %v3379_v49 = vmul.f32 0.03125, %v3377_v8  ;;  %v3570_v51 = vrot.slane %v3566_v48, %v6663_v38 }
0x1f8f   : > { %v3381_v50 = vadd.f32 1e-05, %v3379_v49  ;;  %vm7257_vm15 = vcmp.eq.s32.totalorder %v3570_v51, 1 }
0x1f91   : > { %6308 = vrsqrt.f32 %v3381_v50 }
0x1f94   : > { %v3432_v0 = vpop.permute.xlu0 %3431 }
0x1f9a   : > { %v6307_v52 = vpop.eup %6306 }
0x1f9b   : > { %v3384_v20 = vmul.f32 %v6307_v52, %v3368_v37 }
0x1f9d   : > { %v3392_v1 = vmul.f32 %v5371_v53, %v3384_v20 }
0x1f9e   : > { %v6309_v5 = vpop.eup %6308 }
0x1f9f   : > { %v3400_v54 = vadd.f32 %v5372_v14, %v3392_v1  ;;  %v3385_v55 = vmul.f32 %v6309_v5, %v3369_v42 }
0x1fa1   : > { %v3393_v56 = vmul.f32 %v5371_v53, %v3385_v55  ;;  %v3408_v57 = vmul.f32 %v3406_v6, %v3400_v54 }
0x1fa3   : > { %v3401_v58 = vadd.f32 %v5372_v14, %v3393_v56  ;;  %v3410_v59 = vsel %vm777_vm3, %v3408_v57, 0.0 }
0x1fa4   : > { %v3411_v24 = vrot.slane %v3410_v59, 4 }
0x1fa5   : > { %v3409_v21 = vmul.f32 %v3406_v6, %v3401_v58 }
0x1fa6   : > { %v3412_v25 = vadd.f32 %v3411_v24, %v3410_v59 }
0x1fa7   : > { %v3417_v17 = vsel %vm777_vm3, %v3409_v21, 0.0 }
0x1fa8   : > { %v3413_v26 = vrot.slane %v3412_v25, 2  ;;  %v3418_v60 = vrot.slane %v3417_v17, 4 }
0x1faa   : > { %v3419_v18 = vadd.f32 %v3418_v60, %v3417_v17  ;;  %v3414_v61 = vadd.f32 %v3413_v26, %v3412_v25 }
0x1fac   : > { %v3420_v62 = vrot.slane %v3419_v18, 2  ;;  %v3415_v63 = vrot.slane %v3414_v61, 1 }
0x1fae   : > { %v3416_v3 = vadd.f32 %v3415_v63, %v3414_v61  ;;  %v3421_v4 = vadd.f32 %v3420_v62, %v3419_v18 }
0x1fb0   : > { %v3422_v9 = vrot.slane %v3421_v4, 1  ;;  %v3434_v10 = vadd.f32 %v3432_v0, %v3416_v3 }
0x1fb2   : > { %v3423_v12 = vadd.f32 %v3422_v9, %v3421_v4  ;;  %v3442_v15 = vpack.c.bf16 %v3434_v10, %v3434_v10 }
0x1fb4   : > { %v3435_v13 = vadd.f32 %v3432_v0, %v3423_v12  ;;  %v3454_v22 = vunpack.c.l.b16 %v3442_v15 }
0x1fb6   : > { %v3443_v16 = vpack.c.bf16 %v3435_v13, %v3435_v13  ;;  %v7206_v19 = vsel %vm3456_vm13, %v3435_v13, %v3434_v10 }
0x1fb8   : > { %v3455_v23 = vunpack.c.l.b16 %v3443_v16 }
0x1fba   : > { %v3457_v29 = vsel %vm3456_vm13, %v3455_v23, %v3454_v22 }
0x1fbb   : > { %v3458_v30 = vpack.c.b16 %v3457_v29, %v3457_v29 }
0x1fbd   : > { %5929 = vmatmul.mubr.msk.bf16.vlgmr.msra.gmra.mxu0 %vm777_vm3, %v3458_v30 }
0x1fbe   : > { %5934 = vmatprep.mubr.msk.bf16.mxu0 %vm6413_vm1, %v6412_v2 }
0x207d   : > { %v3508_v11 = vpop.f32.mrf.mxu0 }
0x207e   : > { %v3509_v32 = vadd.f32 %v5379_v28, %v3508_v11 }
0x207f   : > { %v5930_v34 = vpop.f32.mrf.mxu0 }
0x2080   : > { %v7214_v35 = vpack.c.bf16 %v3509_v32, %v3509_v32 }
0x2081   : > { %v3511_v36 = vpop.f32.mrf.mxu0 }
0x2082   : > { %3516 = vrot.lane.b32.xlu1 %v7214_v35, %s7713_s28 }
0x2083   : > { %v5931_v37 = vpop.f32.mrf.mxu0 }
0x2086   : > { %3638 = vrot.lane.b32.xlu1 %v7214_v35, %s7700_s29 }
0x208a   : > { %3636 = vrot.lane.b32.xlu1 %v7214_v35, %s7701_s4 }
0x208e   : > { %3750 = vrot.lane.b32.xlu1 %v7214_v35, %s7703_s1 }
0x2092   : > { %3748 = vrot.lane.b32.xlu1 %v7214_v35, %s7704_s3 }
0x2096   : > { %3862 = vrot.lane.b32.xlu1 %v7214_v35, %s7706_s0 }
0x209a   : > { %3860 = vrot.lane.b32.xlu1 %v7214_v35, %s7707_s24 }
0x20f4   : > { %v3517_v39 = vpop.permute.xlu1 %3516 }
0x20f5   : > { %v3522_v40 = vsel %vm827_vm4, %v3517_v39, 0 }
0x20f6   : > { %5933 = vmatpush3.bf16.xpose.msra.mxu0 %v3522_v40 }
0x20f7   : > { %5944 = vmatprep.subr.bf16.mxu0 %v6412_v2 }
0x20f8   : > { %v3639_v41 = vpop.permute.xlu1 %3638 }
0x20f9   : > { %v3644_v44 = vsel %vm827_vm4, %v3639_v41, 0 }
0x20fc   : > { %v3637_v42 = vpop.permute.xlu1 %3636 }
0x20fd   : > { %5935 = vmatmul.mubr.msk.bf16.vlgmr.msra.gmra.mxu0 %vm827_vm4, %v7214_v35 }
0x20fe   : > { %5945 = vmatpush3.bf16.xpose.msra.mxu0 %v3644_v44  ;;  %5946 = vmatprep.mubr.msk.bf16.mxu0 %vm6413_vm1, %v6412_v2 }
0x20ff   : > { %5956 = vmatprep.subr.bf16.mxu0 %v6412_v2 }
0x2100   : > { %v3751_v43 = vpop.permute.xlu1 %3750 }
0x2101   : > { %v3756_v27 = vsel %vm827_vm4, %v3751_v43, 0 }
0x2104   : > { %v3749_v45 = vpop.permute.xlu1 %3748 }
0x2105   : > { %5947 = vmatmul.mubr.msk.bf16.vlgmr.msra.gmra.mxu0 %vm827_vm4, %v3637_v42 }
0x2106   : > { %5957 = vmatpush3.bf16.xpose.msra.mxu0 %v3756_v27  ;;  %5958 = vmatprep.mubr.msk.bf16.mxu0 %vm6413_vm1, %v6412_v2 }
0x2107   : > { %5968 = vmatprep.subr.bf16.mxu0 %v6412_v2 }
0x2108   : > { %v3863_v31 = vpop.permute.xlu1 %3862 }
0x2109   : > { %v3868_v46 = vsel %vm827_vm4, %v3863_v31, 0 }
0x210c   : > { %v3861_v47 = vpop.permute.xlu1 %3860 }
0x210d   : > { %5959 = vmatmul.mubr.msk.bf16.vlgmr.msra.gmra.mxu0 %vm827_vm4, %v3749_v45 }
0x210e   : > { %5969 = vmatpush3.bf16.xpose.msra.mxu0 %v3868_v46  ;;  %5970 = vmatprep.mubr.msk.bf16.mxu0 %vm6413_vm1, %v6412_v2 }
0x210f   : > { %5980 = vmatprep.subr.bf16.mxu0 %v6412_v2 }
0x2115   : > { %5971 = vmatmul.mubr.msk.bf16.vlgmr.msra.gmra.mxu0 %vm827_vm4, %v3861_v47 }
0x2116   : > { %5984 = vmatprep.mubr.msk.bf16.mxu0 %vm6413_vm1, %v6412_v2 }
0x21bd   : > { %v3558_v8 = vpop.f32.mrf.mxu0 }
0x21be   : > { %v3564_v50 = vmul.f32 0.35355338, %v3558_v8 }
0x21bf   : > { %v5936_v52 = vpop.f32.mrf.mxu0 }
0x21c0   : > { %v3572_v53 = vsel %vm7257_vm15, %v3564_v50, -1e+09 }
0x21c1   : > { %v3561_v20 = vpop.f32.mrf.mxu0  ;;  %v3574_v14 = vsel %vm3573_vm0, %v3572_v53, -inf }
0x21c2   : > { %3575 = vmax.xlane.f32.xlu1 %v3574_v14 }
0x21c3   : > { %v5937_v1 = vpop.f32.mrf.mxu0 }
0x21c5   : > { %v3680_v5 = vpop.f32.mrf.mxu0 }
0x21c6   : > { %v3686_v33 = vmul.f32 0.35355338, %v3680_v5 }
0x21c7   : > { %v5948_v6 = vpop.f32.mrf.mxu0 }
0x21c8   : > { %v3687_v38 = vsel %vm7257_vm15, %v3686_v33, -1e+09 }
0x21c9   : > { %v3683_v54 = vpop.f32.mrf.mxu0  ;;  %v3688_v55 = vsel %vm3573_vm0, %v3687_v38, -inf }
0x21ca   : > { %3689 = vmax.xlane.f32.xlu0 %v3688_v55 }
0x21cb   : > { %v5949_v56 = vpop.f32.mrf.mxu0 }
0x21cd   : > { %v3792_v57 = vpop.f32.mrf.mxu0 }
0x21ce   : > { %v3798_v58 = vmul.f32 0.35355338, %v3792_v57 }
0x21cf   : > { %v5960_v59 = vpop.f32.mrf.mxu0 }
0x21d0   : > { %v3799_v24 = vsel %vm7257_vm15, %v3798_v58, -1e+09 }
0x21d1   : > { %v3795_v21 = vpop.f32.mrf.mxu0  ;;  %v3800_v25 = vsel %vm3573_vm0, %v3799_v24, -inf }
0x21d2   : > { %3801 = vmax.xlane.f32.xlu0 %v3800_v25  ;;  %v6210_v25 = vld [vmem:[%s7613_s11 + $0x28] sm:$0xff]  }
0x21d3   : > { %v5961_v17 = vpop.f32.mrf.mxu0  ;;  %5981 = vmatpush3.bf16.msra.mxu0 %v6210_v25 }
0x21d4   : > { %5982 = vmatprep.subr.bf16.mxu0 %v6412_v2  ;;  %v6211_v17 = vld [vmem:[%s7613_s11 + $0x20] sm:$0xff]  }
0x21d5   : > { %v3904_v26 = vpop.f32.mrf.mxu0 }
0x21d6   : > { %v3910_v60 = vmul.f32 0.35355338, %v3904_v26 }
0x21d7   : > { %v5972_v18 = vpop.f32.mrf.mxu0  ;;  %5983 = vmatpush3.bf16.msra.mxu0 %v6211_v17 }
0x21d8   : > { %v3911_v61 = vsel %vm7257_vm15, %v3910_v60, -1e+09  ;;  %5996 = vmatprep.subr.bf16.mxu0 %v6412_v2 }
0x21d9   : > { %v3907_v62 = vpop.f32.mrf.mxu0  ;;  %v3912_v63 = vsel %vm3573_vm0, %v3911_v61, -inf }
0x21da   : > { %3913 = vmax.xlane.f32.xlu1 %v3912_v63 }
0x21db   : > { %v5973_v0 = vpop.f32.mrf.mxu0 }
0x224b   : > { %v3576_v3 = vpop.xlane.xlu1 %3575 }
0x224c   : > { %v3577_v4 = vsub.f32 %v3572_v53, %v3576_v3 }
0x224e   : > { %v3578_v9 = vmul.f32 1.442695, %v3577_v4 }
0x2250   : > { %6310 = vpow2.f32 %v3578_v9 }
0x2253   : > { %v3690_v10 = vpop.xlane.xlu0 %3689 }
0x2254   : > { %v3691_v12 = vsub.f32 %v3687_v38, %v3690_v10 }
0x2256   : > { %v3692_v13 = vmul.f32 1.442695, %v3691_v12 }
0x2258   : > { %6312 = vpow2.f32 %v3692_v13 }
0x225b   : > { %v3802_v15 = vpop.xlane.xlu0 %3801 }
0x225c   : > { %v3803_v16 = vsub.f32 %v3799_v24, %v3802_v15 }
0x225d   : > { %v6311_v22 = vpop.eup %6310 }
0x225e   : > { %v3804_v23 = vmul.f32 1.442695, %v3803_v16  ;;  %v3580_v29 = vsel %vm3573_vm0, %v6311_v22, 0.0 }
0x225f   : > { %3581 = vadd.xlane.f32.xlu0 %v3580_v29 }
0x2260   : > { %6314 = vpow2.f32 %v3804_v23 }
0x2263   : > { %v3914_v34 = vpop.xlane.xlu1 %3913 }
0x2264   : > { %v3915_v36 = vsub.f32 %v3911_v61, %v3914_v34 }
0x2265   : > { %v6313_v30 = vpop.eup %6312 }
0x2266   : > { %v3694_v28 = vsel %vm3573_vm0, %v6313_v30, 0.0  ;;  %v3916_v37 = vmul.f32 1.442695, %v3915_v36 }
0x2267   : > { %3695 = vadd.xlane.f32.xlu1 %v3694_v28 }
0x2268   : > { %6316 = vpow2.f32 %v3916_v37 }
0x226d   : > { %v6315_v11 = vpop.eup %6314 }
0x226e   : > { %v3806_v32 = vsel %vm3573_vm0, %v6315_v11, 0.0 }
0x226f   : > { %3807 = vadd.xlane.f32.xlu0 %v3806_v32 }
0x2275   : > { %v6317_v39 = vpop.eup %6316 }
0x2276   : > { %v3918_v40 = vsel %vm3573_vm0, %v6317_v39, 0.0 }
0x2278   : > { %3700 = vrot.lane.b32.xlu1 %v7214_v35, %s7702_s30 }
0x2285   : > { %3586 = vrot.lane.b32.xlu0 %v7214_v35, %s7717_s25 }
0x2289   : > { %3924 = vrot.lane.b32.xlu0 %v7214_v35, %s7708_s2 }
0x229c   : > { %3919 = vadd.xlane.f32.xlu1 %v3918_v40 }
0x22ad   : > { %3812 = vrot.lane.b32.xlu1 %v7214_v35, %s7705_s5 }
0x22e8   : > { %v3582_v41 = vpop.xlane.xlu0 %3581 }
0x22e9   : > { %6318 = vrcp.f32 %v3582_v41 }
0x22f0   : > { %v3696_v42 = vpop.xlane.xlu1 %3695 }
0x22f1   : > { %6320 = vrcp.f32 %v3696_v42  ;;  %v6212_v42 = vld [vmem:[%s7617_s15 + $0x28] sm:$0xff]  }
0x22f4   : > { %v3701_v46 = vpop.permute.xlu1 %3700 }
0x22f5   : > { %v3706_v35 = vsel %vm3592_vm2, %v3701_v46, 0 }
0x22f6   : > { %v6319_v44 = vpop.eup %6318 }
0x22f7   : > { %v3584_v45 = vmul.f32 %v6319_v44, %v6311_v22  ;;  %v5396_v22 = vld [vmem:[%s7718_s12 + $0x2] ss:$0 sm:$0xff]  ;;  %v6214_v44 = vld [vmem:[%s7619_s17 + $0x58] sm:$0xff]  }
0x22f8   : > { %v3808_v43 = vpop.xlane.xlu0 %3807 }
0x22f9   : > { %v3585_v47 = vpack.c.bf16 %v3584_v45, %v3584_v45  ;;  %6322 = vrcp.f32 %v3808_v43  ;;  %v6215_v43 = vld [vmem:[%s7619_s17 + $0x50] sm:$0xff]  }
0x22fc   : > { %v3587_v27 = vpop.permute.xlu0 %3586 }
0x22fd   : > { %v3594_v31 = vsel %vm3592_vm2, %v3587_v27, 0 }
0x22fe   : > { %5939 = vmatpush3.bf16.msra.mxu1 %v3594_v31  ;;  %v6321_v7 = vpop.eup %6320 }
0x22ff   : > { %5950 = vmatprep.subr.bf16.mxu1 %v6412_v2  ;;  %v3698_v48 = vmul.f32 %v6321_v7, %v6313_v30 }
0x2300   : > { %v3925_v14 = vpop.permute.xlu0 %3924 }
0x2301   : > { %5941 = vmatmul.mubr.msk.bf16.vlgmr.msra.gmra.mxu1 %vm3588_vm5, %v3585_v47  ;;  %v3699_v51 = vpack.c.bf16 %v3698_v48, %v3698_v48  ;;  %v3930_v5 = vsel %vm3592_vm2, %v3925_v14, 0  ;;  %v5402_v47 = vld [vmem:[%s7615_s13 + $0x2] ss:$0 sm:$0xff] }
0x2302   : > { %5951 = vmatpush3.bf16.msra.mxu1 %v3706_v35  ;;  %5952 = vmatprep.mubr.msk.bf16.mxu1 %vm6413_vm1, %v6412_v2  ;;  %v5403_v35 = vld [vmem:[%s7719_s22 + $0x2] ss:$0 sm:$0xff] }
0x2303   : > { %5962 = vmatprep.subr.bf16.mxu1 %v6412_v2 }
0x2306   : > { %v6323_v8 = vpop.eup %6322 }
0x2307   : > { %v3810_v52 = vmul.f32 %v6323_v8, %v6315_v11 }
0x2309   : > { %5953 = vmatmul.mubr.msk.bf16.vlgmr.msra.gmra.mxu1 %vm3588_vm5, %v3699_v51  ;;  %v3811_v1 = vpack.c.bf16 %v3810_v52, %v3810_v52  ;;  %v6217_v52 = vld [vmem:[%s7619_s17 + $0x40] sm:$0xff]  }
0x230a   : > { %5964 = vmatprep.mubr.msk.bf16.mxu1 %vm6413_vm1, %v6412_v2 }
0x2325   : > { %v3920_v50 = vpop.xlane.xlu1 %3919 }
0x2326   : > { %6324 = vrcp.f32 %v3920_v50  ;;  %v6216_v50 = vld [vmem:[%s7619_s17 + $0x48] sm:$0xff]  }
0x2329   : > { %v3813_v53 = vpop.permute.xlu1 %3812 }
0x232a   : > { %v3818_v20 = vsel %vm3592_vm2, %v3813_v53, 0  ;;  %v5409_v53 = vld [vmem:[%s7618_s16 + $0x2] ss:$0 sm:$0xff] }
0x232b   : > { %5963 = vmatpush3.bf16.msra.mxu1 %v3818_v20 }
0x232c   : > { %5974 = vmatprep.subr.bf16.mxu1 %v6412_v2 }
0x232e   : > { %5965 = vmatmul.mubr.msk.bf16.vlgmr.msra.gmra.mxu1 %vm3588_vm5, %v3811_v1 }
0x232f   : > { %5975 = vmatpush3.bf16.msra.mxu1 %v3930_v5  ;;  %5976 = vmatprep.mubr.msk.bf16.mxu1 %vm6413_vm1, %v6412_v2 }
0x2330   : > { %5988 = vmatprep.subr.bf16.mxu1 %v6412_v2 }
0x2333   : > { %v6325_v33 = vpop.eup %6324 }
0x2334   : > { %v3922_v6 = vmul.f32 %v6325_v33, %v6317_v39 }
0x2336   : > { %v3923_v38 = vpack.c.bf16 %v3922_v6, %v3922_v6 }
0x2338   : > { %5977 = vmatmul.mubr.msk.bf16.vlgmr.msra.gmra.mxu1 %vm3588_vm5, %v3923_v38 }
0x2339   : > { %5992 = vmatprep.mubr.msk.bf16.mxu1 %vm6413_vm1, %v6412_v2  ;;  %5989 = vmatpush3.bf16.msra.mxu1 %v6212_v42 }
0x233a   : > { %5990 = vmatprep.subr.bf16.mxu1 %v6412_v2 }
0x23c1   : > { %v3630_v54 = vpop.f32.mrf.mxu1 }
0x23c3   : > { %v5942_v55 = vpop.f32.mrf.mxu1 }
0x23c5   : > { %v3633_v56 = vpop.f32.mrf.mxu1 }
0x23c7   : > { %v5943_v57 = vpop.f32.mrf.mxu1 }
0x23c9   : > { %v3742_v58 = vpop.f32.mrf.mxu1 }
0x23ca   : > { %3973 = vrot.lane.b32.xlu1 %v3742_v58, %s7709_s23 }
0x23cb   : > { %v5954_v59 = vpop.f32.mrf.mxu1 }
0x23cd   : > { %v3745_v24 = vpop.f32.mrf.mxu1 }
0x23cf   : > { %v5955_v21 = vpop.f32.mrf.mxu1 }
0x23ee   : > { %v3854_v26 = vpop.f32.mrf.mxu1 }
0x23ef   : > { %3977 = vrot.lane.b32.xlu0 %v3854_v26, %s7710_s26 }
0x23f0   : > { %v5966_v60 = vpop.f32.mrf.mxu1 }
0x23f2   : > { %v3857_v18 = vpop.f32.mrf.mxu1 }
0x23f4   : > { %v5967_v61 = vpop.f32.mrf.mxu1 }
0x23f5   : > { %v6218_v61 = vld [vmem:[%s7611_s9 + $0x38] sm:$0xff]  }
0x23f8   : > { %v3966_v62 = vpop.f32.mrf.mxu1 }
0x23f9   : > { %3981 = vrot.lane.b32.xlu1 %v3966_v62, %s7711_s27  ;;  %v6219_v62 = vld [vmem:[%s7611_s9 + $0x30] sm:$0xff]  }
0x23fa   : > { %v5978_v63 = vpop.f32.mrf.mxu1 }
0x23fc   : > { %v3969_v0 = vpop.f32.mrf.mxu1 }
0x23fe   : > { %v5979_v3 = vpop.f32.mrf.mxu1 }
0x243c   : > { %v3974_v4 = vpop.permute.xlu1 %3973 }
0x243d   : > { %v3984_v10 = vsel %vm827_vm4, %v3630_v54, %v3974_v4  ;;  %v5422_v54 = vld [vmem:[%s7620_s18 + $0x2] ss:$0 sm:$0xff] }
0x2461   : > { %v3978_v9 = vpop.permute.xlu0 %3977 }
0x2462   : > { %v3985_v12 = vsel %vm1760_vm10, %v3984_v10, %v3978_v9  ;;  %v5430_v9 = vld [vmem:[%s7621_s19 + $0x2] ss:$0 sm:$0xff] }
0x246b   : > { %v3982_v13 = vpop.permute.xlu1 %3981 }
0x246c   : > { %v3986_v15 = vsel %vm1763_vm11, %v3985_v12, %v3982_v13  ;;  %v5431_v12 = vld [vmem:[%s7622_s20 + $0x2] ss:$0 sm:$0xff] }
0x246d   : > { %v3992_v16 = vpack.c.bf16 %v3986_v15, %v3986_v15 }
0x246f   : > { %5985 = vmatmul.mubr.msk.bf16.vlgmr.msra.gmra.mxu0 %vm777_vm3, %v3992_v16 }
0x2470   : > { %6004 = vmatprep.mubr.msk.bf16.mxu0 %vm6413_vm1, %v6412_v2  ;;  %5997 = vmatpush3.bf16.msra.mxu0 %v6214_v44 }
0x2471   : > { %5998 = vmatprep.subr.bf16.mxu0 %v6412_v2 }
0x2474   : > { %5999 = vmatpush3.bf16.msra.mxu0 %v6215_v43 }
0x2475   : > { %6000 = vmatprep.subr.bf16.mxu0 %v6412_v2 }
0x2478   : > { %6001 = vmatpush3.bf16.msra.mxu0 %v6216_v50 }
0x2479   : > { %6002 = vmatprep.subr.bf16.mxu0 %v6412_v2 }
0x247c   : > { %6003 = vmatpush3.bf16.msra.mxu0 %v6217_v52 }
0x247d   : > { %6022 = vmatprep.subr.bf16.mxu0 %v6412_v2 }
0x252f   : > { %v4050_v23 = vpop.f32.mrf.mxu0 }
0x2530   : > { %v4051_v29 = vadd.f32 %v5396_v22, %v4050_v23  ;;  %v5437_v22 = vld [vmem:[%s7612_s10 + $0x3] ss:$0 sm:$0xff] }
0x2531   : > { %v5986_v30 = vpop.f32.mrf.mxu0 }
0x2532   : > { %v4060_v28 = vadd.f32 %v7206_v19, %v4051_v29  ;;  %v6213_v19 = vld [vmem:[%s7617_s15 + $0x20] sm:$0xff]  }
0x2533   : > { %v4053_v11 = vpop.f32.mrf.mxu0  ;;  %5991 = vmatpush3.bf16.msra.mxu1 %v6213_v19 }
0x2534   : > { %v4066_v32 = vsel %vm4065_vm6, %v4060_v28, 0.0  ;;  %6008 = vmatprep.subr.bf16.mxu1 %v6412_v2 }
0x2535   : > { %4067 = vadd.xlane.f32.xlu0 %v4066_v32  ;;  %v5987_v34 = vpop.f32.mrf.mxu0 }
0x25be   : > { %v4068_v36 = vpop.xlane.xlu0 %4067 }
0x25bf   : > { %v4069_v37 = vmul.f32 0.03125, %v4068_v36 }
0x25c1   : > { %v4070_v39 = vsub.f32 %v4060_v28, %v4069_v37 }
0x25c3   : > { %v4071_v40 = vmul.f32 %v4070_v39, %v4070_v39 }
0x25c5   : > { %v4072_v41 = vsel %vm4065_vm6, %v4071_v40, 0.0 }
0x25c6   : > { %4073 = vadd.xlane.f32.xlu1 %v4072_v41 }
0x264f   : > { %v4074_v45 = vpop.xlane.xlu1 %4073 }
0x2650   : > { %v4075_v27 = vmul.f32 0.03125, %v4074_v45 }
0x2652   : > { %v4076_v31 = vadd.f32 1e-05, %v4075_v27 }
0x2654   : > { %6326 = vrsqrt.f32 %v4076_v31 }
0x2661   : > { %v6327_v46 = vpop.eup %6326 }
0x2662   : > { %v4078_v7 = vmul.f32 %v6327_v46, %v4070_v39 }
0x2664   : > { %v4085_v48 = vmul.f32 %v5402_v47, %v4078_v7 }
0x2666   : > { %v4092_v51 = vadd.f32 %v5403_v35, %v4085_v48 }
0x2668   : > { %v4098_v8 = vpack.c.bf16 %v4092_v51, %v4092_v51 }
0x266a   : > { %5993 = vmatmul.mubr.msk.bf16.vlgmr.msra.gmra.mxu1 %vm777_vm3, %v4098_v8 }
0x266b   : > { %6012 = vmatprep.mubr.msk.bf16.mxu1 %vm6413_vm1, %v6412_v2  ;;  %6009 = vmatpush3.bf16.msra.mxu1 %v6218_v61 }
0x266c   : > { %6010 = vmatprep.subr.bf16.mxu1 %v6412_v2 }
0x266f   : > { %6011 = vmatpush3.bf16.msra.mxu1 %v6219_v62 }
0x2670   : > { %6016 = vmatprep.subr.bf16.mxu1 %v6412_v2 }
0x272a   : > { %v4156_v20 = vpop.f32.mrf.mxu1 }
0x272b   : > { %v4157_v14 = vadd.f32 %v5409_v53, %v4156_v20 }
0x272c   : > { %v5994_v1 = vpop.f32.mrf.mxu1 }
0x272d   : > { %v4162_v5 = vmax.f32 %v4157_v14, 0.0 }
0x272e   : > { %v4159_v33 = vpop.f32.mrf.mxu1 }
0x272f   : > { %v4172_v6 = vpack.c.bf16 %v4162_v5, %v4162_v5 }
0x2730   : > { %v5995_v38 = vpop.f32.mrf.mxu1 }
0x2731   : > { %6005 = vmatmul.mubr.msk.bf16.vlgmr.msra.gmra.mxu0 %vm1991_vm12, %v4172_v6 }
0x2732   : > { %6024 = vmatprep.mubr.msk.bf16.mxu0 %vm6413_vm1, %v6412_v2 }
0x27f1   : > { %v4242_v55 = vpop.f32.mrf.mxu0 }
0x27f2   : > { %v4243_v56 = vadd.f32 %v5422_v54, %v4242_v55 }
0x27f3   : > { %v6006_v57 = vpop.f32.mrf.mxu0 }
0x27f4   : > { %v4248_v58 = vadd.f32 %v4243_v56, %v4092_v51 }
0x27f5   : > { %v4245_v59 = vpop.f32.mrf.mxu0 }
0x27f6   : > { %v4253_v24 = vsel %vm4065_vm6, %v4248_v58, 0.0 }
0x27f7   : > { %4254 = vadd.xlane.f32.xlu0 %v4253_v24  ;;  %v6007_v21 = vpop.f32.mrf.mxu0 }
0x2880   : > { %v4255_v25 = vpop.xlane.xlu0 %4254 }
0x2881   : > { %v4256_v17 = vmul.f32 0.03125, %v4255_v25 }
0x2883   : > { %v4257_v26 = vsub.f32 %v4248_v58, %v4256_v17 }
0x2885   : > { %v4258_v60 = vmul.f32 %v4257_v26, %v4257_v26 }
0x2887   : > { %v4259_v18 = vsel %vm4065_vm6, %v4258_v60, 0.0 }
0x2888   : > { %4260 = vadd.xlane.f32.xlu0 %v4259_v18 }
0x2911   : > { %v4261_v63 = vpop.xlane.xlu0 %4260 }
0x2912   : > { %v4262_v0 = vmul.f32 0.03125, %v4261_v63 }
0x2914   : > { %v4263_v3 = vadd.f32 1e-05, %v4262_v0 }
0x2916   : > { %6328 = vrsqrt.f32 %v4263_v3 }
0x2923   : > { %v6329_v4 = vpop.eup %6328 }
0x2924   : > { %v4265_v10 = vmul.f32 %v6329_v4, %v4257_v26 }
0x2926   : > { %v4272_v13 = vmul.f32 %v5430_v9, %v4265_v10 }
0x2928   : > { %v7386_v15 = vadd.f32 %v5431_v12, %v4272_v13 }
0x292a   : > { %v4285_v16 = vpack.c.bf16 %v7386_v15, %v7386_v15 }
0x292c   : > { %6013 = vmatmul.mubr.msk.bf16.vlgmr.msra.gmra.mxu1 %vm777_vm3, %v4285_v16 }
0x292d   : > { %6018 = vmatprep.mubr.msk.bf16.mxu1 %vm6413_vm1, %v6412_v2 }
0x29ec   : > { %v4343_v23 = vpop.f32.mrf.mxu1 }
0x29ed   : > { %v4344_v29 = vadd.f32 %v5437_v22, %v4343_v23 }
0x29ee   : > { %v6014_v30 = vpop.f32.mrf.mxu1 }
0x29ef   : > { %v7396_v28 = vpack.c.bf16 %v4344_v29, %v4344_v29 }
0x29f0   : > { %v4346_v11 = vpop.f32.mrf.mxu1 }
0x29f1   : > { %4463 = vrot.lane.b32.xlu0 %v7396_v28, %s7700_s29  ;;  %4351 = vrot.lane.b32.xlu1 %v7396_v28, %s7713_s28 }
0x29f2   : > { %v6015_v32 = vpop.f32.mrf.mxu1 }
0x29f5   : > { %4573 = vrot.lane.b32.xlu0 %v7396_v28, %s7704_s3  ;;  %4461 = vrot.lane.b32.xlu1 %v7396_v28, %s7701_s4  ;;  %s6429_s3 = smov [#allocation3]  }
0x29f9   : > { %4685 = vrot.lane.b32.xlu0 %v7396_v28, %s7707_s24  ;;  %4575 = vrot.lane.b32.xlu1 %v7396_v28, %s7703_s1  ;;  %s7721_s1 = sld [smem:[#allocation23_spill]]  ;;  %s674_s24 = scalar_lea.vmem [#allocation3], %s673_s21 }
0x29fa   : > { %s5184_s29 = sshll.u32 %s674_s24, 4  ;;  %s7563_s29 = int_to_ptr.vmem [resolvable:$true] %s5184_s29 }
0x29fd   : > { %4687 = vrot.lane.b32.xlu1 %v7396_v28, %s7706_s0  ;;  %s6354_s0 = sshll.u32 %s6429_s3, 4  ;;  %s6355_s0 = int_to_ptr.vmem [resolvable:$false] %s6354_s0 }
0x29fe   : > { %s6356_s28 = scalar_lea.vmem %s6355_s0, 32  ;;  %p6357_p0 = scmp.lt.s32.totalorder %s7563_s29, %s6355_s0 }
0x2a63   : > { %v4352_v34 = vpop.permute.xlu1 %4351  ;;  %v4464_v37 = vpop.permute.xlu0 %4463 }
0x2a64   : > { %v4357_v36 = vsel %vm827_vm4, %v4352_v34, 0  ;;  %v4469_v40 = vsel %vm827_vm4, %v4464_v37, 0 }
0x2a65   : > { %6017 = vmatpush3.bf16.xpose.msra.mxu1 %v4357_v36 }
0x2a66   : > { %6028 = vmatprep.subr.bf16.mxu1 %v6412_v2 }
0x2a67   : > { %v4462_v39 = vpop.permute.xlu1 %4461  ;;  %v4574_v44 = vpop.permute.xlu0 %4573 }
0x2a6b   : > { %v4576_v41 = vpop.permute.xlu1 %4575  ;;  %v4686_v45 = vpop.permute.xlu0 %4685 }
0x2a6c   : > { %6019 = vmatmul.mubr.msk.bf16.vlgmr.msra.gmra.mxu1 %vm827_vm4, %v7396_v28  ;;  %v4581_v42 = vsel %vm827_vm4, %v4576_v41, 0 }
0x2a6d   : > { %6029 = vmatpush3.bf16.xpose.msra.mxu1 %v4469_v40  ;;  %6030 = vmatprep.mubr.msk.bf16.mxu1 %vm6413_vm1, %v6412_v2 }
0x2a6e   : > { %6040 = vmatprep.subr.bf16.mxu1 %v6412_v2 }
0x2a6f   : > { %v4688_v19 = vpop.permute.xlu1 %4687 }
0x2a70   : > { %v4693_v43 = vsel %vm827_vm4, %v4688_v19, 0 }
0x2a74   : > { %6031 = vmatmul.mubr.msk.bf16.vlgmr.msra.gmra.mxu1 %vm827_vm4, %v4462_v39 }
0x2a75   : > { %6041 = vmatpush3.bf16.xpose.msra.mxu1 %v4581_v42  ;;  %6042 = vmatprep.mubr.msk.bf16.mxu1 %vm6413_vm1, %v6412_v2 }
0x2a76   : > { %6052 = vmatprep.subr.bf16.mxu1 %v6412_v2 }
0x2a7c   : > { %6043 = vmatmul.mubr.msk.bf16.vlgmr.msra.gmra.mxu1 %vm827_vm4, %v4574_v44 }
0x2a7d   : > { %6053 = vmatpush3.bf16.xpose.msra.mxu1 %v4693_v43  ;;  %6054 = vmatprep.mubr.msk.bf16.mxu1 %vm6413_vm1, %v6412_v2 }
0x2a7e   : > { %6064 = vmatprep.subr.bf16.mxu1 %v6412_v2 }
0x2a84   : > { %6055 = vmatmul.mubr.msk.bf16.vlgmr.msra.gmra.mxu1 %vm827_vm4, %v4686_v45 }
0x2a85   : > { %6068 = vmatprep.mubr.msk.bf16.mxu1 %vm6413_vm1, %v6412_v2 }
0x2b2c   : > { %v4393_v27 = vpop.f32.mrf.mxu1 }
0x2b2d   : > { %v4399_v31 = vmul.f32 0.35355338, %v4393_v27 }
0x2b2e   : > { %v6020_v46 = vpop.f32.mrf.mxu1 }
0x2b2f   : > { %v4400_v47 = vsel %vm7257_vm15, %v4399_v31, -1e+09 }
0x2b30   : > { %v4396_v7 = vpop.f32.mrf.mxu1  ;;  %v4401_v35 = vsel %vm3573_vm0, %v4400_v47, -inf }
0x2b31   : > { %4402 = vmax.xlane.f32.xlu1 %v4401_v35 }
0x2b32   : > { %v6021_v48 = vpop.f32.mrf.mxu1 }
0x2b34   : > { %v4505_v51 = vpop.f32.mrf.mxu1 }
0x2b35   : > { %v4511_v8 = vmul.f32 0.35355338, %v4505_v51 }
0x2b36   : > { %v6032_v50 = vpop.f32.mrf.mxu1 }
0x2b37   : > { %v4512_v52 = vsel %vm7257_vm15, %v4511_v8, -1e+09 }
0x2b38   : > { %v4508_v53 = vpop.f32.mrf.mxu1  ;;  %v4513_v20 = vsel %vm3573_vm0, %v4512_v52, -inf }
0x2b39   : > { %4514 = vmax.xlane.f32.xlu0 %v4513_v20 }
0x2b3a   : > { %v6033_v14 = vpop.f32.mrf.mxu1 }
0x2b3c   : > { %v4617_v1 = vpop.f32.mrf.mxu1 }
0x2b3d   : > { %v4623_v5 = vmul.f32 0.35355338, %v4617_v1 }
0x2b3e   : > { %v6044_v33 = vpop.f32.mrf.mxu1 }
0x2b3f   : > { %v4624_v6 = vsel %vm7257_vm15, %v4623_v5, -1e+09 }
0x2b40   : > { %v4620_v38 = vpop.f32.mrf.mxu1  ;;  %v4625_v54 = vsel %vm3573_vm0, %v4624_v6, -inf }
0x2b41   : > { %4626 = vmax.xlane.f32.xlu0 %v4625_v54  ;;  %v6220_v38 = vld [vmem:[%s7613_s11 + $0x38] sm:$0xff]   ;;  %v6221_v54 = vld [vmem:[%s7613_s11 + $0x30] sm:$0xff]  }
0x2b42   : > { %v6045_v55 = vpop.f32.mrf.mxu1  ;;  %6065 = vmatpush3.bf16.msra.mxu1 %v6220_v38 }
0x2b43   : > { %6066 = vmatprep.subr.bf16.mxu1 %v6412_v2 }
0x2b44   : > { %v4729_v56 = vpop.f32.mrf.mxu1 }
0x2b45   : > { %v4735_v57 = vmul.f32 0.35355338, %v4729_v56 }
0x2b46   : > { %v6056_v58 = vpop.f32.mrf.mxu1  ;;  %6067 = vmatpush3.bf16.msra.mxu1 %v6221_v54 }
0x2b47   : > { %v4736_v59 = vsel %vm7257_vm15, %v4735_v57, -1e+09  ;;  %6080 = vmatprep.subr.bf16.mxu1 %v6412_v2 }
0x2b48   : > { %v4732_v24 = vpop.f32.mrf.mxu1  ;;  %v4737_v21 = vsel %vm3573_vm0, %v4736_v59, -inf }
0x2b49   : > { %4738 = vmax.xlane.f32.xlu1 %v4737_v21 }
0x2b4a   : > { %v6057_v25 = vpop.f32.mrf.mxu1 }
0x2bba   : > { %v4403_v17 = vpop.xlane.xlu1 %4402 }
0x2bbb   : > { %v4404_v26 = vsub.f32 %v4400_v47, %v4403_v17 }
0x2bbd   : > { %v4405_v60 = vmul.f32 1.442695, %v4404_v26 }
0x2bbf   : > { %6330 = vpow2.f32 %v4405_v60 }
0x2bc2   : > { %v4515_v18 = vpop.xlane.xlu0 %4514 }
0x2bc3   : > { %v4516_v61 = vsub.f32 %v4512_v52, %v4515_v18 }
0x2bc5   : > { %v4517_v62 = vmul.f32 1.442695, %v4516_v61 }
0x2bc7   : > { %6332 = vpow2.f32 %v4517_v62 }
0x2bca   : > { %v4627_v63 = vpop.xlane.xlu0 %4626 }
0x2bcb   : > { %v4628_v0 = vsub.f32 %v4624_v6, %v4627_v63 }
0x2bcc   : > { %v6331_v3 = vpop.eup %6330 }
0x2bcd   : > { %v4629_v4 = vmul.f32 1.442695, %v4628_v0  ;;  %v4407_v49 = vsel %vm3573_vm0, %v6331_v3, 0.0  ;;  %v5454_v0 = vld [vmem:[%s7721_s1 + $0x3] ss:$0 sm:$0xff]  ;;  %s6350_s1 = scalar_lea.vmem %s7563_s29, 16 }
0x2bce   : > { %4408 = vadd.xlane.f32.xlu0 %v4407_v49  ;;  %p6351_p11 = scmp.ne.s32.totalorder %s7563_s29, %s6350_s1  ;;  %p6358_p1 = scmp.lt.s32.totalorder %s6356_s28, %s6350_s1 }
0x2bcf   : > { %6334 = vpow2.f32 %v4629_v4 }
0x2bd0   : > { %p6352_p12 = pnand %p6351_p11, %p6581_p5  ;;  %p6359_p2 = por %p6358_p1, %p6357_p0 }
0x2bd2   : > { %v4739_v16 = vpop.xlane.xlu1 %4738  ;;  %p6353_p13 = pneg %p6352_p12 }
0x2bd3   : > { %v4740_v22 = vsub.f32 %v4736_v59, %v4739_v16 }
0x2bd4   : > { %v6333_v9 = vpop.eup %6332  ;;  %p6360_p3 = pnand %p6359_p2, %p6353_p13 }
0x2bd5   : > { %v4519_v10 = vsel %vm3573_vm0, %v6333_v9, 0.0  ;;  %v4741_v23 = vmul.f32 1.442695, %v4740_v22 }
0x2bd6   : > { %4520 = vadd.xlane.f32.xlu1 %v4519_v10 }
0x2bd7   : > { %6336 = vpow2.f32 %v4741_v23 }
0x2bdc   : > { %v6335_v12 = vpop.eup %6334 }
0x2bdd   : > { %v4631_v13 = vsel %vm3573_vm0, %v6335_v12, 0.0 }
0x2bde   : > { %4632 = vadd.xlane.f32.xlu0 %v4631_v13 }
0x2be4   : > { %v6337_v29 = vpop.eup %6336 }
0x2be5   : > { %v4743_v30 = vsel %vm3573_vm0, %v6337_v29, 0.0 }
0x2be7   : > { %4525 = vrot.lane.b32.xlu1 %v7396_v28, %s7702_s30  ;;  %s5172_s30 = scalar_lea.sflag [#allocation4], %s673_s21 }
0x2bf4   : > { %4413 = vrot.lane.b32.xlu0 %v7396_v28, %s7717_s25 }
0x2bf8   : > { %4749 = vrot.lane.b32.xlu0 %v7396_v28, %s7708_s2  ;;  %s5493_s2 = sshll.u32 %s7724_s14, 4 }
0x2c0b   : > { %4744 = vadd.xlane.f32.xlu1 %v4743_v30 }
0x2c1c   : > { %4637 = vrot.lane.b32.xlu1 %v7396_v28, %s7705_s5  ;;  %s7722_s5 = sld [smem:[#allocation22_spill]] }
0x2c57   : > { %v4409_v11 = vpop.xlane.xlu0 %4408 }
0x2c58   : > { %6338 = vrcp.f32 %v4409_v11  ;;  %v6222_v11 = vld [vmem:[%s7617_s15 + $0x38] sm:$0xff]  }
0x2c5f   : > { %v4521_v32 = vpop.xlane.xlu1 %4520 }
0x2c60   : > { %6340 = vrcp.f32 %v4521_v32  ;;  %v6224_v32 = vld [vmem:[%s7619_s17 + $0x78] sm:$0xff]  }
0x2c63   : > { %v4526_v41 = vpop.permute.xlu1 %4525 }
0x2c64   : > { %v4531_v44 = vsel %vm3592_vm2, %v4526_v41, 0  ;;  %v5460_v41 = vld [vmem:[%s7615_s13 + $0x3] ss:$0 sm:$0xff] }
0x2c65   : > { %v6339_v34 = vpop.eup %6338 }
0x2c66   : > { %v4411_v37 = vmul.f32 %v6339_v34, %v6331_v3  ;;  %v6225_v34 = vld [vmem:[%s7619_s17 + $0x70] sm:$0xff]  }
0x2c67   : > { %v4633_v36 = vpop.xlane.xlu0 %4632 }
0x2c68   : > { %v4412_v42 = vpack.c.bf16 %v4411_v37, %v4411_v37  ;;  %6342 = vrcp.f32 %v4633_v36 }
0x2c6b   : > { %v4414_v39 = vpop.permute.xlu0 %4413 }
0x2c6c   : > { %v4419_v40 = vsel %vm3592_vm2, %v4414_v39, 0 }
0x2c6d   : > { %6023 = vmatpush3.bf16.msra.mxu0 %v4419_v40  ;;  %v6341_v19 = vpop.eup %6340 }
0x2c6e   : > { %6034 = vmatprep.subr.bf16.mxu0 %v6412_v2  ;;  %v4523_v28 = vmul.f32 %v6341_v19, %v6333_v9  ;;  %v5461_v19 = vld [vmem:[%s7719_s22 + $0x3] ss:$0 sm:$0xff] }
0x2c6f   : > { %v4750_v7 = vpop.permute.xlu0 %4749 }
0x2c70   : > { %6025 = vmatmul.mubr.msk.bf16.vlgmr.msra.gmra.mxu0 %vm3588_vm5, %v4412_v42  ;;  %v4524_v43 = vpack.c.bf16 %v4523_v28, %v4523_v28  ;;  %v4755_v48 = vsel %vm3592_vm2, %v4750_v7, 0 }
0x2c71   : > { %6035 = vmatpush3.bf16.msra.mxu0 %v4531_v44  ;;  %6036 = vmatprep.mubr.msk.bf16.mxu0 %vm6413_vm1, %v6412_v2 }
0x2c72   : > { %6046 = vmatprep.subr.bf16.mxu0 %v6412_v2 }
0x2c75   : > { %v6343_v45 = vpop.eup %6342 }
0x2c76   : > { %v4635_v31 = vmul.f32 %v6343_v45, %v6335_v12  ;;  %v6226_v45 = vld [vmem:[%s7619_s17 + $0x68] sm:$0xff]  }
0x2c78   : > { %6037 = vmatmul.mubr.msk.bf16.vlgmr.msra.gmra.mxu0 %vm3588_vm5, %v4524_v43  ;;  %v4636_v35 = vpack.c.bf16 %v4635_v31, %v4635_v31  ;;  %v5467_v31 = vld [vmem:[%s7618_s16 + $0x3] ss:$0 sm:$0xff] }
0x2c79   : > { %6048 = vmatprep.mubr.msk.bf16.mxu0 %vm6413_vm1, %v6412_v2 }
0x2c94   : > { %v4745_v27 = vpop.xlane.xlu1 %4744 }
0x2c95   : > { %6344 = vrcp.f32 %v4745_v27  ;;  %v6227_v27 = vld [vmem:[%s7619_s17 + $0x60] sm:$0xff]  }
0x2c98   : > { %v4638_v46 = vpop.permute.xlu1 %4637 }
0x2c99   : > { %v4643_v47 = vsel %vm3592_vm2, %v4638_v46, 0 }
0x2c9a   : > { %6047 = vmatpush3.bf16.msra.mxu0 %v4643_v47 }
0x2c9b   : > { %6058 = vmatprep.subr.bf16.mxu0 %v6412_v2 }
0x2c9d   : > { %6049 = vmatmul.mubr.msk.bf16.vlgmr.msra.gmra.mxu0 %vm3588_vm5, %v4636_v35 }
0x2c9e   : > { %6059 = vmatpush3.bf16.msra.mxu0 %v4755_v48  ;;  %6060 = vmatprep.mubr.msk.bf16.mxu0 %vm6413_vm1, %v6412_v2 }
0x2c9f   : > { %6072 = vmatprep.subr.bf16.mxu0 %v6412_v2 }
0x2ca2   : > { %v6345_v51 = vpop.eup %6344 }
0x2ca3   : > { %v4747_v8 = vmul.f32 %v6345_v51, %v6337_v29 }
0x2ca5   : > { %v4748_v50 = vpack.c.bf16 %v4747_v8, %v4747_v8 }
0x2ca7   : > { %6061 = vmatmul.mubr.msk.bf16.vlgmr.msra.gmra.mxu0 %vm3588_vm5, %v4748_v50  ;;  %v5480_v50 = vld [vmem:[%s7620_s18 + $0x3] ss:$0 sm:$0xff] }
0x2ca8   : > { %6076 = vmatprep.mubr.msk.bf16.mxu0 %vm6413_vm1, %v6412_v2  ;;  %6073 = vmatpush3.bf16.msra.mxu0 %v6222_v11 }
0x2ca9   : > { %6074 = vmatprep.subr.bf16.mxu0 %v6412_v2 }
0x2d30   : > { %v4455_v52 = vpop.f32.mrf.mxu0 }
0x2d32   : > { %v6026_v53 = vpop.f32.mrf.mxu0 }
0x2d34   : > { %v4458_v20 = vpop.f32.mrf.mxu0 }
0x2d36   : > { %v6027_v14 = vpop.f32.mrf.mxu0 }
0x2d38   : > { %v4567_v1 = vpop.f32.mrf.mxu0 }
0x2d39   : > { %4798 = vrot.lane.b32.xlu1 %v4567_v1, %s7709_s23  ;;  %s7720_s23 = smov 24  }
0x2d3a   : > { %v6038_v5 = vpop.f32.mrf.mxu0 }
0x2d3c   : > { %v4570_v33 = vpop.f32.mrf.mxu0 }
0x2d3e   : > { %v6039_v6 = vpop.f32.mrf.mxu0 }
0x2d5d   : > { %v4679_v55 = vpop.f32.mrf.mxu0 }
0x2d5e   : > { %4802 = vrot.lane.b32.xlu0 %v4679_v55, %s7710_s26 }
0x2d5f   : > { %v6050_v56 = vpop.f32.mrf.mxu0 }
0x2d61   : > { %v4682_v57 = vpop.f32.mrf.mxu0 }
0x2d62   : > { %v6228_v57 = vld [vmem:[%s7722_s5 + $0x8] sm:$0xff]  }
0x2d63   : > { %v6051_v58 = vpop.f32.mrf.mxu0 }
0x2d64   : > { %v6229_v58 = vld [vmem:[%s7722_s5] sm:$0xff]  }
0x2d67   : > { %v4791_v59 = vpop.f32.mrf.mxu0 }
0x2d68   : > { %4806 = vrot.lane.b32.xlu1 %v4791_v59, %s7720_s23  ;;  %s7726_s23 = sld [smem:[#allocation25_spill]] }
0x2d69   : > { %v6062_v24 = vpop.f32.mrf.mxu0 }
0x2d6b   : > { %v4794_v21 = vpop.f32.mrf.mxu0 }
0x2d6d   : > { %v6063_v25 = vpop.f32.mrf.mxu0 }
0x2d6e   : > { %s7561_s26 = scalar_lea.hbm %s7726_s23, %s5493_s2 }
0x2dab   : > { %v4799_v17 = vpop.permute.xlu1 %4798 }
0x2dac   : > { %v4809_v60 = vsel %vm827_vm4, %v4455_v52, %v4799_v17  ;;  %v5488_v17 = vld [vmem:[%s7621_s19 + $0x3] ss:$0 sm:$0xff] }
0x2dd0   : > { %v4803_v26 = vpop.permute.xlu0 %4802 }
0x2dd1   : > { %v4810_v18 = vsel %vm1760_vm10, %v4809_v60, %v4803_v26  ;;  %v5489_v60 = vld [vmem:[%s7622_s20 + $0x3] ss:$0 sm:$0xff] }
0x2dda   : > { %v4807_v61 = vpop.permute.xlu1 %4806 }
0x2ddb   : > { %v4811_v62 = vsel %vm1763_vm11, %v4810_v18, %v4807_v61 }
0x2ddc   : > { %v4817_v63 = vpack.c.bf16 %v4811_v62, %v4811_v62 }
0x2dde   : > { %6069 = vmatmul.mubr.msk.bf16.vlgmr.msra.gmra.mxu1 %vm777_vm3, %v4817_v63 }
0x2ddf   : > { %6088 = vmatprep.mubr.msk.bf16.mxu1 %vm6413_vm1, %v6412_v2  ;;  %6081 = vmatpush3.bf16.msra.mxu1 %v6224_v32 }
0x2de0   : > { %6082 = vmatprep.subr.bf16.mxu1 %v6412_v2 }
0x2de3   : > { %6083 = vmatpush3.bf16.msra.mxu1 %v6225_v34 }
0x2de4   : > { %6084 = vmatprep.subr.bf16.mxu1 %v6412_v2 }
0x2de7   : > { %6085 = vmatpush3.bf16.msra.mxu1 %v6226_v45 }
0x2de8   : > { %6086 = vmatprep.subr.bf16.mxu1 %v6412_v2 }
0x2deb   : > { %6087 = vmatpush3.bf16.msra.mxu1 %v6227_v27 }
0x2e9e   : > { %v4875_v3 = vpop.f32.mrf.mxu1 }
0x2e9f   : > { %v4876_v4 = vadd.f32 %v5454_v0, %v4875_v3 }
0x2ea0   : > { %v6070_v49 = vpop.f32.mrf.mxu1 }
0x2ea1   : > { %v4881_v9 = vadd.f32 %v4876_v4, %v7386_v15  ;;  %v6223_v15 = vld [vmem:[%s7617_s15 + $0x30] sm:$0xff]  }
0x2ea2   : > { %v4878_v10 = vpop.f32.mrf.mxu1  ;;  %6075 = vmatpush3.bf16.msra.mxu0 %v6223_v15 }
0x2ea3   : > { %v4886_v12 = vsel %vm4065_vm6, %v4881_v9, 0.0  ;;  %6092 = vmatprep.subr.bf16.mxu0 %v6412_v2 }
0x2ea4   : > { %4887 = vadd.xlane.f32.xlu0 %v4886_v12  ;;  %v6071_v13 = vpop.f32.mrf.mxu1 }
0x2f2d   : > { %v4888_v16 = vpop.xlane.xlu0 %4887 }
0x2f2e   : > { %v4889_v22 = vmul.f32 0.03125, %v4888_v16 }
0x2f30   : > { %v4890_v23 = vsub.f32 %v4881_v9, %v4889_v22 }
0x2f32   : > { %v4891_v29 = vmul.f32 %v4890_v23, %v4890_v23 }
0x2f34   : > { %v4892_v30 = vsel %vm4065_vm6, %v4891_v29, 0.0 }
0x2f35   : > { %4893 = vadd.xlane.f32.xlu1 %v4892_v30 }
0x2fbe   : > { %v4894_v36 = vpop.xlane.xlu1 %4893 }
0x2fbf   : > { %v4895_v37 = vmul.f32 0.03125, %v4894_v36 }
0x2fc1   : > { %v4896_v39 = vadd.f32 1e-05, %v4895_v37 }
0x2fc3   : > { %6346 = vrsqrt.f32 %v4896_v39 }
0x2fd0   : > { %v6347_v40 = vpop.eup %6346 }
0x2fd1   : > { %v4898_v42 = vmul.f32 %v6347_v40, %v4890_v23 }
0x2fd3   : > { %v4905_v44 = vmul.f32 %v5460_v41, %v4898_v42 }
0x2fd5   : > { %v4912_v28 = vadd.f32 %v5461_v19, %v4905_v44 }
0x2fd7   : > { %v4918_v43 = vpack.c.bf16 %v4912_v28, %v4912_v28 }
0x2fd9   : > { %6077 = vmatmul.mubr.msk.bf16.vlgmr.msra.gmra.mxu0 %vm777_vm3, %v4918_v43 }
0x2fda   : > { %6096 = vmatprep.mubr.msk.bf16.mxu0 %vm6413_vm1, %v6412_v2  ;;  %6093 = vmatpush3.bf16.msra.mxu0 %v6228_v57  ;;  %vm5169_vm1 = vcmask 32768  }
0x2fdb   : > { %6094 = vmatprep.subr.bf16.mxu0 %v6412_v2 }
0x2fde   : > { %6095 = vmatpush3.bf16.msra.mxu0 %v6229_v58 }
0x3099   : > { %v4976_v46 = vpop.f32.mrf.mxu0 }
0x309a   : > { %v4977_v47 = vadd.f32 %v5467_v31, %v4976_v46 }
0x309b   : > { %v6078_v7 = vpop.f32.mrf.mxu0 }
0x309c   : > { %v4982_v35 = vmax.f32 %v4977_v47, 0.0 }
0x309d   : > { %v4979_v48 = vpop.f32.mrf.mxu0 }
0x309e   : > { %v4992_v51 = vpack.c.bf16 %v4982_v35, %v4982_v35 }
0x309f   : > { %v6079_v8 = vpop.f32.mrf.mxu0 }
0x30a0   : > { %6089 = vmatmul.mubr.msk.bf16.vlgmr.msra.gmra.mxu1 %vm1991_vm12, %v4992_v51 }
0x3160   : > { %v5062_v52 = vpop.f32.mrf.mxu1 }
0x3161   : > { %v5063_v53 = vadd.f32 %v5480_v50, %v5062_v52 }
0x3162   : > { %v6090_v20 = vpop.f32.mrf.mxu1 }
0x3163   : > { %v5068_v14 = vadd.f32 %v5063_v53, %v4912_v28 }
0x3164   : > { %v5065_v1 = vpop.f32.mrf.mxu1 }
0x3165   : > { %v5073_v5 = vsel %vm4065_vm6, %v5068_v14, 0.0 }
0x3166   : > { %5074 = vadd.xlane.f32.xlu0 %v5073_v5  ;;  %v6091_v33 = vpop.f32.mrf.mxu1 }
0x31ef   : > { %v5075_v6 = vpop.xlane.xlu0 %5074 }
0x31f0   : > { %v5076_v38 = vmul.f32 0.03125, %v5075_v6 }
0x31f2   : > { %v5077_v54 = vsub.f32 %v5068_v14, %v5076_v38 }
0x31f4   : > { %v5078_v55 = vmul.f32 %v5077_v54, %v5077_v54 }
0x31f6   : > { %v5079_v56 = vsel %vm4065_vm6, %v5078_v55, 0.0 }
0x31f7   : > { %5080 = vadd.xlane.f32.xlu0 %v5079_v56 }
0x3280   : > { %v5081_v59 = vpop.xlane.xlu0 %5080 }
0x3281   : > { %v5082_v24 = vmul.f32 0.03125, %v5081_v59 }
0x3283   : > { %v5083_v21 = vadd.f32 1e-05, %v5082_v24 }
0x3285   : > { %6348 = vrsqrt.f32 %v5083_v21 }
0x3292   : > { %v6349_v25 = vpop.eup %6348 }
0x3293   : > { %v5085_v26 = vmul.f32 %v6349_v25, %v5077_v54 }
0x3295   : > { %v5092_v18 = vmul.f32 %v5488_v17, %v5085_v26 }
0x3297   : > { %v5099_v61 = vadd.f32 %v5489_v60, %v5092_v18 }
0x3299   : > { %v5100_v2 = vsel %vm4065_vm6, %v5099_v61, 0.0 }
0x329a   : > { %v5101_v62 = vrot.slane %v5100_v2, 4 }
0x329c   : > { %v5102_v63 = vadd.f32 %v5101_v62, %v5100_v2 }
0x329e   : > { %v5103_v0 = vrot.slane %v5102_v63, 2 }
0x32a0   : > { %v5104_v3 = vadd.f32 %v5103_v0, %v5102_v63 }
0x32a2   : > { %v5105_v4 = vrot.slane %v5104_v3, 1 }
0x32a4   : > { %v5106_v49 = vadd.f32 %v5105_v4, %v5104_v3 }
0x32a6   : > { %v5108_v9 = vmul.f32 0.5, %v5106_v49 }
0x32a8   : > { %v5113_v10 = vpack.c.bf16 %v5108_v9, %v5108_v9 }
0x32aa   : > { %6097 = vmatmul.mubr.msk.bf16.vlgmr.msra.gmra.mxu0 %vm777_vm3, %v5113_v10 }
0x336a   : > { %v5163_v12 = vpop.f32.mrf.mxu0 }
0x336b   : > { %5170 = vst.msk [vmem:[%s674_s24] sm:$0x1] %vm5169_vm1, %v5163_v12 }
0x336c   : > { %v6098_v13 = vpop.f32.mrf.mxu0 }
0x336d   : > { %6363 = shalt.err (!%p6360_p3)
}
0x336e   : > { %s6364_s25 = scalar_lea.hbm %s7561_s26, 16  ;;  %s6368_s14 = scalar_lea.hbm %s7726_s23, 32 }
0x336f   : > { %p6365_p4 = scmp.ne.s32.totalorder %s7561_s26, %s6364_s25  ;;  %p6369_p9 = scmp.lt.s32.totalorder %s7561_s26, %s7726_s23 }
0x3370   : > { %p6370_p10 = scmp.lt.s32.totalorder %s6368_s14, %s6364_s25 }
0x3371   : > { %p6366_p7 = pnand %p6365_p4, %p6581_p5 }
0x3372   : > { %p6371_p11 = por %p6370_p10, %p6369_p9 }
0x3373   : > { %p6367_p8 = pneg %p6366_p7 }
0x3375   : > { %p6372_p12 = pnand %p6371_p11, %p6367_p8 }
0x3377   : > { %6375 = shalt.err (!%p6372_p12)
}
0x3378   : > { %6100 = dma.vmem_to_hbm [thread:$0]  (%p6581_p5), %s7563_s29, 16, %s7561_s26, %s5172_s30   ;;  %v5166_v16 = vpop.f32.mrf.mxu0 }
0x337a   : > { %v6099_v22 = vpop.f32.mrf.mxu0 }
0x337b PF: > { %s7727_s21 = sld [smem:[#allocation9_spill]] }
0x337c   : > { %s7728_s2 = sld [smem:[#allocation6_spill]] }
0x3381   : > { %p6106_p13 = scmp.ge.s32.totalorder %s7727_s21, 2 }
0x3382   : > { %s5196_s4 = sand.u32 1, %s7728_s2  }
0x3383   : > { %p6103_p0 = pnand %p6106_p13, %p6585_p6  ;;  %s5197_s22 = scalar_lea.sflag [#allocation4], %s5196_s4 }
0x3385   : > { %p6104_p1 = pneg %p6103_p0 }
0x3387   : > { %6393 = dma.done.wait (%p6104_p1), %s5197_s22, 16  }
0x3388   : > { %6395 = vsyncadd (%p6104_p1), %s5197_s22, 4294967280  ;;  %s7730_s28 = sld [smem:[#allocation11_spill]] }
0x3389   : > { %s7731_s26 = sld [smem:[#allocation7_spill]] }
0x338a   : > { %s7732_s27 = sld [smem:[#allocation8_spill]] }
0x338b   : > { %s7733_s3 = sld [smem:[#allocation12_spill]] }
0x338e   : > { %p33_p5 = scmp.ge.s32.totalorder %s7730_s28, 4  }
0x3390   :  { %35 = sbr.rel (!%p33_p5) target bundleno = 15 (0xf), region = 181 }
0x3395   :  { %5201 = vsyncpa [#allocation4], 1 }
0x3396   :  { %5203 = vsyncpa [#allocation4 + $0x1], 1 }

</bundles_post_ra>
